<compile_context>
chip_gen: v7x
topology: tpu7x:2x2x1
jax: 0.10.0
libtpu: 0.0.40
codegen_flags: <defaults>
</compile_context>

<pallas_src>
import jax
import jax.numpy as jnp
from jax.experimental import pallas as pl
from jax.experimental.pallas import tpu as pltpu


def _round_up(x, m):
    return (x + m - 1) // m * m


# ---------------------------------------------------------------------------
# Pallas kernel: 3x3 conv (padding=1) + bias (+ fused input BN-affine+ReLU)
# with BatchNorm batch-stat (sum / sum-of-squares) epilogue outputs.
# ---------------------------------------------------------------------------

def _make_conv3x3_kernel(nb, H, W, Wp, Cin, Cout, fuse_input_bn_relu):
    M = nb * H * W

    def kernel(*refs):
        if fuse_input_bn_relu:
            (x_ref, sc_ref, sh_ref, w_ref, b_ref,
             z_ref, sum_ref, ssq_ref, xp_ref) = refs
        else:
            x_ref, w_ref, b_ref, z_ref, sum_ref, ssq_ref, xp_ref = refs

        # --- prologue: optional BN affine + ReLU (f32), single cast to bf16.
        if fuse_input_bn_relu:
            xv = x_ref[...].astype(jnp.float32)                   # (nb,H,W,Cin)
            sc = sc_ref[...].reshape(1, 1, 1, Cin)
            sh = sh_ref[...].reshape(1, 1, 1, Cin)
            xv = jnp.maximum(xv * sc + sh, 0.0).astype(jnp.bfloat16)
        else:
            xv = x_ref[...]                                       # already bf16

        # Zero only the 1-pixel border (the interior store below never touches
        # it).  Re-done each step so each TensorCore's private scratch is valid
        # even when the "parallel" grid axis is split across cores.
        zrow = jnp.zeros((nb, 1, Wp, Cin), jnp.bfloat16)
        zcol = jnp.zeros((nb, H + 2, 1, Cin), jnp.bfloat16)
        xp_ref[:, 0:1, :, :] = zrow
        xp_ref[:, H + 1:H + 2, :, :] = zrow
        xp_ref[:, :, 0:1, :] = zcol
        xp_ref[:, :, W + 1:W + 2, :] = zcol

        # Interior = (activated) input; border stays exactly zero, matching
        # torch's zero padding applied AFTER relu(bn(.)).
        xp_ref[:, 1:H + 1, 1:W + 1, :] = xv

        # im2col: concatenate the 9 shifted windows along channels and issue a
        # single MXU dot with K = 9*Cin (bf16 operands, f32 accumulation).
        taps = []
        for ky in range(3):
            for kx in range(3):
                taps.append(
                    xp_ref[:, ky:ky + H, kx:kx + W, :].reshape(M, Cin))
        x9 = jnp.concatenate(taps, axis=-1)                       # (M, 9*Cin)
        acc = jnp.dot(x9, w_ref[...], preferred_element_type=jnp.float32)
        z = acc + b_ref[...]                                      # (M, Cout) f32

        z_ref[...] = z.reshape(nb, H * W, Cout).astype(z_ref.dtype)
        # Per-block channel sums for BatchNorm batch statistics (f32 epilogue).
        sum_ref[...] = jnp.sum(z, axis=0).reshape(1, 1, Cout)
        ssq_ref[...] = jnp.sum(z * z, axis=0).reshape(1, 1, Cout)

    return kernel


# ---------------------------------------------------------------------------
# Kernel wrapper
# ---------------------------------------------------------------------------

def conv3x3_bn_stats(x_nhwc, w9, bias, in_scale=None, in_shift=None,
                     out_dtype=jnp.bfloat16, block_images=1):
    """3x3 conv, padding=1, bias, optional fused relu(x*scale+shift) prologue.

    x_nhwc: (N, H, W, Cin) bf16.     w9: (9*Cin, Cout) bf16 (tap-major rows).
    Returns z (N, H*W, Cout), per-block channel sum / sumsq (NB, 1, Cout) f32.
    """
    x_nhwc = x_nhwc.astype(jnp.bfloat16)
    N, H, W, Cin = x_nhwc.shape
    Cout = w9.shape[-1]
    nb = block_images
    assert N % nb == 0
    NB = N // nb
    Wp = _round_up(W + 2, 8)
    fuse = in_scale is not None

    kernel = _make_conv3x3_kernel(nb, H, W, Wp, Cin, Cout, fuse)

    in_specs = [pl.BlockSpec((nb, H, W, Cin), lambda b: (b, 0, 0, 0))]
    args = [x_nhwc]
    if fuse:
        in_specs += [pl.BlockSpec((1, Cin), lambda b: (0, 0)),
                     pl.BlockSpec((1, Cin), lambda b: (0, 0))]
        args += [in_scale.reshape(1, Cin).astype(jnp.float32),
                 in_shift.reshape(1, Cin).astype(jnp.float32)]
    in_specs += [pl.BlockSpec((9 * Cin, Cout), lambda b: (0, 0)),
                 pl.BlockSpec((1, Cout), lambda b: (0, 0))]
    args += [w9, bias.reshape(1, Cout).astype(jnp.float32)]

    out_shape = (jax.ShapeDtypeStruct((N, H * W, Cout), out_dtype),
                 jax.ShapeDtypeStruct((NB, 1, Cout), jnp.float32),
                 jax.ShapeDtypeStruct((NB, 1, Cout), jnp.float32))
    out_specs = [pl.BlockSpec((nb, H * W, Cout), lambda b: (b, 0, 0)),
                 pl.BlockSpec((1, 1, Cout), lambda b: (b, 0, 0)),
                 pl.BlockSpec((1, 1, Cout), lambda b: (b, 0, 0))]

    # Scoped-VMEM budget from the real block footprint (2x headroom).
    out_bytes = jnp.dtype(out_dtype).itemsize
    footprint = (2 * nb * H * W * Cin * 2            # input block x2 bufs (bf16)
                 + 2 * 9 * Cin * Cout * 2            # weights x2 bufs
                 + nb * (H + 2) * Wp * Cin * 2       # padded bf16 scratch
                 + nb * H * W * (9 * Cin * 2 + Cout * 4)  # im2col slab + f32 acc
                 + 2 * nb * H * W * Cout * out_bytes      # z output x2 bufs
                 + 16 * (Cout + Cin) * 4)                 # bias/scale/shift/sums
    vmem_limit = int(min(max(2 * footprint, 32 << 20), 64 << 20))

    return pl.pallas_call(
        kernel,
        out_shape=out_shape,
        grid_spec=pltpu.PrefetchScalarGridSpec(
            num_scalar_prefetch=0,
            grid=(NB,),
            in_specs=in_specs,
            out_specs=out_specs,
            scratch_shapes=[pltpu.VMEM((nb, H + 2, Wp, Cin), jnp.bfloat16)],
        ),
        compiler_params=pltpu.CompilerParams(
            dimension_semantics=("parallel",),
            vmem_limit_bytes=vmem_limit),
    )(*args)


# ---------------------------------------------------------------------------
# BatchNorm (training-mode batch stats) scale/shift from kernel-emitted sums
# ---------------------------------------------------------------------------

def _bn_scale_shift(sums, ssqs, count, gamma, beta, eps=1e-5):
    total = jnp.sum(sums, axis=0).reshape(-1)                     # (C,)
    total_sq = jnp.sum(ssqs, axis=0).reshape(-1)
    mean = total / count
    var = jnp.maximum(total_sq / count - mean * mean, 0.0)        # biased (train)
    scale = gamma * jax.lax.rsqrt(var + eps)
    shift = beta - mean * scale
    return scale, shift


def _pick_block_images(N, hw, target_m=256):
    """Smallest divisor of N whose block reaches target MXU M rows."""
    for nb in range(1, N + 1):
        if N % nb == 0 and nb * hw >= target_m:
            return nb
    return N


# ---------------------------------------------------------------------------
# down forward:  MaxPool2d(2) -> [Conv3x3 -> BN -> ReLU] x 2   (NCHW in / out)
# ---------------------------------------------------------------------------

def down_forward(params, x_nchw):
    x = jnp.transpose(x_nchw, (0, 2, 3, 1)).astype(jnp.float32)   # NHWC
    N, H2, W2, Cin = x.shape
    H, W = H2 // 2, W2 // 2

    pooled = x.reshape(N, H, 2, W, 2, Cin).max(axis=(2, 4))       # MaxPool2d(2)
    pooled = pooled.astype(jnp.bfloat16)

    Cout = params["w1"].shape[-1]
    count = N * H * W
    nb = _pick_block_images(N, H * W)

    # conv1 (+ bias); BN1 batch stats come from the kernel epilogue.
    z1, s1, q1 = conv3x3_bn_stats(pooled, params["w1"], params["b1"],
                                  out_dtype=jnp.bfloat16, block_images=nb)
    sc1, sh1 = _bn_scale_shift(s1, q1, count, params["g1"], params["be1"])

    # conv2 with BN1 affine + ReLU fused into its input prologue.
    z1 = z1.reshape(N, H, W, Cout)                                # free reshape
    z2, s2, q2 = conv3x3_bn_stats(z1, params["w2"], params["b2"],
                                  in_scale=sc1, in_shift=sh1,
                                  out_dtype=jnp.bfloat16, block_images=nb)
    sc2, sh2 = _bn_scale_shift(s2, q2, count, params["g2"], params["be2"])

    # Final BN2 affine + ReLU in plain jnp: XLA fuses it into the transpose.
    y = z2.reshape(N, H, W, Cout).astype(jnp.float32)
    y = jnp.maximum(y * sc2.reshape(1, 1, 1, Cout)
                    + sh2.reshape(1, 1, 1, Cout), 0.0)
    return jnp.transpose(y, (0, 3, 1, 2))                         # NCHW


# ---------------------------------------------------------------------------
# Deterministic parameter init (same shapes as the PyTorch module) + reference
# ---------------------------------------------------------------------------

def init_down_params(key, in_ch, out_ch):
    k1, k2, k3, k4 = jax.random.split(key, 4)

    def conv_init(kw, kb, cout, cin):
        fan_in = cin * 9
        w = jax.random.normal(kw, (cout, cin, 3, 3), jnp.float32) / jnp.sqrt(fan_in)
        b = jax.random.normal(kb, (cout,), jnp.float32) * 0.01
        return w, b

    w1, b1 = conv_init(k1, k2, out_ch, in_ch)
    w2, b2 = conv_init(k3, k4, out_ch, out_ch)
    return dict(w1=w1, b1=b1, g1=jnp.ones(out_ch, jnp.float32),
                be1=jnp.zeros(out_ch, jnp.float32),
                w2=w2, b2=b2, g2=jnp.ones(out_ch, jnp.float32),
                be2=jnp.zeros(out_ch, jnp.float32))


def _pack_w(w_oihw):
    """Torch (Cout,Cin,3,3) f32 -> kernel (9*Cin, Cout) bf16, tap-major rows."""
    cout, cin = w_oihw.shape[0], w_oihw.shape[1]
    return (jnp.transpose(w_oihw, (2, 3, 1, 0))        # (kh, kw, Cin, Cout)
            .reshape(9 * cin, cout).astype(jnp.bfloat16))


def pack_params(raw):
    return dict(
        w1=_pack_w(raw["w1"]), b1=raw["b1"], g1=raw["g1"], be1=raw["be1"],
        w2=_pack_w(raw["w2"]), b2=raw["b2"], g2=raw["g2"], be2=raw["be2"],
    )


def down_reference(raw, x_nchw, eps=1e-5):
    """Pure-JAX f32 reference of the PyTorch module (training-mode BN)."""
    N, C, H2, W2 = x_nchw.shape
    x = x_nchw.reshape(N, C, H2 // 2, 2, W2 // 2, 2).max(axis=(3, 5))

    def conv_bn_relu(x, w, b, g, be):
        y = jax.lax.conv_general_dilated(
            x, w, window_strides=(1, 1), padding=((1, 1), (1, 1)),
            dimension_numbers=("NCHW", "OIHW", "NCHW"))
        y = y + b.reshape(1, -1, 1, 1)
        mean = y.mean(axis=(0, 2, 3), keepdims=True)
        var = y.var(axis=(0, 2, 3), keepdims=True)
        y = (y - mean) * jax.lax.rsqrt(var + eps) * g.reshape(1, -1, 1, 1) \
            + be.reshape(1, -1, 1, 1)
        return jnp.maximum(y, 0.0)

    x = conv_bn_relu(x, raw["w1"], raw["b1"], raw["g1"], raw["be1"])
    x = conv_bn_relu(x, raw["w2"], raw["b2"], raw["g2"], raw["be2"])
    return x


# ---------------------------------------------------------------------------

if __name__ == "__main__":
    batch, in_ch, out_ch, spatial = 2, 4, 8, 16

    key = jax.random.PRNGKey(0)
    k_param, k_input = jax.random.split(key)

    raw = init_down_params(k_param, in_ch, out_ch)
    params = pack_params(raw)
    x = jax.random.normal(k_input, (batch, in_ch, spatial, spatial), jnp.float32)

    fwd = jax.jit(down_forward)
    out = jax.block_until_ready(fwd(params, x))

    assert out.shape == (batch, out_ch, spatial // 2, spatial // 2)
    assert bool(jnp.all(jnp.isfinite(out)))
    assert bool(jnp.all(out >= 0.0))                 # ReLU output

    # Correctness vs. f32 reference (loose tolerance for bf16 operands/writeback).
    ref = down_reference(raw, x)
    max_err = float(jnp.max(jnp.abs(out - ref)))
    mean_err = float(jnp.mean(jnp.abs(out - ref)))
    assert max_err < 2e-1 and mean_err < 5e-2, (max_err, mean_err)

    print("KERNEL_OK")
</pallas_src>

<mosaic_0001>
module attributes {stable_mosaic.version = 11 : i64} {
  func.func @kernel(%arg0: i32, %arg1: memref<2x8x8x4xbf16, #tpu.memory_space<vmem>>, %arg2: memref<36x8xbf16, #tpu.memory_space<vmem>>, %arg3: memref<1x8xf32, #tpu.memory_space<vmem>>, %arg4: memref<2x64x8xbf16, #tpu.memory_space<vmem>>, %arg5: memref<1x1x8xf32, #tpu.memory_space<vmem>>, %arg6: memref<1x1x8xf32, #tpu.memory_space<vmem>>, %arg7: memref<2x10x16x4xbf16, #tpu.memory_space<vmem>>) attributes {dimension_semantics = [#tpu.dimension_semantics<parallel>], iteration_bounds = array<i64: 1>, scalar_prefetch = 0 : i64, scratch_operands = 1 : i64, tpu.core_type = #tpu.core_type<tc>, window_params = [{transform_indices = @transform_0, window_bounds = array<i64: 2, 8, 8, 4>}, {pipeline_mode = #tpu.pipeline_mode<synchronous>, transform_indices = @transform_1, window_bounds = array<i64: 36, 8>}, {pipeline_mode = #tpu.pipeline_mode<synchronous>, transform_indices = @transform_2, window_bounds = array<i64: 1, 8>}, {transform_indices = @transform_3, window_bounds = array<i64: 2, 64, 8>}, {transform_indices = @transform_4, window_bounds = array<i64: 1, 1, 8>}, {transform_indices = @transform_5, window_bounds = array<i64: 1, 1, 8>}]} {
    %c0 = arith.constant 0 : index
    %c0_0 = arith.constant 0 : index
    %c0_1 = arith.constant 0 : index
    %c0_2 = arith.constant 0 : index
    %0 = vector.load %arg1[%c0, %c0_0, %c0_1, %c0_2] : memref<2x8x8x4xbf16, #tpu.memory_space<vmem>>, vector<2x8x8x4xbf16>
    %cst = arith.constant 0.000000e+00 : bf16
    %1 = vector.broadcast %cst : bf16 to vector<2x1x16x4xbf16>
    %cst_3 = arith.constant 0.000000e+00 : bf16
    %2 = vector.broadcast %cst_3 : bf16 to vector<2x10x1x4xbf16>
    %c0_4 = arith.constant 0 : index
    %c0_5 = arith.constant 0 : index
    %c0_6 = arith.constant 0 : index
    %c0_7 = arith.constant 0 : index
    %3 = vector.load %arg7[%c0_4, %c0_5, %c0_6, %c0_7] : memref<2x10x16x4xbf16, #tpu.memory_space<vmem>>, vector<2x1x16x4xbf16>
    tpu.vector_store %arg7[%c0_4, %c0_5, %c0_6, %c0_7], %1 {strides = array<i32>} : memref<2x10x16x4xbf16, #tpu.memory_space<vmem>>, vector<2x1x16x4xbf16>,
    %c0_8 = arith.constant 0 : index
    %c9 = arith.constant 9 : index
    %c0_9 = arith.constant 0 : index
    %c0_10 = arith.constant 0 : index
    %4 = vector.load %arg7[%c0_8, %c9, %c0_9, %c0_10] : memref<2x10x16x4xbf16, #tpu.memory_space<vmem>>, vector<2x1x16x4xbf16>
    tpu.vector_store %arg7[%c0_8, %c9, %c0_9, %c0_10], %1 {strides = array<i32>} : memref<2x10x16x4xbf16, #tpu.memory_space<vmem>>, vector<2x1x16x4xbf16>,
    %c0_11 = arith.constant 0 : index
    %c0_12 = arith.constant 0 : index
    %c0_13 = arith.constant 0 : index
    %c0_14 = arith.constant 0 : index
    %5 = vector.load %arg7[%c0_11, %c0_12, %c0_13, %c0_14] : memref<2x10x16x4xbf16, #tpu.memory_space<vmem>>, vector<2x10x1x4xbf16>
    tpu.vector_store %arg7[%c0_11, %c0_12, %c0_13, %c0_14], %2 {strides = array<i32>} : memref<2x10x16x4xbf16, #tpu.memory_space<vmem>>, vector<2x10x1x4xbf16>,
    %c0_15 = arith.constant 0 : index
    %c0_16 = arith.constant 0 : index
    %c9_17 = arith.constant 9 : index
    %c0_18 = arith.constant 0 : index
    %6 = vector.load %arg7[%c0_15, %c0_16, %c9_17, %c0_18] : memref<2x10x16x4xbf16, #tpu.memory_space<vmem>>, vector<2x10x1x4xbf16>
    tpu.vector_store %arg7[%c0_15, %c0_16, %c9_17, %c0_18], %2 {strides = array<i32>} : memref<2x10x16x4xbf16, #tpu.memory_space<vmem>>, vector<2x10x1x4xbf16>,
    %c0_19 = arith.constant 0 : index
    %c1 = arith.constant 1 : index
    %c1_20 = arith.constant 1 : index
    %c0_21 = arith.constant 0 : index
    %7 = vector.load %arg7[%c0_19, %c1, %c1_20, %c0_21] : memref<2x10x16x4xbf16, #tpu.memory_space<vmem>>, vector<2x8x8x4xbf16>
    tpu.vector_store %arg7[%c0_19, %c1, %c1_20, %c0_21], %0 {strides = array<i32>} : memref<2x10x16x4xbf16, #tpu.memory_space<vmem>>, vector<2x8x8x4xbf16>,
    %c0_22 = arith.constant 0 : index
    %c0_23 = arith.constant 0 : index
    %c0_24 = arith.constant 0 : index
    %c0_25 = arith.constant 0 : index
    %8 = vector.load %arg7[%c0_22, %c0_23, %c0_24, %c0_25] : memref<2x10x16x4xbf16, #tpu.memory_space<vmem>>, vector<2x8x8x4xbf16>
    %9 = vector.shape_cast %8 : vector<2x8x8x4xbf16> to vector<128x4xbf16>
    %c0_26 = arith.constant 0 : index
    %c0_27 = arith.constant 0 : index
    %c1_28 = arith.constant 1 : index
    %c0_29 = arith.constant 0 : index
    %10 = vector.load %arg7[%c0_26, %c0_27, %c1_28, %c0_29] : memref<2x10x16x4xbf16, #tpu.memory_space<vmem>>, vector<2x8x8x4xbf16>
    %11 = vector.shape_cast %10 : vector<2x8x8x4xbf16> to vector<128x4xbf16>
    %c0_30 = arith.constant 0 : index
    %c0_31 = arith.constant 0 : index
    %c2 = arith.constant 2 : index
    %c0_32 = arith.constant 0 : index
    %12 = vector.load %arg7[%c0_30, %c0_31, %c2, %c0_32] : memref<2x10x16x4xbf16, #tpu.memory_space<vmem>>, vector<2x8x8x4xbf16>
    %13 = vector.shape_cast %12 : vector<2x8x8x4xbf16> to vector<128x4xbf16>
    %c0_33 = arith.constant 0 : index
    %c1_34 = arith.constant 1 : index
    %c0_35 = arith.constant 0 : index
    %c0_36 = arith.constant 0 : index
    %14 = vector.load %arg7[%c0_33, %c1_34, %c0_35, %c0_36] : memref<2x10x16x4xbf16, #tpu.memory_space<vmem>>, vector<2x8x8x4xbf16>
    %15 = vector.shape_cast %14 : vector<2x8x8x4xbf16> to vector<128x4xbf16>
    %c0_37 = arith.constant 0 : index
    %c1_38 = arith.constant 1 : index
    %c1_39 = arith.constant 1 : index
    %c0_40 = arith.constant 0 : index
    %16 = vector.load %arg7[%c0_37, %c1_38, %c1_39, %c0_40] : memref<2x10x16x4xbf16, #tpu.memory_space<vmem>>, vector<2x8x8x4xbf16>
    %17 = vector.shape_cast %16 : vector<2x8x8x4xbf16> to vector<128x4xbf16>
    %c0_41 = arith.constant 0 : index
    %c1_42 = arith.constant 1 : index
    %c2_43 = arith.constant 2 : index
    %c0_44 = arith.constant 0 : index
    %18 = vector.load %arg7[%c0_41, %c1_42, %c2_43, %c0_44] : memref<2x10x16x4xbf16, #tpu.memory_space<vmem>>, vector<2x8x8x4xbf16>
    %19 = vector.shape_cast %18 : vector<2x8x8x4xbf16> to vector<128x4xbf16>
    %c0_45 = arith.constant 0 : index
    %c2_46 = arith.constant 2 : index
    %c0_47 = arith.constant 0 : index
    %c0_48 = arith.constant 0 : index
    %20 = vector.load %arg7[%c0_45, %c2_46, %c0_47, %c0_48] : memref<2x10x16x4xbf16, #tpu.memory_space<vmem>>, vector<2x8x8x4xbf16>
    %21 = vector.shape_cast %20 : vector<2x8x8x4xbf16> to vector<128x4xbf16>
    %c0_49 = arith.constant 0 : index
    %c2_50 = arith.constant 2 : index
    %c1_51 = arith.constant 1 : index
    %c0_52 = arith.constant 0 : index
    %22 = vector.load %arg7[%c0_49, %c2_50, %c1_51, %c0_52] : memref<2x10x16x4xbf16, #tpu.memory_space<vmem>>, vector<2x8x8x4xbf16>
    %23 = vector.shape_cast %22 : vector<2x8x8x4xbf16> to vector<128x4xbf16>
    %c0_53 = arith.constant 0 : index
    %c2_54 = arith.constant 2 : index
    %c2_55 = arith.constant 2 : index
    %c0_56 = arith.constant 0 : index
    %24 = vector.load %arg7[%c0_53, %c2_54, %c2_55, %c0_56] : memref<2x10x16x4xbf16, #tpu.memory_space<vmem>>, vector<2x8x8x4xbf16>
    %25 = vector.shape_cast %24 : vector<2x8x8x4xbf16> to vector<128x4xbf16>
    %26 = tpu.concatenate %9, %11, %13, %15, %17, %19, %21, %23, %25 in 1 : vector<128x4xbf16>, vector<128x4xbf16>, vector<128x4xbf16>, vector<128x4xbf16>, vector<128x4xbf16>, vector<128x4xbf16>, vector<128x4xbf16>, vector<128x4xbf16>, vector<128x4xbf16> -> vector<128x36xbf16>
    %c0_57 = arith.constant 0 : index
    %c0_58 = arith.constant 0 : index
    %27 = vector.load %arg2[%c0_57, %c0_58] : memref<36x8xbf16, #tpu.memory_space<vmem>>, vector<36x8xbf16>
    %cst_59 = arith.constant dense<0.000000e+00> : vector<128x8xf32>
    %28 = tpu.matmul %26, %27, %cst_59 {dimension_numbers = #tpu.dot_dimension_numbers<[1], [0], [0], [1], [0, 0, 1, 1], [], []>} : vector<128x36xbf16>, vector<36x8xbf16>, vector<128x8xf32> -> vector<128x8xf32>
    %c0_60 = arith.constant 0 : index
    %c0_61 = arith.constant 0 : index
    %29 = vector.load %arg3[%c0_60, %c0_61] : memref<1x8xf32, #tpu.memory_space<vmem>>, vector<1x8xf32>
    %30 = vector.broadcast %29 : vector<1x8xf32> to vector<128x8xf32>
    %31 = arith.addf %28, %30 : vector<128x8xf32>
    %32 = vector.shape_cast %31 : vector<128x8xf32> to vector<2x64x8xf32>
    %33 = arith.truncf %32 : vector<2x64x8xf32> to vector<2x64x8xbf16>
    %c0_62 = arith.constant 0 : index
    %c0_63 = arith.constant 0 : index
    %c0_64 = arith.constant 0 : index
    %34 = vector.load %arg4[%c0_62, %c0_63, %c0_64] : memref<2x64x8xbf16, #tpu.memory_space<vmem>>, vector<2x64x8xbf16>
    tpu.vector_store %arg4[%c0_62, %c0_63, %c0_64], %33 {strides = array<i32>} : memref<2x64x8xbf16, #tpu.memory_space<vmem>>, vector<2x64x8xbf16>,
    %cst_65 = arith.constant dense<0.000000e+00> : vector<8xf32>
    %35 = vector.multi_reduction <add>, %31, %cst_65 [0] : vector<128x8xf32> to vector<8xf32>
    %36 = vector.shape_cast %35 : vector<8xf32> to vector<1x1x8xf32>
    %c0_66 = arith.constant 0 : index
    %c0_67 = arith.constant 0 : index
    %c0_68 = arith.constant 0 : index
    %37 = vector.load %arg5[%c0_66, %c0_67, %c0_68] : memref<1x1x8xf32, #tpu.memory_space<vmem>>, vector<1x1x8xf32>
    tpu.vector_store %arg5[%c0_66, %c0_67, %c0_68], %36 {strides = array<i32>} : memref<1x1x8xf32, #tpu.memory_space<vmem>>, vector<1x1x8xf32>,
    %38 = arith.mulf %31, %31 : vector<128x8xf32>
    %cst_69 = arith.constant dense<0.000000e+00> : vector<8xf32>
    %39 = vector.multi_reduction <add>, %38, %cst_69 [0] : vector<128x8xf32> to vector<8xf32>
    %40 = vector.shape_cast %39 : vector<8xf32> to vector<1x1x8xf32>
    %c0_70 = arith.constant 0 : index
    %c0_71 = arith.constant 0 : index
    %c0_72 = arith.constant 0 : index
    %41 = vector.load %arg6[%c0_70, %c0_71, %c0_72] : memref<1x1x8xf32, #tpu.memory_space<vmem>>, vector<1x1x8xf32>
    tpu.vector_store %arg6[%c0_70, %c0_71, %c0_72], %40 {strides = array<i32>} : memref<1x1x8xf32, #tpu.memory_space<vmem>>, vector<1x1x8xf32>,
    return
  }
  func.func @transform_0(%arg0: i32) -> (i32, i32, i32, i32) {
    %c0_i32 = arith.constant 0 : i32
    %c0_i32_0 = arith.constant 0 : i32
    %c0_i32_1 = arith.constant 0 : i32
    %c0_i32_2 = arith.constant 0 : i32
    return %arg0, %c0_i32, %c0_i32_0, %c0_i32_1 : i32, i32, i32, i32
  }
  func.func @transform_1(%arg0: i32) -> (i32, i32) {
    %c0_i32 = arith.constant 0 : i32
    %c0_i32_0 = arith.constant 0 : i32
    %c0_i32_1 = arith.constant 0 : i32
    return %c0_i32, %c0_i32_0 : i32, i32
  }
  func.func @transform_2(%arg0: i32) -> (i32, i32) {
    %c0_i32 = arith.constant 0 : i32
    %c0_i32_0 = arith.constant 0 : i32
    %c0_i32_1 = arith.constant 0 : i32
    return %c0_i32, %c0_i32_0 : i32, i32
  }
  func.func @transform_3(%arg0: i32) -> (i32, i32, i32) {
    %c0_i32 = arith.constant 0 : i32
    %c0_i32_0 = arith.constant 0 : i32
    %c0_i32_1 = arith.constant 0 : i32
    return %arg0, %c0_i32, %c0_i32_0 : i32, i32, i32
  }
  func.func @transform_4(%arg0: i32) -> (i32, i32, i32) {
    %c0_i32 = arith.constant 0 : i32
    %c0_i32_0 = arith.constant 0 : i32
    %c0_i32_1 = arith.constant 0 : i32
    return %arg0, %c0_i32, %c0_i32_0 : i32, i32, i32
  }
  func.func @transform_5(%arg0: i32) -> (i32, i32, i32) {
    %c0_i32 = arith.constant 0 : i32
    %c0_i32_0 = arith.constant 0 : i32
    %c0_i32_1 = arith.constant 0 : i32
    return %arg0, %c0_i32, %c0_i32_0 : i32, i32, i32
  }
}

module attributes {stable_mosaic.version = 11 : i64} {
  func.func @kernel(%arg0: i32, %arg1: memref<2x8x8x8xbf16, #tpu.memory_space<vmem>>, %arg2: memref<1x8xf32, #tpu.memory_space<vmem>>, %arg3: memref<1x8xf32, #tpu.memory_space<vmem>>, %arg4: memref<72x8xbf16, #tpu.memory_space<vmem>>, %arg5: memref<1x8xf32, #tpu.memory_space<vmem>>, %arg6: memref<2x64x8xbf16, #tpu.memory_space<vmem>>, %arg7: memref<1x1x8xf32, #tpu.memory_space<vmem>>, %arg8: memref<1x1x8xf32, #tpu.memory_space<vmem>>, %arg9: memref<2x10x16x8xbf16, #tpu.memory_space<vmem>>) attributes {dimension_semantics = [#tpu.dimension_semantics<parallel>], iteration_bounds = array<i64: 1>, scalar_prefetch = 0 : i64, scratch_operands = 1 : i64, tpu.core_type = #tpu.core_type<tc>, window_params = [{transform_indices = @transform_0, window_bounds = array<i64: 2, 8, 8, 8>}, {pipeline_mode = #tpu.pipeline_mode<synchronous>, transform_indices = @transform_1, window_bounds = array<i64: 1, 8>}, {pipeline_mode = #tpu.pipeline_mode<synchronous>, transform_indices = @transform_2, window_bounds = array<i64: 1, 8>}, {pipeline_mode = #tpu.pipeline_mode<synchronous>, transform_indices = @transform_3, window_bounds = array<i64: 72, 8>}, {pipeline_mode = #tpu.pipeline_mode<synchronous>, transform_indices = @transform_4, window_bounds = array<i64: 1, 8>}, {transform_indices = @transform_5, window_bounds = array<i64: 2, 64, 8>}, {transform_indices = @transform_6, window_bounds = array<i64: 1, 1, 8>}, {transform_indices = @transform_7, window_bounds = array<i64: 1, 1, 8>}]} {
    %c0 = arith.constant 0 : index
    %c0_0 = arith.constant 0 : index
    %c0_1 = arith.constant 0 : index
    %c0_2 = arith.constant 0 : index
    %0 = vector.load %arg1[%c0, %c0_0, %c0_1, %c0_2] : memref<2x8x8x8xbf16, #tpu.memory_space<vmem>>, vector<2x8x8x8xbf16>
    %1 = arith.extf %0 : vector<2x8x8x8xbf16> to vector<2x8x8x8xf32>
    %c0_3 = arith.constant 0 : index
    %c0_4 = arith.constant 0 : index
    %2 = vector.load %arg2[%c0_3, %c0_4] : memref<1x8xf32, #tpu.memory_space<vmem>>, vector<1x8xf32>
    %3 = vector.shape_cast %2 : vector<1x8xf32> to vector<1x1x1x8xf32>
    %c0_5 = arith.constant 0 : index
    %c0_6 = arith.constant 0 : index
    %4 = vector.load %arg3[%c0_5, %c0_6] : memref<1x8xf32, #tpu.memory_space<vmem>>, vector<1x8xf32>
    %5 = vector.shape_cast %4 : vector<1x8xf32> to vector<1x1x1x8xf32>
    %6 = vector.broadcast %3 : vector<1x1x1x8xf32> to vector<2x8x8x8xf32>
    %7 = arith.mulf %1, %6 : vector<2x8x8x8xf32>
    %8 = vector.broadcast %5 : vector<1x1x1x8xf32> to vector<2x8x8x8xf32>
    %9 = arith.addf %7, %8 : vector<2x8x8x8xf32>
    %cst = arith.constant 0.000000e+00 : f32
    %10 = vector.broadcast %cst : f32 to vector<2x8x8x8xf32>
    %11 = arith.maximumf %9, %10 : vector<2x8x8x8xf32>
    %12 = arith.truncf %11 : vector<2x8x8x8xf32> to vector<2x8x8x8xbf16>
    %cst_7 = arith.constant 0.000000e+00 : bf16
    %13 = vector.broadcast %cst_7 : bf16 to vector<2x1x16x8xbf16>
    %cst_8 = arith.constant 0.000000e+00 : bf16
    %14 = vector.broadcast %cst_8 : bf16 to vector<2x10x1x8xbf16>
    %c0_9 = arith.constant 0 : index
    %c0_10 = arith.constant 0 : index
    %c0_11 = arith.constant 0 : index
    %c0_12 = arith.constant 0 : index
    %15 = vector.load %arg9[%c0_9, %c0_10, %c0_11, %c0_12] : memref<2x10x16x8xbf16, #tpu.memory_space<vmem>>, vector<2x1x16x8xbf16>
    tpu.vector_store %arg9[%c0_9, %c0_10, %c0_11, %c0_12], %13 {strides = array<i32>} : memref<2x10x16x8xbf16, #tpu.memory_space<vmem>>, vector<2x1x16x8xbf16>,
    %c0_13 = arith.constant 0 : index
    %c9 = arith.constant 9 : index
    %c0_14 = arith.constant 0 : index
    %c0_15 = arith.constant 0 : index
    %16 = vector.load %arg9[%c0_13, %c9, %c0_14, %c0_15] : memref<2x10x16x8xbf16, #tpu.memory_space<vmem>>, vector<2x1x16x8xbf16>
    tpu.vector_store %arg9[%c0_13, %c9, %c0_14, %c0_15], %13 {strides = array<i32>} : memref<2x10x16x8xbf16, #tpu.memory_space<vmem>>, vector<2x1x16x8xbf16>,
    %c0_16 = arith.constant 0 : index
    %c0_17 = arith.constant 0 : index
    %c0_18 = arith.constant 0 : index
    %c0_19 = arith.constant 0 : index
    %17 = vector.load %arg9[%c0_16, %c0_17, %c0_18, %c0_19] : memref<2x10x16x8xbf16, #tpu.memory_space<vmem>>, vector<2x10x1x8xbf16>
    tpu.vector_store %arg9[%c0_16, %c0_17, %c0_18, %c0_19], %14 {strides = array<i32>} : memref<2x10x16x8xbf16, #tpu.memory_space<vmem>>, vector<2x10x1x8xbf16>,
    %c0_20 = arith.constant 0 : index
    %c0_21 = arith.constant 0 : index
    %c9_22 = arith.constant 9 : index
    %c0_23 = arith.constant 0 : index
    %18 = vector.load %arg9[%c0_20, %c0_21, %c9_22, %c0_23] : memref<2x10x16x8xbf16, #tpu.memory_space<vmem>>, vector<2x10x1x8xbf16>
    tpu.vector_store %arg9[%c0_20, %c0_21, %c9_22, %c0_23], %14 {strides = array<i32>} : memref<2x10x16x8xbf16, #tpu.memory_space<vmem>>, vector<2x10x1x8xbf16>,
    %c0_24 = arith.constant 0 : index
    %c1 = arith.constant 1 : index
    %c1_25 = arith.constant 1 : index
    %c0_26 = arith.constant 0 : index
    %19 = vector.load %arg9[%c0_24, %c1, %c1_25, %c0_26] : memref<2x10x16x8xbf16, #tpu.memory_space<vmem>>, vector<2x8x8x8xbf16>
    tpu.vector_store %arg9[%c0_24, %c1, %c1_25, %c0_26], %12 {strides = array<i32>} : memref<2x10x16x8xbf16, #tpu.memory_space<vmem>>, vector<2x8x8x8xbf16>,
    %c0_27 = arith.constant 0 : index
    %c0_28 = arith.constant 0 : index
    %c0_29 = arith.constant 0 : index
    %c0_30 = arith.constant 0 : index
    %20 = vector.load %arg9[%c0_27, %c0_28, %c0_29, %c0_30] : memref<2x10x16x8xbf16, #tpu.memory_space<vmem>>, vector<2x8x8x8xbf16>
    %21 = vector.shape_cast %20 : vector<2x8x8x8xbf16> to vector<128x8xbf16>
    %c0_31 = arith.constant 0 : index
    %c0_32 = arith.constant 0 : index
    %c1_33 = arith.constant 1 : index
    %c0_34 = arith.constant 0 : index
    %22 = vector.load %arg9[%c0_31, %c0_32, %c1_33, %c0_34] : memref<2x10x16x8xbf16, #tpu.memory_space<vmem>>, vector<2x8x8x8xbf16>
    %23 = vector.shape_cast %22 : vector<2x8x8x8xbf16> to vector<128x8xbf16>
    %c0_35 = arith.constant 0 : index
    %c0_36 = arith.constant 0 : index
    %c2 = arith.constant 2 : index
    %c0_37 = arith.constant 0 : index
    %24 = vector.load %arg9[%c0_35, %c0_36, %c2, %c0_37] : memref<2x10x16x8xbf16, #tpu.memory_space<vmem>>, vector<2x8x8x8xbf16>
    %25 = vector.shape_cast %24 : vector<2x8x8x8xbf16> to vector<128x8xbf16>
    %c0_38 = arith.constant 0 : index
    %c1_39 = arith.constant 1 : index
    %c0_40 = arith.constant 0 : index
    %c0_41 = arith.constant 0 : index
    %26 = vector.load %arg9[%c0_38, %c1_39, %c0_40, %c0_41] : memref<2x10x16x8xbf16, #tpu.memory_space<vmem>>, vector<2x8x8x8xbf16>
    %27 = vector.shape_cast %26 : vector<2x8x8x8xbf16> to vector<128x8xbf16>
    %c0_42 = arith.constant 0 : index
    %c1_43 = arith.constant 1 : index
    %c1_44 = arith.constant 1 : index
    %c0_45 = arith.constant 0 : index
    %28 = vector.load %arg9[%c0_42, %c1_43, %c1_44, %c0_45] : memref<2x10x16x8xbf16, #tpu.memory_space<vmem>>, vector<2x8x8x8xbf16>
    %29 = vector.shape_cast %28 : vector<2x8x8x8xbf16> to vector<128x8xbf16>
    %c0_46 = arith.constant 0 : index
    %c1_47 = arith.constant 1 : index
    %c2_48 = arith.constant 2 : index
    %c0_49 = arith.constant 0 : index
    %30 = vector.load %arg9[%c0_46, %c1_47, %c2_48, %c0_49] : memref<2x10x16x8xbf16, #tpu.memory_space<vmem>>, vector<2x8x8x8xbf16>
    %31 = vector.shape_cast %30 : vector<2x8x8x8xbf16> to vector<128x8xbf16>
    %c0_50 = arith.constant 0 : index
    %c2_51 = arith.constant 2 : index
    %c0_52 = arith.constant 0 : index
    %c0_53 = arith.constant 0 : index
    %32 = vector.load %arg9[%c0_50, %c2_51, %c0_52, %c0_53] : memref<2x10x16x8xbf16, #tpu.memory_space<vmem>>, vector<2x8x8x8xbf16>
    %33 = vector.shape_cast %32 : vector<2x8x8x8xbf16> to vector<128x8xbf16>
    %c0_54 = arith.constant 0 : index
    %c2_55 = arith.constant 2 : index
    %c1_56 = arith.constant 1 : index
    %c0_57 = arith.constant 0 : index
    %34 = vector.load %arg9[%c0_54, %c2_55, %c1_56, %c0_57] : memref<2x10x16x8xbf16, #tpu.memory_space<vmem>>, vector<2x8x8x8xbf16>
    %35 = vector.shape_cast %34 : vector<2x8x8x8xbf16> to vector<128x8xbf16>
    %c0_58 = arith.constant 0 : index
    %c2_59 = arith.constant 2 : index
    %c2_60 = arith.constant 2 : index
    %c0_61 = arith.constant 0 : index
    %36 = vector.load %arg9[%c0_58, %c2_59, %c2_60, %c0_61] : memref<2x10x16x8xbf16, #tpu.memory_space<vmem>>, vector<2x8x8x8xbf16>
    %37 = vector.shape_cast %36 : vector<2x8x8x8xbf16> to vector<128x8xbf16>
    %38 = tpu.concatenate %21, %23, %25, %27, %29, %31, %33, %35, %37 in 1 : vector<128x8xbf16>, vector<128x8xbf16>, vector<128x8xbf16>, vector<128x8xbf16>, vector<128x8xbf16>, vector<128x8xbf16>, vector<128x8xbf16>, vector<128x8xbf16>, vector<128x8xbf16> -> vector<128x72xbf16>
    %c0_62 = arith.constant 0 : index
    %c0_63 = arith.constant 0 : index
    %39 = vector.load %arg4[%c0_62, %c0_63] : memref<72x8xbf16, #tpu.memory_space<vmem>>, vector<72x8xbf16>
    %cst_64 = arith.constant dense<0.000000e+00> : vector<128x8xf32>
    %40 = tpu.matmul %38, %39, %cst_64 {dimension_numbers = #tpu.dot_dimension_numbers<[1], [0], [0], [1], [0, 0, 1, 1], [], []>} : vector<128x72xbf16>, vector<72x8xbf16>, vector<128x8xf32> -> vector<128x8xf32>
    %c0_65 = arith.constant 0 : index
    %c0_66 = arith.constant 0 : index
    %41 = vector.load %arg5[%c0_65, %c0_66] : memref<1x8xf32, #tpu.memory_space<vmem>>, vector<1x8xf32>
    %42 = vector.broadcast %41 : vector<1x8xf32> to vector<128x8xf32>
    %43 = arith.addf %40, %42 : vector<128x8xf32>
    %44 = vector.shape_cast %43 : vector<128x8xf32> to vector<2x64x8xf32>
    %45 = arith.truncf %44 : vector<2x64x8xf32> to vector<2x64x8xbf16>
    %c0_67 = arith.constant 0 : index
    %c0_68 = arith.constant 0 : index
    %c0_69 = arith.constant 0 : index
    %46 = vector.load %arg6[%c0_67, %c0_68, %c0_69] : memref<2x64x8xbf16, #tpu.memory_space<vmem>>, vector<2x64x8xbf16>
    tpu.vector_store %arg6[%c0_67, %c0_68, %c0_69], %45 {strides = array<i32>} : memref<2x64x8xbf16, #tpu.memory_space<vmem>>, vector<2x64x8xbf16>,
    %cst_70 = arith.constant dense<0.000000e+00> : vector<8xf32>
    %47 = vector.multi_reduction <add>, %43, %cst_70 [0] : vector<128x8xf32> to vector<8xf32>
    %48 = vector.shape_cast %47 : vector<8xf32> to vector<1x1x8xf32>
    %c0_71 = arith.constant 0 : index
    %c0_72 = arith.constant 0 : index
    %c0_73 = arith.constant 0 : index
    %49 = vector.load %arg7[%c0_71, %c0_72, %c0_73] : memref<1x1x8xf32, #tpu.memory_space<vmem>>, vector<1x1x8xf32>
    tpu.vector_store %arg7[%c0_71, %c0_72, %c0_73], %48 {strides = array<i32>} : memref<1x1x8xf32, #tpu.memory_space<vmem>>, vector<1x1x8xf32>,
    %50 = arith.mulf %43, %43 : vector<128x8xf32>
    %cst_74 = arith.constant dense<0.000000e+00> : vector<8xf32>
    %51 = vector.multi_reduction <add>, %50, %cst_74 [0] : vector<128x8xf32> to vector<8xf32>
    %52 = vector.shape_cast %51 : vector<8xf32> to vector<1x1x8xf32>
    %c0_75 = arith.constant 0 : index
    %c0_76 = arith.constant 0 : index
    %c0_77 = arith.constant 0 : index
    %53 = vector.load %arg8[%c0_75, %c0_76, %c0_77] : memref<1x1x8xf32, #tpu.memory_space<vmem>>, vector<1x1x8xf32>
    tpu.vector_store %arg8[%c0_75, %c0_76, %c0_77], %52 {strides = array<i32>} : memref<1x1x8xf32, #tpu.memory_space<vmem>>, vector<1x1x8xf32>,
    return
  }
  func.func @transform_0(%arg0: i32) -> (i32, i32, i32, i32) {
    %c0_i32 = arith.constant 0 : i32
    %c0_i32_0 = arith.constant 0 : i32
    %c0_i32_1 = arith.constant 0 : i32
    %c0_i32_2 = arith.constant 0 : i32
    return %arg0, %c0_i32, %c0_i32_0, %c0_i32_1 : i32, i32, i32, i32
  }
  func.func @transform_1(%arg0: i32) -> (i32, i32) {
    %c0_i32 = arith.constant 0 : i32
    %c0_i32_0 = arith.constant 0 : i32
    %c0_i32_1 = arith.constant 0 : i32
    return %c0_i32, %c0_i32_0 : i32, i32
  }
  func.func @transform_2(%arg0: i32) -> (i32, i32) {
    %c0_i32 = arith.constant 0 : i32
    %c0_i32_0 = arith.constant 0 : i32
    %c0_i32_1 = arith.constant 0 : i32
    return %c0_i32, %c0_i32_0 : i32, i32
  }
  func.func @transform_3(%arg0: i32) -> (i32, i32) {
    %c0_i32 = arith.constant 0 : i32
    %c0_i32_0 = arith.constant 0 : i32
    %c0_i32_1 = arith.constant 0 : i32
    return %c0_i32, %c0_i32_0 : i32, i32
  }
  func.func @transform_4(%arg0: i32) -> (i32, i32) {
    %c0_i32 = arith.constant 0 : i32
    %c0_i32_0 = arith.constant 0 : i32
    %c0_i32_1 = arith.constant 0 : i32
    return %c0_i32, %c0_i32_0 : i32, i32
  }
  func.func @transform_5(%arg0: i32) -> (i32, i32, i32) {
    %c0_i32 = arith.constant 0 : i32
    %c0_i32_0 = arith.constant 0 : i32
    %c0_i32_1 = arith.constant 0 : i32
    return %arg0, %c0_i32, %c0_i32_0 : i32, i32, i32
  }
  func.func @transform_6(%arg0: i32) -> (i32, i32, i32) {
    %c0_i32 = arith.constant 0 : i32
    %c0_i32_0 = arith.constant 0 : i32
    %c0_i32_1 = arith.constant 0 : i32
    return %arg0, %c0_i32, %c0_i32_0 : i32, i32, i32
  }
  func.func @transform_7(%arg0: i32) -> (i32, i32, i32) {
    %c0_i32 = arith.constant 0 : i32
    %c0_i32_0 = arith.constant 0 : i32
    %c0_i32_1 = arith.constant 0 : i32
    return %arg0, %c0_i32, %c0_i32_0 : i32, i32, i32
  }
}

</mosaic_0001>

<bundles_post_ra>
// kernel: down_forward.2
= control target key start
LH: loop header
LB: loop body
LE: loop exit
PB: predicated region body
PF: predicated region fallthrough
CT: control target
= control target key end

     0   :  { %vm40_vm0 = vcmask 24576   ;;  %vm41_vm1 = vsmask.f32 256  ;;  %v52_v0 = vld [vmem:[#allocation2 + $0x18] sm:$0x1]  ;;  %vm103_vm2 = vcmask 28676   ;;  %s4390_s0 = inlined_call_operand.vmem [shape: bf16[2,8,8,4], index: 0, kind: input, shape index: {}]   ;;  %s4391_s1 = inlined_call_operand.vmem [shape: bf16[36,8], index: 1, kind: input, shape index: {}]   ;;  %s4392_s2 = inlined_call_operand.vmem [shape: f32[1,8], index: 2, kind: input, shape index: {}]   ;;  %s4393_s3 = inlined_call_operand.vmem [shape: bf16[2,64,8], index: 3, kind: output, shape index: {0}]   ;;  %s4394_s4 = inlined_call_operand.vmem [shape: f32[1,1,8], index: 4, kind: output, shape index: {1}]   ;;  %s4395_s5 = inlined_call_operand.vmem [shape: f32[1,1,8], index: 5, kind: output, shape index: {2}]  }
   0x1   :  { %vm3451_vm3 = vmand %vm40_vm0, %vm41_vm1  ;;  %vm104_vm4 = vsmask.f32 7954  ;;  %v55_v3 = vld [vmem:[#allocation2 + $0x20] sm:$0x1]  ;;  %v115_v5 = vld [vmem:[#allocation2 + $0x18] sm:$0x10] }
   0x2   :  { %v53_v2 = vsel %vm3451_vm3, 0, %v52_v0  ;;  %vm3457_vm5 = vmand %vm103_vm2, %vm104_vm4  ;;  %v56_v6 = vsel %vm3451_vm3, 0, %v55_v3  ;;  %v118_v8 = vld [vmem:[#allocation2 + $0x20] sm:$0x10]  ;;  %v3177_v9 = vld [vmem:[%s4390_s0 + $0x8] ss:$0 sps:$4 sm:$0xff]  }
   0x3   :  { %54 = vst [vmem:[#allocation2 + $0x18] sm:$0x1] %v53_v2  ;;  %v116_v7 = vsel %vm3457_vm5, 0, %v115_v5  ;;  %57 = vst [vmem:[#allocation2 + $0x20] sm:$0x1] %v56_v6  ;;  %v119_v10 = vsel %vm3457_vm5, 0, %v118_v8 }
   0x4   :  { %117 = vst [vmem:[#allocation2 + $0x18] sm:$0x10] %v116_v7  ;;  %v3178_v11 = vld [vmem:[%s4390_s0 + $0xc] ss:$0 sps:$4 sm:$0xff]   ;;  %vm343_vm6 = vcmask 28672   ;;  %v229_v12 = vshrl.u32 %v3177_v9, 16 }
   0x5   :  { %vm344_vm7 = vsmask.f32 4354  ;;  %120 = vst [vmem:[#allocation2 + $0x20] sm:$0x10] %v119_v10  ;;  %v232_v13 = vshll.u32 %v3177_v9, 16  ;;  %v236_v14 = vshrl.u32 %v3178_v11, 16 }
   0x6   :  { %v239_v15 = vshll.u32 %v3178_v11, 16  ;;  %v46_v16 = vld [vmem:[#allocation2 + $0x8] sm:$0x1]  ;;  %v49_v17 = vld [vmem:[#allocation2 + $0x10] sm:$0x1]  ;;  %v231_v18 = vrot.slane %v229_v12, 7  ;;  %vm3484_vm8 = vmand %vm343_vm6, %vm344_vm7 }
   0x7   :  { %v47_v19 = vsel %vm3451_vm3, 0, %v46_v16  ;;  %v50_v20 = vsel %vm3451_vm3, 0, %v49_v17  ;;  %v109_v21 = vld [vmem:[#allocation2 + $0x8] sm:$0x10]  ;;  %v238_v22 = vrot.slane %v236_v14, 7  ;;  %vm34_vm9 = vcmask 31744  }
   0x8   :  { %48 = vst [vmem:[#allocation2 + $0x8] sm:$0x1] %v47_v19  ;;  %51 = vst [vmem:[#allocation2 + $0x10] sm:$0x1] %v50_v20  ;;  %v110_v23 = vsel %vm3457_vm5, 0, %v109_v21  ;;  %v234_v26 = vor.u32 %v232_v13, %v231_v18  ;;  %v3412_v49 = vmov 0  }
   0x9   :  { %v112_v24 = vld [vmem:[#allocation2 + $0x10] sm:$0x10]  ;;  %v3180_v25 = vld [vmem:[%s4390_s0] ss:$0 sps:$4 sm:$0xff]   ;;  %111 = vst [vmem:[#allocation2 + $0x8] sm:$0x10] %v110_v23  ;;  %v241_v30 = vor.u32 %v239_v15, %v238_v22 }
   0xa   :  { %v113_v28 = vsel %vm3457_vm5, 0, %v112_v24  ;;  %v3181_v29 = vld [vmem:[%s4390_s0 + $0x4] ss:$0 sps:$4 sm:$0xff]   ;;  %v215_v31 = vshrl.u32 %v3180_v25, 16  ;;  %v218_v32 = vshll.u32 %v3180_v25, 16  ;;  %35 = vst.msk [vmem:[#allocation2] sm:$0xff] %vm34_vm9, %v3412_v49 }
   0xb   :  { %114 = vst [vmem:[#allocation2 + $0x10] sm:$0x10] %v113_v28  ;;  %v58_v33 = vld [vmem:[#allocation2 + $0x28] sm:$0x1]  ;;  %v121_v34 = vld [vmem:[#allocation2 + $0x28] sm:$0x10] }
   0xc   :  { %v352_v35 = vld [vmem:[#allocation2 + $0x18] sm:$0x1f]  ;;  %v222_v36 = vshrl.u32 %v3181_v29, 16  ;;  %v225_v37 = vshll.u32 %v3181_v29, 16  ;;  %v59_v38 = vsel %vm3451_vm3, 0, %v58_v33  ;;  %v122_v39 = vsel %vm3457_vm5, 0, %v121_v34 }
   0xd   :  { %v353_v40 = vsel %vm3484_vm8, %v234_v26, %v352_v35  ;;  %v355_v41 = vld [vmem:[#allocation2 + $0x20] sm:$0x1f]  ;;  %v217_v42 = vrot.slane %v215_v31, 7  ;;  %60 = vst [vmem:[#allocation2 + $0x28] sm:$0x1] %v59_v38  ;;  %36 = vst.msk [vmem:[#allocation2 + $0x50] sm:$0xff] %vm34_vm9, %v3412_v49 }
   0xe   :  { %123 = vst [vmem:[#allocation2 + $0x28] sm:$0x10] %v122_v39  ;;  %v3183_v43 = vld [vmem:[%s4390_s0 + $0x10] ss:$0 sps:$4 sm:$0xff]   ;;  %354 = vst [vmem:[#allocation2 + $0x18] sm:$0x1f] %v353_v40  ;;  %v356_v44 = vsel %vm3484_vm8, %v241_v30, %v355_v41 }
   0xf   :  { %v224_v45 = vrot.slane %v222_v36, 7  ;;  %357 = vst [vmem:[#allocation2 + $0x20] sm:$0x1f] %v356_v44  ;;  %v220_v46 = vor.u32 %v218_v32, %v217_v42  ;;  %v243_v47 = vshrl.u32 %v3183_v43, 16  ;;  %v246_v48 = vshll.u32 %v3183_v43, 16  ;;  %38 = vst.msk [vmem:[#allocation2 + $0x48] sm:$0xff] %vm34_vm9, %v3412_v49 }
  0x10   :  { %39 = vst.msk [vmem:[#allocation2 + $0x98] sm:$0xff] %vm34_vm9, %v3412_v49  ;;  %v346_v51 = vld [vmem:[#allocation2 + $0x8] sm:$0x1f]  ;;  %v61_v55 = vld [vmem:[#allocation2 + $0x30] sm:$0x1]  ;;  %vm829_vm10 = vcmask 1042432  }
  0x11   :  { %v227_v50 = vor.u32 %v225_v37, %v224_v45  ;;  %v245_v52 = vrot.slane %v243_v47, 7  ;;  %v347_v53 = vsel %vm3484_vm8, %v220_v46, %v346_v51  ;;  %v64_v56 = vld [vmem:[#allocation2 + $0x38] sm:$0x1]  ;;  %v62_v59 = vsel %vm3451_vm3, 0, %v61_v55  ;;  %v124_v61 = vld [vmem:[#allocation2 + $0x30] sm:$0x10] }
  0x12   :  { %v349_v54 = vld [vmem:[#allocation2 + $0x10] sm:$0x1f]  ;;  %348 = vst [vmem:[#allocation2 + $0x8] sm:$0x1f] %v347_v53  ;;  %v65_v60 = vsel %vm3451_vm3, 0, %v64_v56  ;;  %vm830_vm11 = vcmask 1046532  }
  0x13   :  { %v350_v57 = vsel %vm3484_vm8, %v227_v50, %v349_v54  ;;  %v248_v58 = vor.u32 %v246_v48, %v245_v52  ;;  %v127_v62 = vld [vmem:[#allocation2 + $0x38] sm:$0x10]  ;;  %63 = vst [vmem:[#allocation2 + $0x30] sm:$0x1] %v62_v59  ;;  %66 = vst [vmem:[#allocation2 + $0x38] sm:$0x1] %v65_v60 }
  0x14   :  { %351 = vst [vmem:[#allocation2 + $0x10] sm:$0x1f] %v350_v57  ;;  %v125_v0 = vsel %vm3457_vm5, 0, %v124_v61  ;;  %v128_v2 = vsel %vm3457_vm5, 0, %v127_v62  ;;  %v106_v9 = vld [vmem:[#allocation2] sm:$0x10]  ;;  %vm3529_vm12 = vmor %vm829_vm10, %vm830_vm11 }
  0x15   :  { %v358_v63 = vld [vmem:[#allocation2 + $0x28] sm:$0x1f]  ;;  %v1730_v5 = vld [vmem:[#allocation2 + $0x18] sm:$0x1e]  ;;  %126 = vst [vmem:[#allocation2 + $0x30] sm:$0x10] %v125_v0 }
  0x16   :  { %v359_v3 = vsel %vm3484_vm8, %v248_v58, %v358_v63  ;;  %129 = vst [vmem:[#allocation2 + $0x38] sm:$0x10] %v128_v2  ;;  %v3179_v6 = vld [vmem:[#allocation2 + $0x18] ss:$8 sps:$4 sm:$0xff]   ;;  %v2965_v7 = vcombine.low %v1730_v5, %v1730_v5  ;;  %v2966_v8 = vcombine.high %v1730_v5, %v1730_v5  ;;  %s3413_s28 = smov 12   ;;  %v107_v13 = vsel %vm3457_vm5, 0, %v106_v9 }
  0x17   :  { %360 = vst [vmem:[#allocation2 + $0x28] sm:$0x1f] %v359_v3  ;;  %v3522_v10 = vld [vmem:[#allocation2 + $0x18] sm:$0x1e]  ;;  %v3524_v11 = vld [vmem:[#allocation2 + $0x20] sm:$0x1e]  ;;  %2051 = vrot.lane.b32.xlu1 %v3179_v6, %s3413_s28 }
  0x18   :  { %v3535_v14 = vrot.slane %v2965_v7, 9  ;;  %v3537_v15 = vrot.slane %v2966_v8, 5  ;;  %v2809_v16 = vcombine.low %v3522_v10, %v3522_v10  ;;  %v3541_v17 = vld [vmem:[#allocation2 + $0x18] sm:$0x1e]  ;;  %108 = vst [vmem:[#allocation2] sm:$0x10] %v107_v13  ;;  %v2810_v18 = vcombine.high %v3522_v10, %v3522_v10 }
  0x19   :  { %v2967_v19 = vcombine.low %v3524_v11, %v3524_v11  ;;  %v2968_v20 = vcombine.high %v3524_v11, %v3524_v11  ;;  %v3549_v21 = vld [vmem:[#allocation2 + $0x20] sm:$0x1e]  ;;  %v2887_v22 = vcombine.low %v3541_v17, %v3541_v17  ;;  %v3553_v23 = vld [vmem:[#allocation2 + $0x18] sm:$0x1f]  ;;  %v1232_v25 = vld [vmem:[#allocation2 + $0x8] sm:$0x1e]  ;;  %v2888_v29 = vcombine.high %v3541_v17, %v3541_v17 }
  0x1a   :  { %v3555_v24 = vld [vmem:[#allocation2 + $0x20] sm:$0x1f]  ;;  %v734_v26 = vld [vmem:[#allocation2 + $0x8] sm:$0x1e]  ;;  %v1832_v28 = vsel %vm3529_vm12, %v3535_v14, %v3537_v15  ;;  %v2889_v30 = vcombine.low %v3549_v21, %v3549_v21  ;;  %v2890_v31 = vcombine.high %v3549_v21, %v3549_v21  ;;  %v2883_v33 = vcombine.low %v1232_v25, %v1232_v25  ;;  %s3414_s29 = smov 24   ;;  %s3415_s30 = smov 20  }
  0x1b   :  { %v3182_v32 = vld [vmem:[#allocation2 + $0x8] ss:$8 sps:$4 sm:$0xff]   ;;  %v2884_v34 = vcombine.high %v1232_v25, %v1232_v25  ;;  %v2805_v35 = vcombine.low %v734_v26, %v734_v26  ;;  %v2806_v36 = vcombine.high %v734_v26, %v734_v26  ;;  %v3569_v40 = vcombine.low %v3553_v23, %v3553_v23  ;;  %s3416_s6 = smov 8   ;;  %s3417_s7 = smov 32  }
  0x1c   :  { %v3185_v37 = vld [vmem:[#allocation2 + $0x10] ss:$8 sps:$4 sm:$0xff]   ;;  %v2856_v41 = vcombine.high %v3553_v23, %v3553_v23  ;;  %v3575_v42 = vcombine.low %v3555_v24, %v3555_v24  ;;  %v2858_v43 = vcombine.high %v3555_v24, %v3555_v24  ;;  %2049 = vrot.lane.b32.xlu0 %v3182_v32, %s3413_s28  ;;  %v2915_v47 = vrot.slane %v2883_v33, 9  ;;  %s3418_s8 = smov 16   ;;  %s3419_s9 = smov 28  }
  0x1d   :  { %v1233_v38 = vld [vmem:[#allocation2 + $0x10] sm:$0x1e]  ;;  %v1330_v48 = vrot.slane %v2884_v34, 5  ;;  %v2836_v49 = vrot.slane %v2805_v35, 9  ;;  %v838_v50 = vrot.slane %v2806_v36, 5  ;;  %v2838_v9 = vrot.slane %v2809_v16, 9 }
  0x1e   :  { %v1729_v39 = vld [vmem:[#allocation2 + $0x10] sm:$0x1e]  ;;  %v3184_v44 = vld [vmem:[#allocation2 + $0x20] ss:$8 sps:$4 sm:$0xff]   ;;  %v2885_v45 = vcombine.low %v1233_v38, %v1233_v38  ;;  %v2886_v46 = vcombine.high %v1233_v38, %v1233_v38  ;;  %vm506_vm13 = vsmask.f32 3328 }
  0x1f   :  { %v2963_v51 = vcombine.low %v1729_v39, %v1729_v39  ;;  %v2964_v52 = vcombine.high %v1729_v39, %v1729_v39  ;;  %v735_v53 = vld [vmem:[#allocation2 + $0x10] sm:$0x1e]  ;;  %2187 = vrot.lane.b32.xlu1 %v3184_v44, %s3414_s29  ;;  %v1331_v54 = vsel %vm3529_vm12, %v2915_v47, %v1330_v48  ;;  %v733_v58 = vld [vmem:[#allocation2] sm:$0x1e]  ;;  %v839_v59 = vsel %vm3529_vm12, %v2836_v49, %v838_v50  ;;  %v1732_v5 = vld [vmem:[#allocation2 + $0x28] sm:$0x1e] }
  0x20   :  { %v2916_v55 = vrot.slane %v2885_v45, 9  ;;  %v1334_v56 = vrot.slane %v2886_v46, 5  ;;  %v2807_v57 = vcombine.low %v735_v53, %v735_v53  ;;  %v2808_v62 = vcombine.high %v735_v53, %v735_v53  ;;  %2185 = vrot.lane.b32.xlu0 %v3185_v37, %s3414_s29  ;;  %v1411_v48 = vld [vmem:[#allocation2 + $0x20] sm:$0x1f]  ;;  %v1412_v23 = vld [vmem:[#allocation2 + $0x28] sm:$0x1f] }
  0x21   :  { %v2995_v60 = vrot.slane %v2963_v51, 9  ;;  %v1827_v61 = vrot.slane %v2964_v52, 5  ;;  %v2803_v0 = vcombine.low %v733_v58, %v733_v58  ;;  %v2804_v2 = vcombine.high %v733_v58, %v733_v58  ;;  %s3420_s12 = smov 4  }
  0x22   :  { %v1335_v63 = vsel %vm3529_vm12, %v2916_v55, %v1334_v56  ;;  %v2837_v3 = vrot.slane %v2807_v57, 9  ;;  %v842_v8 = vrot.slane %v2808_v62, 5  ;;  %vm507_vm14 = vsmask.f32 7440 }
  0x23   :  { %v3051_v6 = vcombine.low %v1331_v54, %v1335_v63  ;;  %v1828_v7 = vsel %vm3529_vm12, %v2995_v60, %v1827_v61  ;;  %v2835_v10 = vrot.slane %v2803_v0, 9  ;;  %v834_v13 = vrot.slane %v2804_v2, 5  ;;  %vm3641_vm15 = vmor %vm506_vm13, %vm507_vm14 }
  0x24   :  { %v3075_v14 = vcombine.low %v1828_v7, %v1832_v28  ;;  %v846_v15 = vrot.slane %v2810_v18, 5  ;;  %v843_v25 = vsel %vm3529_vm12, %v2837_v3, %v842_v8  ;;  %v2969_v26 = vcombine.low %v1732_v5, %v1732_v5 }
  0x25   :  { %v2970_v32 = vcombine.high %v1732_v5, %v1732_v5  ;;  %v2997_v33 = vrot.slane %v2967_v19, 9  ;;  %2129 = vrot.lane.b32.xlu0 %v3051_v6, %s3415_s30  ;;  %v835_v16 = vsel %vm3529_vm12, %v2835_v10, %v834_v13  ;;  %v1835_v18 = vrot.slane %v2968_v20, 5  ;;  %v412_v13 = vld [vmem:[#allocation2 + $0x10] sm:$0x1f] }
  0x26   :  { %v847_v34 = vsel %vm3529_vm12, %v2838_v9, %v846_v15  ;;  %v2917_v28 = vrot.slane %v2887_v22, 9  ;;  %v3027_v35 = vcombine.low %v835_v16, %v839_v59  ;;  %v2998_v19 = vrot.slane %v2969_v26, 9  ;;  %v43_v22 = vld [vmem:[#allocation2] sm:$0x1] }
  0x27   :  { %v3028_v36 = vcombine.low %v843_v25, %v847_v34  ;;  %v1839_v37 = vrot.slane %v2970_v32, 5  ;;  %v1836_v38 = vsel %vm3529_vm12, %v2997_v33, %v1835_v18  ;;  %v1338_v39 = vrot.slane %v2888_v29, 5 }
  0x28   :  { %v2918_v11 = vrot.slane %v2889_v30, 9  ;;  %v1342_v20 = vrot.slane %v2890_v31, 5  ;;  %1993 = vrot.lane.b32.xlu1 %v3027_v35, %s3416_s6  ;;  %v1037_v45 = vshrl.u32 %v3569_v40, 16  ;;  %v1040_v17 = vshll.u32 %v3569_v40, 16  ;;  %v411_v30 = vld [vmem:[#allocation2 + $0x8] sm:$0x1f] }
  0x29   :  { %v1840_v44 = vsel %vm3529_vm12, %v2998_v19, %v1839_v37  ;;  %v1046_v29 = vshll.u32 %v2856_v41, 16  ;;  %2265 = vrot.lane.b32.xlu0 %v3075_v14, %s3417_s7  ;;  %v1339_v31 = vsel %vm3529_vm12, %v2917_v28, %v1338_v39  ;;  %v1051_v47 = vshrl.u32 %v3575_v42, 16  ;;  %v413_v19 = vld [vmem:[#allocation2 + $0x18] sm:$0x1f] }
  0x2a   :  { %v3076_v21 = vcombine.low %v1836_v38, %v1840_v44  ;;  %v1343_v46 = vsel %vm3529_vm12, %v2918_v11, %v1342_v20  ;;  %v1039_v40 = vrot.slane %v1037_v45, 4  ;;  %v1042_v50 = vrot.slane %v1040_v17, 5 }
  0x2b   :  { %v3052_v49 = vcombine.low %v1339_v31, %v1343_v46  ;;  %v1048_v51 = vrot.slane %v1046_v29, 5  ;;  %v1053_v41 = vrot.slane %v1051_v47, 4  ;;  %v1054_v52 = vshll.u32 %v3575_v42, 16 }
  0x2c   :  { %v1060_v53 = vshll.u32 %v2858_v43, 16  ;;  %v44_v54 = vsel %vm3451_vm3, 0, %v43_v22  ;;  %1995 = vrot.lane.b32.xlu1 %v3028_v36, %s3416_s6  ;;  %v1043_v55 = vor.u32 %v1042_v50, %v1039_v40  ;;  %v2773_v56 = vcombine.low %v411_v30, %v411_v30 }
  0x2d   :  { %45 = vst [vmem:[#allocation2] sm:$0x1] %v44_v54  ;;  %v2774_v57 = vcombine.high %v411_v30, %v411_v30  ;;  %v2935_v58 = vcombine.low %v1411_v48, %v1411_v48  ;;  %2267 = vrot.lane.b32.xlu0 %v3076_v21, %s3417_s7  ;;  %v1056_v24 = vrot.slane %v1054_v52, 5  ;;  %v2936_v59 = vcombine.high %v1411_v48, %v1411_v48 }
  0x2e   :  { %v1062_v43 = vrot.slane %v1060_v53, 5  ;;  %v2937_v60 = vcombine.low %v1412_v23, %v1412_v23  ;;  %v1044_v61 = vrot.slane %v1043_v55, 4  ;;  %v524_v62 = vshrl.u32 %v2773_v56, 16 }
  0x2f   :  { %v527_v63 = vshll.u32 %v2773_v56, 16  ;;  %v533_v0 = vshll.u32 %v2774_v57, 16  ;;  %v1057_v2 = vor.u32 %v1056_v24, %v1053_v41  ;;  %v2938_v3 = vcombine.high %v1412_v23, %v1412_v23  ;;  %v414_v24 = vld [vmem:[#allocation2 + $0x20] sm:$0x1f] }
  0x30   :  { %v1534_v5 = vshrl.u32 %v2935_v58, 16  ;;  %v1537_v6 = vshll.u32 %v2935_v58, 16  ;;  %2131 = vrot.lane.b32.xlu1 %v3052_v49, %s3415_s30  ;;  %v1049_v7 = vsel %vm3641_vm15, %v1044_v61, %v1048_v51  ;;  %v526_v8 = vrot.slane %v524_v62, 4  ;;  %v415_v62 = vld [vmem:[#allocation2 + $0x28] sm:$0x1f] }
  0x31   :  { %v529_v9 = vrot.slane %v527_v63, 5  ;;  %v535_v10 = vrot.slane %v533_v0, 5  ;;  %v1058_v14 = vrot.slane %v1057_v2, 4  ;;  %v1543_v26 = vshll.u32 %v2936_v59, 16 }
  0x32   :  { %v1536_v15 = vrot.slane %v1534_v5, 4  ;;  %v1539_v25 = vrot.slane %v1537_v6, 5  ;;  %v1548_v33 = vshrl.u32 %v2937_v60, 16  ;;  %v1551_v16 = vshll.u32 %v2937_v60, 16 }
  0x33   :  { %v530_v32 = vor.u32 %v529_v9, %v526_v8  ;;  %v1557_v34 = vshll.u32 %v2938_v3, 16  ;;  %v1063_v18 = vsel %vm3641_vm15, %v1058_v14, %v1062_v43  ;;  %v1545_v36 = vrot.slane %v1543_v26, 5 }
  0x34   :  { %v410_v28 = vld [vmem:[#allocation2] sm:$0x1f]  ;;  %v1540_v35 = vor.u32 %v1539_v25, %v1536_v15  ;;  %v2775_v37 = vcombine.low %v412_v13, %v412_v13  ;;  %v3044_v38 = vcombine.low %v1049_v7, %v1063_v18  ;;  %v1550_v44 = vrot.slane %v1548_v33, 4  ;;  %v3234_v33 = vld [vmem:[%s4390_s0 + $0x14] ss:$0 sps:$4 sm:$0xff]  }
  0x35   :  { %v2771_v39 = vcombine.low %v410_v28, %v410_v28  ;;  %v2772_v11 = vcombine.high %v410_v28, %v410_v28  ;;  %v531_v20 = vrot.slane %v530_v32, 4  ;;  %v1553_v45 = vrot.slane %v1551_v16, 5 }
  0x36   :  { %v1541_v22 = vrot.slane %v1540_v35, 4  ;;  %v1559_v17 = vrot.slane %v1557_v34, 5  ;;  %2091 = vrot.lane.b32.xlu1 %v3044_v38, %s3418_s8  ;;  %v2776_v48 = vcombine.high %v412_v13, %v412_v13  ;;  %v2777_v49 = vcombine.low %v413_v19, %v413_v19  ;;  %v912_v35 = vld [vmem:[#allocation2 + $0x8] sm:$0x1f] }
  0x37   :  { %v510_v29 = vshrl.u32 %v2771_v39, 16  ;;  %v513_v30 = vshll.u32 %v2771_v39, 16  ;;  %v519_v21 = vshll.u32 %v2772_v11, 16  ;;  %v536_v31 = vsel %vm3641_vm15, %v531_v20, %v535_v10  ;;  %v913_v39 = vld [vmem:[#allocation2 + $0x10] sm:$0x1f] }
  0x38   :  { %v1546_v46 = vsel %vm3641_vm15, %v1541_v22, %v1545_v36  ;;  %v1554_v47 = vor.u32 %v1553_v45, %v1550_v44  ;;  %v2778_v23 = vcombine.high %v413_v19, %v413_v19  ;;  %v538_v52 = vshrl.u32 %v2775_v37, 16 }
  0x39   :  { %v512_v40 = vrot.slane %v510_v29, 4  ;;  %v515_v50 = vrot.slane %v513_v30, 5  ;;  %v521_v51 = vrot.slane %v519_v21, 5  ;;  %v541_v53 = vshll.u32 %v2775_v37, 16 }
  0x3a   :  { %v1555_v41 = vrot.slane %v1554_v47, 4  ;;  %v547_v54 = vshll.u32 %v2776_v48, 16  ;;  %v552_v56 = vshrl.u32 %v2777_v49, 16  ;;  %v555_v57 = vshll.u32 %v2777_v49, 16  ;;  %v3235_v48 = vld [vmem:[%s4390_s0 + $0x18] ss:$0 sps:$4 sm:$0xff]  }
  0x3b   :  { %v516_v55 = vor.u32 %v515_v50, %v512_v40  ;;  %v561_v58 = vshll.u32 %v2778_v23, 16  ;;  %v540_v59 = vrot.slane %v538_v52, 4  ;;  %v543_v60 = vrot.slane %v541_v53, 5 }
  0x3c   :  { %v1560_v43 = vsel %vm3641_vm15, %v1555_v41, %v1559_v17  ;;  %v549_v61 = vrot.slane %v547_v54, 5  ;;  %v554_v2 = vrot.slane %v552_v56, 4  ;;  %v557_v3 = vrot.slane %v555_v57, 5  ;;  %v1409_v54 = vld [vmem:[#allocation2 + $0x10] sm:$0x1f] }
  0x3d   :  { %v517_v63 = vrot.slane %v516_v55, 4  ;;  %v3068_v0 = vcombine.low %v1546_v46, %v1560_v43  ;;  %v544_v5 = vor.u32 %v543_v60, %v540_v59  ;;  %v563_v6 = vrot.slane %v561_v58, 5  ;;  %v1410_v55 = vld [vmem:[#allocation2 + $0x18] sm:$0x1f] }
  0x3e   :  { %v2779_v7 = vcombine.low %v414_v24, %v414_v24  ;;  %v2780_v8 = vcombine.high %v414_v24, %v414_v24  ;;  %v558_v10 = vor.u32 %v557_v3, %v554_v2  ;;  %v2781_v13 = vcombine.low %v415_v62, %v415_v62 }
  0x3f   :  { %v522_v9 = vsel %vm3641_vm15, %v517_v63, %v521_v51  ;;  %2227 = vrot.lane.b32.xlu1 %v3068_v0, %s3419_s9  ;;  %v2782_v14 = vcombine.high %v415_v62, %v415_v62  ;;  %v545_v25 = vrot.slane %v544_v5, 4  ;;  %v2851_v30 = vcombine.low %v912_v35, %v912_v35 }
  0x40   :  { %v3019_v15 = vcombine.low %v522_v9, %v536_v31  ;;  %v566_v26 = vshrl.u32 %v2779_v7, 16  ;;  %v569_v32 = vshll.u32 %v2779_v7, 16  ;;  %v559_v16 = vrot.slane %v558_v10, 4  ;;  %v361_v9 = vld [vmem:[#allocation2 + $0x30] sm:$0x1f] }
  0x41   :  { %v575_v34 = vshll.u32 %v2780_v8, 16  ;;  %v580_v18 = vshrl.u32 %v2781_v13, 16  ;;  %v583_v28 = vshll.u32 %v2781_v13, 16  ;;  %v550_v36 = vsel %vm3641_vm15, %v545_v25, %v549_v61 }
  0x42   :  { %1953 = vrot.lane.b32.xlu0 %v3019_v15, %s3420_s12  ;;  %v568_v19 = vrot.slane %v566_v26, 4  ;;  %v571_v37 = vrot.slane %v569_v32, 5  ;;  %v589_v38 = vshll.u32 %v2782_v14, 16  ;;  %v564_v11 = vsel %vm3641_vm15, %v559_v16, %v563_v6 }
  0x43   :  { %v577_v20 = vrot.slane %v575_v34, 5  ;;  %v582_v22 = vrot.slane %v580_v18, 4  ;;  %v585_v44 = vrot.slane %v583_v28, 5  ;;  %v3020_v45 = vcombine.low %v550_v36, %v564_v11  ;;  %v364_v34 = vld [vmem:[#allocation2 + $0x38] sm:$0x1f] }
  0x44   :  { %v572_v17 = vor.u32 %v571_v37, %v568_v19  ;;  %v591_v29 = vrot.slane %v589_v38, 5  ;;  %v2852_v31 = vcombine.high %v912_v35, %v912_v35  ;;  %v2853_v46 = vcombine.low %v913_v39, %v913_v39  ;;  %v737_v38 = vld [vmem:[#allocation2 + $0x20] sm:$0x1e] }
  0x45   :  { %v586_v21 = vor.u32 %v585_v44, %v582_v22  ;;  %v2854_v47 = vcombine.high %v913_v39, %v913_v39  ;;  %v1009_v40 = vshrl.u32 %v2851_v30, 16  ;;  %v1012_v50 = vshll.u32 %v2851_v30, 16  ;;  %v738_v39 = vld [vmem:[#allocation2 + $0x28] sm:$0x1e] }
  0x46   :  { %1955 = vrot.lane.b32.xlu0 %v3020_v45, %s3420_s12  ;;  %v573_v49 = vrot.slane %v572_v17, 4  ;;  %v250_v51 = vshrl.u32 %v3234_v33, 16  ;;  %v1018_v41 = vshll.u32 %v2852_v31, 16  ;;  %v1023_v52 = vshrl.u32 %v2853_v46, 16  ;;  %v67_v45 = vld [vmem:[#allocation2 + $0x40] sm:$0x1] }
  0x47   :  { %v587_v23 = vrot.slane %v586_v21, 4  ;;  %v1026_v53 = vshll.u32 %v2853_v46, 16  ;;  %v1011_v57 = vrot.slane %v1009_v40, 4  ;;  %v1014_v58 = vrot.slane %v1012_v50, 5  ;;  %v3252_v31 = vld [vmem:[%s4390_s0 + $0x1c] ss:$0 sps:$4 sm:$0xff]  }
  0x48   :  { %v578_v56 = vsel %vm3641_vm15, %v573_v49, %v577_v20  ;;  %v1032_v24 = vshll.u32 %v2854_v47, 16  ;;  %v1020_v59 = vrot.slane %v1018_v41, 5  ;;  %v1025_v60 = vrot.slane %v1023_v52, 4  ;;  %v130_v40 = vld [vmem:[#allocation2 + $0x40] sm:$0x10] }
  0x49   :  { %v592_v43 = vsel %vm3641_vm15, %v587_v23, %v591_v29  ;;  %v1028_v61 = vrot.slane %v1026_v53, 5  ;;  %v1015_v63 = vor.u32 %v1014_v58, %v1011_v57  ;;  %v252_v2 = vrot.slane %v250_v51, 7  ;;  %v3691_v52 = vld [vmem:[#allocation2 + $0x28] sm:$0x1f] }
  0x4a   :  { %v3021_v62 = vcombine.low %v578_v56, %v592_v43  ;;  %v1034_v0 = vrot.slane %v1032_v24, 5  ;;  %v253_v5 = vshll.u32 %v3234_v33, 16  ;;  %v257_v6 = vshrl.u32 %v3235_v48, 16 }
  0x4b   :  { %v1029_v3 = vor.u32 %v1028_v61, %v1025_v60  ;;  %v260_v7 = vshll.u32 %v3235_v48, 16  ;;  %v1016_v8 = vrot.slane %v1015_v63, 4  ;;  %v2931_v10 = vcombine.low %v1409_v54, %v1409_v54 }
  0x4c   :  { %1957 = vrot.lane.b32.xlu1 %v3021_v62, %s3420_s12  ;;  %v2932_v13 = vcombine.high %v1409_v54, %v1409_v54  ;;  %v2933_v14 = vcombine.low %v1410_v55, %v1410_v55  ;;  %v255_v25 = vor.u32 %v253_v5, %v252_v2  ;;  %v259_v26 = vrot.slane %v257_v6, 7 }
  0x4d   :  { %v1030_v15 = vrot.slane %v1029_v3, 4  ;;  %v2934_v32 = vcombine.high %v1410_v55, %v1410_v55  ;;  %v1021_v16 = vsel %vm3641_vm15, %v1016_v8, %v1020_v59  ;;  %v1506_v18 = vshrl.u32 %v2931_v10, 16 }
  0x4e   :  { %v1509_v28 = vshll.u32 %v2931_v10, 16  ;;  %v1515_v33 = vshll.u32 %v2932_v13, 16  ;;  %v262_v36 = vor.u32 %v260_v7, %v259_v26  ;;  %v362_v19 = vsel %vm3484_vm8, %v255_v25, %v361_v9 }
  0x4f   :  { %v1035_v35 = vsel %vm3641_vm15, %v1030_v15, %v1034_v0  ;;  %v1520_v37 = vshrl.u32 %v2933_v14, 16  ;;  %363 = vst [vmem:[#allocation2 + $0x30] sm:$0x1f] %v362_v19  ;;  %v1508_v20 = vrot.slane %v1506_v18, 4  ;;  %v1523_v30 = vshll.u32 %v2933_v14, 16 }
  0x50   :  { %v3043_v11 = vcombine.low %v1021_v16, %v1035_v35  ;;  %v1511_v22 = vrot.slane %v1509_v28, 5  ;;  %v1517_v44 = vrot.slane %v1515_v33, 5  ;;  %v365_v17 = vsel %vm3484_vm8, %v262_v36, %v364_v34 }
  0x51   :  { %v1522_v29 = vrot.slane %v1520_v37, 4  ;;  %v1529_v21 = vshll.u32 %v2934_v32, 16  ;;  %366 = vst [vmem:[#allocation2 + $0x38] sm:$0x1f] %v365_v17  ;;  %v2811_v47 = vcombine.low %v737_v38, %v737_v38  ;;  %v2812_v48 = vcombine.high %v737_v38, %v737_v38 }
  0x52   :  { %2089 = vrot.lane.b32.xlu0 %v3043_v11, %s3418_s8  ;;  %v1512_v46 = vor.u32 %v1511_v22, %v1508_v20  ;;  %v2813_v49 = vcombine.low %v738_v39, %v738_v39  ;;  %v1525_v50 = vrot.slane %v1523_v30, 5  ;;  %v2814_v23 = vcombine.high %v738_v39, %v738_v39 }
  0x53   :  { %v1531_v51 = vrot.slane %v1529_v21, 5  ;;  %v68_v41 = vsel %vm3451_vm3, 0, %v67_v45  ;;  %v2839_v54 = vrot.slane %v2811_v47, 9  ;;  %v850_v55 = vrot.slane %v2812_v48, 5 }
  0x54   :  { %v1513_v53 = vrot.slane %v1512_v46, 4  ;;  %v2840_v56 = vrot.slane %v2813_v49, 9  ;;  %69 = vst [vmem:[#allocation2 + $0x40] sm:$0x1] %v68_v41  ;;  %v1526_v57 = vor.u32 %v1525_v50, %v1522_v29  ;;  %v854_v58 = vrot.slane %v2814_v23, 5 }
  0x55   :  { %v131_v24 = vsel %vm3457_vm5, 0, %v130_v40  ;;  %v264_v43 = vshrl.u32 %v3252_v31, 16  ;;  %v851_v60 = vsel %vm3529_vm12, %v2839_v54, %v850_v55  ;;  %v267_v61 = vshll.u32 %v3252_v31, 16 }
  0x56   :  { %v1518_v59 = vsel %vm3641_vm15, %v1513_v53, %v1517_v44  ;;  %132 = vst [vmem:[#allocation2 + $0x40] sm:$0x10] %v131_v24  ;;  %v3701_v62 = vcombine.low %v3691_v52, %v3691_v52  ;;  %v416_v63 = vld [vmem:[#allocation2 + $0x30] sm:$0x1f]  ;;  %v1527_v0 = vrot.slane %v1526_v57, 4  ;;  %v855_v3 = vsel %vm3529_vm12, %v2840_v56, %v854_v58 }
  0x57   :  { %v739_v2 = vld [vmem:[#allocation2 + $0x30] sm:$0x1e]  ;;  %v266_v5 = vrot.slane %v264_v43, 7  ;;  %v2860_v6 = vcombine.high %v3691_v52, %v3691_v52  ;;  %v2783_v7 = vcombine.low %v416_v63, %v416_v63  ;;  %v2784_v8 = vcombine.high %v416_v63, %v416_v63 }
  0x58   :  { %v2815_v9 = vcombine.low %v739_v2, %v739_v2  ;;  %v2816_v10 = vcombine.high %v739_v2, %v739_v2  ;;  %v3707_v13 = vld [vmem:[#allocation2 + $0x30] sm:$0x1f]  ;;  %v417_v14 = vld [vmem:[#allocation2 + $0x38] sm:$0x1f]  ;;  %v1532_v15 = vsel %vm3641_vm15, %v1527_v0, %v1531_v51  ;;  %v3029_v26 = vcombine.low %v851_v60, %v855_v3  ;;  %v1236_v2 = vld [vmem:[#allocation2 + $0x28] sm:$0x1e] }
  0x59   :  { %v740_v25 = vld [vmem:[#allocation2 + $0x38] sm:$0x1e]  ;;  %v269_v32 = vor.u32 %v267_v61, %v266_v5  ;;  %v3713_v16 = vcombine.low %v3707_v13, %v3707_v13  ;;  %v2785_v34 = vcombine.low %v417_v14, %v417_v14  ;;  %v2786_v18 = vcombine.high %v417_v14, %v417_v14  ;;  %v3254_v54 = vld [vmem:[#allocation2 + $0x28] ss:$8 sps:$4 sm:$0xff]  }
  0x5a   :  { %v594_v28 = vshrl.u32 %v2783_v7, 16  ;;  %v597_v33 = vshll.u32 %v2783_v7, 16  ;;  %v603_v35 = vshll.u32 %v2784_v8, 16  ;;  %v3067_v36 = vcombine.low %v1518_v59, %v1532_v15  ;;  %v918_v38 = vld [vmem:[#allocation2 + $0x38] sm:$0x1f] }
  0x5b   :  { %v2817_v19 = vcombine.low %v740_v25, %v740_v25  ;;  %v2818_v37 = vcombine.high %v740_v25, %v740_v25  ;;  %v608_v20 = vshrl.u32 %v2785_v34, 16  ;;  %v611_v22 = vshll.u32 %v2785_v34, 16 }
  0x5c   :  { %v596_v39 = vrot.slane %v594_v28, 4  ;;  %v599_v11 = vrot.slane %v597_v33, 5  ;;  %v605_v44 = vrot.slane %v603_v35, 5  ;;  %v617_v45 = vshll.u32 %v2786_v18, 16  ;;  %2225 = vrot.lane.b32.xlu0 %v3067_v36, %s3419_s9 }
  0x5d   :  { %v2841_v17 = vrot.slane %v2815_v9, 9  ;;  %v858_v29 = vrot.slane %v2816_v10, 5  ;;  %v367_v30 = vld [vmem:[#allocation2 + $0x40] sm:$0x1f]  ;;  %v610_v31 = vrot.slane %v608_v20, 4  ;;  %v613_v46 = vrot.slane %v611_v22, 5 }
  0x5e   :  { %v600_v21 = vor.u32 %v599_v11, %v596_v39  ;;  %v2842_v47 = vrot.slane %v2817_v19, 9  ;;  %v619_v48 = vrot.slane %v617_v45, 5  ;;  %v862_v40 = vrot.slane %v2818_v37, 5  ;;  %v1238_v9 = vld [vmem:[#allocation2 + $0x38] sm:$0x1e] }
  0x5f   :  { %v859_v49 = vsel %vm3529_vm12, %v2841_v17, %v858_v29  ;;  %v368_v50 = vsel %vm3484_vm8, %v269_v32, %v367_v30  ;;  %v614_v23 = vor.u32 %v613_v46, %v610_v31  ;;  %v2863_v41 = vcombine.low %v918_v38, %v918_v38 }
  0x60   :  { %v601_v51 = vrot.slane %v600_v21, 4  ;;  %369 = vst [vmem:[#allocation2 + $0x40] sm:$0x1f] %v368_v50  ;;  %v2864_v52 = vcombine.high %v918_v38, %v918_v38  ;;  %v863_v53 = vsel %vm3529_vm12, %v2842_v47, %v862_v40  ;;  %1997 = vrot.lane.b32.xlu0 %v3029_v26, %s3416_s6  ;;  %v2862_v55 = vcombine.high %v3707_v13, %v3707_v13  ;;  %v1237_v47 = vld [vmem:[#allocation2 + $0x30] sm:$0x1e] }
  0x61   :  { %v1065_v56 = vshrl.u32 %v3701_v62, 16  ;;  %v1068_v57 = vshll.u32 %v3701_v62, 16  ;;  %v615_v24 = vrot.slane %v614_v23, 4  ;;  %v3030_v43 = vcombine.low %v859_v49, %v863_v53 }
  0x62   :  { %v606_v58 = vsel %vm3641_vm15, %v601_v51, %v605_v44  ;;  %v1093_v59 = vshrl.u32 %v2863_v41, 16  ;;  %v1096_v60 = vshll.u32 %v2863_v41, 16  ;;  %v1102_v61 = vshll.u32 %v2864_v52, 16  ;;  %v70_v51 = vld [vmem:[#allocation2 + $0x48] sm:$0x1] }
  0x63   :  { %v1067_v63 = vrot.slane %v1065_v56, 4  ;;  %v1070_v0 = vrot.slane %v1068_v57, 5  ;;  %v620_v3 = vsel %vm3641_vm15, %v615_v24, %v619_v48  ;;  %v1074_v7 = vshll.u32 %v2860_v6, 16 }
  0x64   :  { %v1095_v5 = vrot.slane %v1093_v59, 4  ;;  %v1079_v8 = vshrl.u32 %v3713_v16, 16  ;;  %v3022_v62 = vcombine.low %v606_v58, %v620_v3  ;;  %2053 = vrot.lane.b32.xlu0 %v3254_v54, %s3413_s28  ;;  %v1098_v10 = vrot.slane %v1096_v60, 5  ;;  %v133_v58 = vld [vmem:[#allocation2 + $0x48] sm:$0x10] }
  0x65   :  { %v1104_v13 = vrot.slane %v1102_v61, 5  ;;  %v1071_v14 = vor.u32 %v1070_v0, %v1067_v63  ;;  %v1076_v15 = vrot.slane %v1074_v7, 5  ;;  %v1082_v26 = vshll.u32 %v3713_v16, 16  ;;  %v1413_v63 = vld [vmem:[#allocation2 + $0x30] sm:$0x1f] }
  0x66   :  { %v1081_v25 = vrot.slane %v1079_v8, 4  ;;  %v1088_v32 = vshll.u32 %v2862_v55, 16  ;;  %1959 = vrot.lane.b32.xlu1 %v3022_v62, %s3420_s12  ;;  %v1099_v18 = vor.u32 %v1098_v10, %v1095_v5  ;;  %v2895_v28 = vcombine.low %v1238_v9, %v1238_v9  ;;  %v1414_v10 = vld [vmem:[#allocation2 + $0x38] sm:$0x1f] }
  0x67   :  { %v919_v34 = vld [vmem:[#allocation2 + $0x40] sm:$0x1f]  ;;  %v2896_v6 = vcombine.high %v1238_v9, %v1238_v9  ;;  %v2891_v33 = vcombine.low %v1236_v2, %v1236_v2  ;;  %v1072_v19 = vrot.slane %v1071_v14, 4  ;;  %v1084_v37 = vrot.slane %v1082_v26, 5 }
  0x68   :  { %v2865_v35 = vcombine.low %v919_v34, %v919_v34  ;;  %v2866_v36 = vcombine.high %v919_v34, %v919_v34  ;;  %v1239_v38 = vld [vmem:[#allocation2 + $0x40] sm:$0x1e]  ;;  %v1100_v39 = vrot.slane %v1099_v18, 4  ;;  %v1090_v11 = vrot.slane %v1088_v32, 5 }
  0x69   :  { %v2897_v20 = vcombine.low %v1239_v38, %v1239_v38  ;;  %v2898_v22 = vcombine.high %v1239_v38, %v1239_v38  ;;  %v1077_v17 = vsel %vm3641_vm15, %v1072_v19, %v1076_v15  ;;  %v3253_v29 = vld [vmem:[#allocation2 + $0x38] ss:$8 sps:$4 sm:$0xff]   ;;  %v1085_v21 = vor.u32 %v1084_v37, %v1081_v25  ;;  %v3758_v19 = vld [vmem:[#allocation2 + $0x30] sm:$0x1e] }
  0x6a   :  { %v1107_v44 = vshrl.u32 %v2865_v35, 16  ;;  %v1110_v45 = vshll.u32 %v2865_v35, 16  ;;  %v1116_v16 = vshll.u32 %v2866_v36, 16  ;;  %1999 = vrot.lane.b32.xlu1 %v3030_v43, %s3416_s6  ;;  %v1105_v30 = vsel %vm3641_vm15, %v1100_v39, %v1104_v13  ;;  %v1415_v24 = vld [vmem:[#allocation2 + $0x40] sm:$0x1f] }
  0x6b   :  { %v2921_v31 = vrot.slane %v2895_v28, 9  ;;  %v1354_v46 = vrot.slane %v2896_v6, 5  ;;  %v2922_v50 = vrot.slane %v2897_v20, 9  ;;  %v1086_v23 = vrot.slane %v1085_v21, 4  ;;  %v73_v36 = vld [vmem:[#allocation2 + $0x50] sm:$0x1] }
  0x6c   :  { %v1109_v48 = vrot.slane %v1107_v44, 4  ;;  %v1112_v49 = vrot.slane %v1110_v45, 5  ;;  %v1118_v40 = vrot.slane %v1116_v16, 5  ;;  %v1358_v52 = vrot.slane %v2898_v22, 5  ;;  %v76_v20 = vld [vmem:[#allocation2 + $0x58] sm:$0x1] }
  0x6d   :  { %v1355_v41 = vsel %vm3529_vm12, %v2921_v31, %v1354_v46  ;;  %v2892_v53 = vcombine.high %v1236_v2, %v1236_v2  ;;  %v2893_v55 = vcombine.low %v1237_v47, %v1237_v47  ;;  %v2894_v56 = vcombine.high %v1237_v47, %v1237_v47  ;;  %v3272_v22 = vld [vmem:[#allocation2 + $0x30] ss:$8 sps:$4 sm:$0xff]   ;;  %v3281_v47 = vld [vmem:[%s4390_s0 + $0x20] ss:$0 sps:$4 sm:$0xff]  }
  0x6e   :  { %v1113_v54 = vor.u32 %v1112_v49, %v1109_v48  ;;  %v2919_v57 = vrot.slane %v2891_v33, 9  ;;  %2055 = vrot.lane.b32.xlu1 %v3253_v29, %s3413_s28  ;;  %v1091_v43 = vsel %vm3641_vm15, %v1086_v23, %v1090_v11  ;;  %v1359_v59 = vsel %vm3529_vm12, %v2922_v50, %v1358_v52  ;;  %v136_v29 = vld [vmem:[#allocation2 + $0x50] sm:$0x10] }
  0x6f   :  { %v1346_v60 = vrot.slane %v2892_v53, 5  ;;  %v71_v61 = vsel %vm3451_vm3, 0, %v70_v51  ;;  %v3045_v2 = vcombine.low %v1077_v17, %v1091_v43  ;;  %v3054_v3 = vcombine.low %v1355_v41, %v1359_v59 }
  0x70   :  { %v1114_v0 = vrot.slane %v1113_v54, 4  ;;  %v2920_v5 = vrot.slane %v2893_v55, 9  ;;  %72 = vst [vmem:[#allocation2 + $0x48] sm:$0x1] %v71_v61  ;;  %v1350_v8 = vrot.slane %v2894_v56, 5  ;;  %v134_v9 = vsel %vm3457_vm5, 0, %v133_v58 }
  0x71   :  { %v1347_v7 = vsel %vm3529_vm12, %v2919_v57, %v1346_v60  ;;  %v2943_v62 = vcombine.low %v1415_v24, %v1415_v24  ;;  %2093 = vrot.lane.b32.xlu0 %v3045_v2, %s3418_s8  ;;  %135 = vst [vmem:[#allocation2 + $0x48] sm:$0x10] %v134_v9  ;;  %v2944_v14 = vcombine.high %v1415_v24, %v1415_v24  ;;  %v74_v54 = vsel %vm3451_vm3, 0, %v73_v36  ;;  %v3291_v36 = vld [vmem:[%s4390_s0 + $0x28] ss:$0 sps:$4 sm:$0xff]  }
  0x72   :  { %v1119_v13 = vsel %vm3641_vm15, %v1114_v0, %v1118_v40  ;;  %v2939_v15 = vcombine.low %v1413_v63, %v1413_v63  ;;  %v2940_v25 = vcombine.high %v1413_v63, %v1413_v63  ;;  %v1351_v32 = vsel %vm3529_vm12, %v2920_v5, %v1350_v8  ;;  %75 = vst [vmem:[#allocation2 + $0x50] sm:$0x1] %v74_v54  ;;  %v79_v63 = vld [vmem:[#allocation2 + $0x60] sm:$0x1] }
  0x73   :  { %v3046_v26 = vcombine.low %v1105_v30, %v1119_v13  ;;  %v1590_v34 = vshrl.u32 %v2943_v62, 16  ;;  %v1593_v18 = vshll.u32 %v2943_v62, 16  ;;  %v3053_v28 = vcombine.low %v1347_v7, %v1351_v32  ;;  %v139_v30 = vld [vmem:[#allocation2 + $0x58] sm:$0x10]  ;;  %v82_v13 = vld [vmem:[#allocation2 + $0x68] sm:$0x1] }
  0x74   :  { %v1599_v6 = vshll.u32 %v2944_v14, 16  ;;  %v2941_v33 = vcombine.low %v1414_v10, %v1414_v10  ;;  %v2942_v35 = vcombine.high %v1414_v10, %v1414_v10  ;;  %v1562_v39 = vshrl.u32 %v2939_v15, 16  ;;  %v1734_v7 = vld [vmem:[#allocation2 + $0x38] sm:$0x1e]  ;;  %v142_v14 = vld [vmem:[#allocation2 + $0x60] sm:$0x10] }
  0x75   :  { %2095 = vrot.lane.b32.xlu1 %v3046_v26, %s3418_s8  ;;  %v1592_v37 = vrot.slane %v1590_v34, 4  ;;  %v1595_v38 = vrot.slane %v1593_v18, 5  ;;  %v1565_v11 = vshll.u32 %v2939_v15, 16  ;;  %2133 = vrot.lane.b32.xlu0 %v3053_v28, %s3415_s30  ;;  %v1571_v45 = vshll.u32 %v2940_v25, 16  ;;  %v145_v34 = vld [vmem:[#allocation2 + $0x68] sm:$0x10] }
  0x76   :  { %v1601_v44 = vrot.slane %v1599_v6, 5  ;;  %v1576_v16 = vshrl.u32 %v2941_v33, 16  ;;  %v1579_v17 = vshll.u32 %v2941_v33, 16  ;;  %v1564_v31 = vrot.slane %v1562_v39, 4 }
  0x77   :  { %v1596_v21 = vor.u32 %v1595_v38, %v1592_v37  ;;  %v1567_v46 = vrot.slane %v1565_v11, 5  ;;  %v2971_v48 = vcombine.low %v3758_v19, %v3758_v19  ;;  %v3271_v49 = vld [vmem:[#allocation2 + $0x40] ss:$8 sps:$4 sm:$0xff]   ;;  %v1573_v40 = vrot.slane %v1571_v45, 5 }
  0x78   :  { %v1578_v50 = vrot.slane %v1576_v16, 4  ;;  %v1581_v51 = vrot.slane %v1579_v17, 5  ;;  %v1585_v23 = vshll.u32 %v2942_v35, 16  ;;  %v1416_v41 = vld [vmem:[#allocation2 + $0x48] sm:$0x1f]  ;;  %v77_v55 = vsel %vm3451_vm3, 0, %v76_v20 }
  0x79   :  { %2135 = vrot.lane.b32.xlu1 %v3054_v3, %s3415_s30  ;;  %v1597_v52 = vrot.slane %v1596_v21, 4  ;;  %v1568_v53 = vor.u32 %v1567_v46, %v1564_v31  ;;  %2189 = vrot.lane.b32.xlu0 %v3272_v22, %s3414_s29  ;;  %v2945_v56 = vcombine.low %v1416_v41, %v1416_v41  ;;  %v2946_v57 = vcombine.high %v1416_v41, %v1416_v41  ;;  %v3290_v35 = vld [vmem:[%s4390_s0 + $0x24] ss:$0 sps:$4 sm:$0xff]   ;;  %v3404_v31 = vld [vmem:[%s4391_s1 + $0x8] sm:$0xff]  }
  0x7a   :  { %v1582_v58 = vor.u32 %v1581_v51, %v1578_v50  ;;  %v1587_v24 = vrot.slane %v1585_v23, 5  ;;  %78 = vst [vmem:[#allocation2 + $0x58] sm:$0x1] %v77_v55  ;;  %v137_v60 = vsel %vm3457_vm5, 0, %v136_v29  ;;  %v140_v61 = vsel %vm3457_vm5, 0, %v139_v30  ;;  %v3402_v16 = vld [vmem:[%s4391_s1] sm:$0xff]  }
  0x7b   :  { %v3775_v43 = vsel %vm3641_vm15, %v1597_v52, %v1601_v44  ;;  %v1569_v59 = vrot.slane %v1568_v53, 4  ;;  %v1604_v0 = vshrl.u32 %v2945_v56, 16  ;;  %v1607_v2 = vshll.u32 %v2945_v56, 16  ;;  %138 = vst [vmem:[#allocation2 + $0x50] sm:$0x10] %v137_v60  ;;  %3138 = vmatprep.subr.bf16.mxu0 %v3402_v16  ;;  %3160 = vmatprep.subr.bf16.mxu1 %v3402_v16 }
  0x7c   :  { %v1613_v3 = vshll.u32 %v2946_v57, 16  ;;  %v1583_v5 = vrot.slane %v1582_v58, 4  ;;  %141 = vst [vmem:[#allocation2 + $0x58] sm:$0x10] %v140_v61  ;;  %v271_v9 = vshrl.u32 %v3281_v47, 16  ;;  %v274_v62 = vshll.u32 %v3281_v47, 16  ;;  %3139 = vmatpush3.bf16.msra.mxu0 %v3402_v16  ;;  %3163 = vmatpush3.bf16.msra.mxu1 %v3402_v16 }
  0x7d   :  { %2191 = vrot.lane.b32.xlu1 %v3271_v49, %s3414_s29  ;;  %v1574_v8 = vsel %vm3641_vm15, %v1569_v59, %v1573_v40  ;;  %v2972_v10 = vcombine.high %v3758_v19, %v3758_v19  ;;  %v1606_v15 = vrot.slane %v1604_v0, 4  ;;  %v1609_v25 = vrot.slane %v1607_v2, 5  ;;  %v1735_v11 = vld [vmem:[#allocation2 + $0x40] sm:$0x1e]  ;;  %v1736_v53 = vld [vmem:[#allocation2 + $0x48] sm:$0x1e]  ;;  %3140 = vmatprep.subr.bf16.mxu0 %v3404_v31 }
  0x7e   :  { %v1615_v26 = vrot.slane %v1613_v3, 5  ;;  %v1588_v32 = vsel %vm3641_vm15, %v1583_v5, %v1587_v24  ;;  %v273_v28 = vrot.slane %v271_v9, 7  ;;  %v2973_v6 = vcombine.low %v1734_v7, %v1734_v7  ;;  %3161 = vmatprep.subr.bf16.mxu1 %v3404_v31  ;;  %v85_v3 = vld [vmem:[#allocation2 + $0x70] sm:$0x1] }
  0x7f   :  { %v3069_v18 = vcombine.low %v1574_v8, %v1588_v32  ;;  %v2974_v33 = vcombine.high %v1734_v7, %v1734_v7  ;;  %v1610_v19 = vor.u32 %v1609_v25, %v1606_v15  ;;  %v2999_v37 = vrot.slane %v2971_v48, 9 }
  0x80   :  { %v1843_v38 = vrot.slane %v2972_v10, 5  ;;  %v80_v39 = vsel %vm3451_vm3, 0, %v79_v63  ;;  %v276_v20 = vor.u32 %v274_v62, %v273_v28  ;;  %v3000_v22 = vrot.slane %v2973_v6, 9  ;;  %3141 = vmatpush3.bf16.msra.mxu0 %v3404_v31  ;;  %3164 = vmatpush3.bf16.msra.mxu1 %v3404_v31 }
  0x81   :  { %2229 = vrot.lane.b32.xlu0 %v3069_v18, %s3419_s9  ;;  %v1847_v44 = vrot.slane %v2974_v33, 5  ;;  %81 = vst [vmem:[#allocation2 + $0x60] sm:$0x1] %v80_v39  ;;  %v83_v45 = vsel %vm3451_vm3, 0, %v82_v13  ;;  %v1611_v17 = vrot.slane %v1610_v19, 4  ;;  %v143_v30 = vsel %vm3457_vm5, 0, %v142_v14 }
  0x82   :  { %v1844_v29 = vsel %vm3529_vm12, %v2999_v37, %v1843_v38  ;;  %84 = vst [vmem:[#allocation2 + $0x68] sm:$0x1] %v83_v45  ;;  %v146_v21 = vsel %vm3457_vm5, 0, %v145_v34  ;;  %v418_v47 = vld [vmem:[#allocation2 + $0x50] sm:$0x1f]  ;;  %v278_v49 = vshrl.u32 %v3290_v35, 16  ;;  %v2975_v50 = vcombine.low %v1735_v11, %v1735_v11 }
  0x83   :  { %v370_v46 = vld [vmem:[#allocation2 + $0x58] sm:$0x1f]  ;;  %v1848_v48 = vsel %vm3529_vm12, %v3000_v22, %v1847_v44  ;;  %144 = vst [vmem:[#allocation2 + $0x60] sm:$0x10] %v143_v30  ;;  %147 = vst [vmem:[#allocation2 + $0x68] sm:$0x10] %v146_v21  ;;  %v1616_v51 = vsel %vm3641_vm15, %v1611_v17, %v1615_v26  ;;  %v2787_v41 = vcombine.low %v418_v47, %v418_v47 }
  0x84   :  { %v281_v40 = vshll.u32 %v3290_v35, 16  ;;  %v371_v23 = vsel %vm3484_vm8, %v276_v20, %v370_v46  ;;  %v2788_v52 = vcombine.high %v418_v47, %v418_v47  ;;  %v3070_v54 = vcombine.low %v3775_v43, %v1616_v51  ;;  %v741_v43 = vld [vmem:[#allocation2 + $0x50] sm:$0x1e]  ;;  %v3831_v19 = vld [vmem:[%s4390_s0 + $0x2c] ss:$0 sps:$4 sm:$0xff]  }
  0x85   :  { %372 = vst [vmem:[#allocation2 + $0x58] sm:$0x1f] %v371_v23  ;;  %v3077_v55 = vcombine.low %v1844_v29, %v1848_v48  ;;  %v280_v56 = vrot.slane %v278_v49, 7  ;;  %v285_v57 = vshrl.u32 %v3291_v36, 16  ;;  %v622_v58 = vshrl.u32 %v2787_v41, 16 }
  0x86   :  { %v625_v24 = vshll.u32 %v2787_v41, 16  ;;  %v631_v59 = vshll.u32 %v2788_v52, 16  ;;  %v288_v60 = vshll.u32 %v3291_v36, 16  ;;  %2231 = vrot.lane.b32.xlu1 %v3070_v54, %s3419_s9  ;;  %v2976_v0 = vcombine.high %v1735_v11, %v1735_v11  ;;  %v148_v36 = vld [vmem:[#allocation2 + $0x70] sm:$0x10] }
  0x87   :  { %2269 = vrot.lane.b32.xlu0 %v3077_v55, %s3417_s7  ;;  %v283_v61 = vor.u32 %v281_v40, %v280_v56  ;;  %v287_v63 = vrot.slane %v285_v57, 7  ;;  %v2977_v2 = vcombine.low %v1736_v53, %v1736_v53  ;;  %v624_v5 = vrot.slane %v622_v58, 4 }
  0x88   :  { %v627_v7 = vrot.slane %v625_v24, 5  ;;  %v633_v8 = vrot.slane %v631_v59, 5  ;;  %v2978_v9 = vcombine.high %v1736_v53, %v1736_v53  ;;  %v3001_v10 = vrot.slane %v2975_v50, 9 }
  0x89   :  { %v290_v62 = vor.u32 %v288_v60, %v287_v63  ;;  %v1851_v13 = vrot.slane %v2976_v0, 5  ;;  %v3002_v14 = vrot.slane %v2977_v2, 9  ;;  %v2819_v34 = vcombine.low %v741_v43, %v741_v43 }
  0x8a   :  { %v628_v15 = vor.u32 %v627_v7, %v624_v5  ;;  %v373_v25 = vld [vmem:[#allocation2 + $0x60] sm:$0x1f]  ;;  %v376_v26 = vld [vmem:[#allocation2 + $0x68] sm:$0x1f]  ;;  %v1855_v32 = vrot.slane %v2978_v9, 5  ;;  %v2820_v18 = vcombine.high %v741_v43, %v741_v43  ;;  %v86_v35 = vsel %vm3451_vm3, 0, %v85_v3 }
  0x8b   :  { %v374_v28 = vsel %vm3484_vm8, %v283_v61, %v373_v25  ;;  %v377_v6 = vsel %vm3484_vm8, %v290_v62, %v376_v26  ;;  %v1852_v33 = vsel %vm3529_vm12, %v3001_v10, %v1851_v13  ;;  %v2843_v20 = vrot.slane %v2819_v34, 9  ;;  %87 = vst [vmem:[#allocation2 + $0x70] sm:$0x1] %v86_v35 }
  0x8c   :  { %v419_v37 = vld [vmem:[#allocation2 + $0x58] sm:$0x1f]  ;;  %v629_v38 = vrot.slane %v628_v15, 4  ;;  %375 = vst [vmem:[#allocation2 + $0x60] sm:$0x1f] %v374_v28  ;;  %v1856_v39 = vsel %vm3529_vm12, %v3002_v14, %v1855_v32  ;;  %v866_v29 = vrot.slane %v2820_v18, 5 }
  0x8d   :  { %378 = vst [vmem:[#allocation2 + $0x68] sm:$0x1f] %v377_v6  ;;  %v742_v11 = vld [vmem:[#allocation2 + $0x58] sm:$0x1e]  ;;  %v2789_v22 = vcombine.low %v419_v37, %v419_v37  ;;  %v2790_v44 = vcombine.high %v419_v37, %v419_v37  ;;  %v3078_v45 = vcombine.low %v1852_v33, %v1856_v39  ;;  %v149_v30 = vsel %vm3457_vm5, 0, %v148_v36 }
  0x8e   :  { %v2821_v16 = vcombine.low %v742_v11, %v742_v11  ;;  %v2822_v17 = vcombine.high %v742_v11, %v742_v11  ;;  %150 = vst [vmem:[#allocation2 + $0x70] sm:$0x10] %v149_v30  ;;  %v3838_v48 = vld [vmem:[#allocation2 + $0x58] sm:$0x1f]  ;;  %v634_v49 = vsel %vm3641_vm15, %v629_v38, %v633_v8  ;;  %v867_v40 = vsel %vm3529_vm12, %v2843_v20, %v866_v29 }
  0x8f   :  { %v636_v21 = vshrl.u32 %v2789_v22, 16  ;;  %v639_v31 = vshll.u32 %v2789_v22, 16  ;;  %v645_v46 = vshll.u32 %v2790_v44, 16  ;;  %2271 = vrot.lane.b32.xlu0 %v3078_v45, %s3417_s7  ;;  %v292_v51 = vshrl.u32 %v3831_v19, 16  ;;  %v3845_v23 = vld [vmem:[#allocation2 + $0x58] sm:$0x1e] }
  0x90   :  { %v2844_v47 = vrot.slane %v2821_v16, 9  ;;  %v870_v50 = vrot.slane %v2822_v17, 5  ;;  %v295_v54 = vshll.u32 %v3831_v19, 16  ;;  %v3852_v57 = vcombine.low %v3838_v48, %v3838_v48 }
  0x91   :  { %v638_v41 = vrot.slane %v636_v21, 4  ;;  %v641_v52 = vrot.slane %v639_v31, 5  ;;  %v647_v53 = vrot.slane %v645_v46, 5  ;;  %v294_v56 = vrot.slane %v292_v51, 7 }
  0x92   :  { %v871_v55 = vsel %vm3529_vm12, %v2844_v47, %v870_v50  ;;  %v2868_v58 = vcombine.high %v3838_v48, %v3838_v48  ;;  %v2899_v0 = vcombine.low %v3845_v23, %v3845_v23  ;;  %v2900_v2 = vcombine.high %v3845_v23, %v3845_v23 }
  0x93   :  { %v642_v24 = vor.u32 %v641_v52, %v638_v41  ;;  %v420_v59 = vld [vmem:[#allocation2 + $0x60] sm:$0x1f]  ;;  %v3031_v63 = vcombine.low %v867_v40, %v871_v55  ;;  %v297_v21 = vor.u32 %v295_v54, %v294_v56  ;;  %vm2305_vm0 = vcmask 64512  }
  0x94   :  { %v421_v60 = vld [vmem:[#allocation2 + $0x68] sm:$0x1f]  ;;  %v743_v61 = vld [vmem:[#allocation2 + $0x60] sm:$0x1e]  ;;  %v2791_v43 = vcombine.low %v420_v59, %v420_v59  ;;  %v2792_v3 = vcombine.high %v420_v59, %v420_v59  ;;  %vm2322_vm1 = vcmask 97280   ;;  %vm2339_vm2 = vcmask 130048  }
  0x95   :  { %v2793_v5 = vcombine.low %v421_v60, %v421_v60  ;;  %v2794_v7 = vcombine.high %v421_v60, %v421_v60  ;;  %v744_v8 = vld [vmem:[#allocation2 + $0x68] sm:$0x1e]  ;;  %v643_v9 = vrot.slane %v642_v24, 4  ;;  %v2823_v62 = vcombine.low %v743_v61, %v743_v61  ;;  %2001 = vrot.lane.b32.xlu0 %v3031_v63, %s3416_s6  ;;  %v3310_v14 = vld [vmem:[#allocation2 + $0x58] ss:$8 sps:$4 sm:$0xff]  }
  0x96   :  { %v2824_v10 = vcombine.high %v743_v61, %v743_v61  ;;  %v2825_v13 = vcombine.low %v744_v8, %v744_v8  ;;  %v650_v15 = vshrl.u32 %v2791_v43, 16  ;;  %v653_v25 = vshll.u32 %v2791_v43, 16  ;;  %v922_v33 = vld [vmem:[#allocation2 + $0x68] sm:$0x1f]  ;;  %v379_v38 = vld [vmem:[#allocation2 + $0x70] sm:$0x1f] }
  0x97   :  { %v659_v26 = vshll.u32 %v2792_v3, 16  ;;  %v664_v32 = vshrl.u32 %v2793_v5, 16  ;;  %v648_v34 = vsel %vm3641_vm15, %v643_v9, %v647_v53  ;;  %v667_v18 = vshll.u32 %v2793_v5, 16  ;;  %v921_v39 = vld [vmem:[#allocation2 + $0x60] sm:$0x1f] }
  0x98   :  { %v673_v28 = vshll.u32 %v2794_v7, 16  ;;  %v2826_v6 = vcombine.high %v744_v8, %v744_v8  ;;  %v3023_v35 = vcombine.low %v634_v49, %v648_v34  ;;  %v652_v36 = vrot.slane %v650_v15, 4  ;;  %v1242_v43 = vld [vmem:[#allocation2 + $0x68] sm:$0x1e] }
  0x99   :  { %v655_v19 = vrot.slane %v653_v25, 5  ;;  %v661_v37 = vrot.slane %v659_v26, 5  ;;  %v666_v11 = vrot.slane %v664_v32, 4  ;;  %v669_v20 = vrot.slane %v667_v18, 5  ;;  %2057 = vrot.lane.b32.xlu0 %v3310_v14, %s3413_s28  ;;  %v1241_v14 = vld [vmem:[#allocation2 + $0x60] sm:$0x1e] }
  0x9a   :  { %v675_v22 = vrot.slane %v673_v28, 5  ;;  %v2845_v44 = vrot.slane %v2823_v62, 9  ;;  %1961 = vrot.lane.b32.xlu1 %v3023_v35, %s3420_s12  ;;  %v874_v16 = vrot.slane %v2824_v10, 5  ;;  %v2846_v17 = vrot.slane %v2825_v13, 9 }
  0x9b   :  { %v656_v45 = vor.u32 %v655_v19, %v652_v36  ;;  %v878_v29 = vrot.slane %v2826_v6, 5  ;;  %v670_v30 = vor.u32 %v669_v20, %v666_v11  ;;  %v2871_v31 = vcombine.low %v922_v33, %v922_v33  ;;  %v3889_v20 = vpop.permute.xlu0 %2049 }
  0x9c   :  { %v2872_v46 = vcombine.high %v922_v33, %v922_v33  ;;  %v875_v49 = vsel %vm3529_vm12, %v2845_v44, %v874_v16  ;;  %v2869_v50 = vcombine.low %v921_v39, %v921_v39  ;;  %v380_v52 = vsel %vm3484_vm8, %v297_v21, %v379_v38 }
  0x9d   :  { %v657_v47 = vrot.slane %v656_v45, 4  ;;  %v879_v40 = vsel %vm3529_vm12, %v2846_v17, %v878_v29  ;;  %v671_v51 = vrot.slane %v670_v30, 4  ;;  %v1149_v53 = vshrl.u32 %v2871_v31, 16  ;;  %381 = vst [vmem:[#allocation2 + $0x70] sm:$0x1f] %v380_v52 }
  0x9e   :  { %v3032_v41 = vcombine.low %v875_v49, %v879_v40  ;;  %v1152_v54 = vshll.u32 %v2871_v31, 16  ;;  %v1158_v56 = vshll.u32 %v2872_v46, 16  ;;  %v2870_v24 = vcombine.high %v921_v39, %v921_v39 }
  0x9f   :  { %v662_v55 = vsel %vm3641_vm15, %v657_v47, %v661_v37  ;;  %v676_v59 = vsel %vm3641_vm15, %v671_v51, %v675_v22  ;;  %v1151_v60 = vrot.slane %v1149_v53, 4  ;;  %v1121_v61 = vshrl.u32 %v3852_v57, 16 }
  0xa0   :  { %v1124_v63 = vshll.u32 %v3852_v57, 16  ;;  %v3024_v3 = vcombine.low %v662_v55, %v676_v59  ;;  %v1154_v5 = vrot.slane %v1152_v54, 5  ;;  %v1160_v7 = vrot.slane %v1158_v56, 5  ;;  %v3881_v57 = vld [vmem:[#allocation2 + $0x60] sm:$0x1f] }
  0xa1   :  { %v1130_v8 = vshll.u32 %v2868_v58, 16  ;;  %v1123_v9 = vrot.slane %v1121_v61, 4  ;;  %v1135_v10 = vshrl.u32 %v2869_v50, 16  ;;  %v1138_v13 = vshll.u32 %v2869_v50, 16  ;;  %v88_v50 = vld [vmem:[#allocation2 + $0x78] sm:$0x1] }
  0xa2   :  { %v1126_v62 = vrot.slane %v1124_v63, 5  ;;  %1963 = vrot.lane.b32.xlu1 %v3024_v3, %s3420_s12  ;;  %v1155_v15 = vor.u32 %v1154_v5, %v1151_v60  ;;  %v1144_v26 = vshll.u32 %v2870_v24, 16  ;;  %v2903_v32 = vcombine.low %v1242_v43, %v1242_v43  ;;  %v3327_v55 = vld [vmem:[%s4390_s0 + $0x30] ss:$0 sps:$4 sm:$0xff]   ;;  %v151_v60 = vld [vmem:[#allocation2 + $0x78] sm:$0x10] }
  0xa3   :  { %v1132_v25 = vrot.slane %v1130_v8, 5  ;;  %v1137_v18 = vrot.slane %v1135_v10, 4  ;;  %v1140_v28 = vrot.slane %v1138_v13, 5  ;;  %v2904_v6 = vcombine.high %v1242_v43, %v1242_v43  ;;  %v1418_v13 = vld [vmem:[#allocation2 + $0x68] sm:$0x1f] }
  0xa4   :  { %v1127_v34 = vor.u32 %v1126_v62, %v1123_v9  ;;  %v1156_v33 = vrot.slane %v1155_v15, 4  ;;  %v1146_v48 = vrot.slane %v1144_v26, 5  ;;  %v2925_v58 = vrot.slane %v2903_v32, 9  ;;  %v3309_v36 = vld [vmem:[#allocation2 + $0x68] ss:$8 sps:$4 sm:$0xff]  }
  0xa5   :  { %v2901_v35 = vcombine.low %v1241_v14, %v1241_v14  ;;  %v923_v19 = vld [vmem:[#allocation2 + $0x70] sm:$0x1f]  ;;  %v1141_v37 = vor.u32 %v1140_v28, %v1137_v18  ;;  %v2902_v38 = vcombine.high %v1241_v14, %v1241_v14  ;;  %v3885_v39 = vcombine.low %v3881_v57, %v3881_v57 }
  0xa6   :  { %v2948_v11 = vcombine.high %v3881_v57, %v3881_v57  ;;  %2003 = vrot.lane.b32.xlu1 %v3032_v41, %s3416_s6  ;;  %v2873_v22 = vcombine.low %v923_v19, %v923_v19  ;;  %v2874_v44 = vcombine.high %v923_v19, %v923_v19  ;;  %v3894_v45 = vsel %vm3641_vm15, %v1156_v33, %v1160_v7  ;;  %v1243_v17 = vld [vmem:[#allocation2 + $0x70] sm:$0x1e]  ;;  %v3914_v7 = vpop.permute.xlu0 %2185 }
  0xa7   :  { %v1128_v16 = vrot.slane %v1127_v34, 4  ;;  %v1142_v29 = vrot.slane %v1141_v37, 4  ;;  %v2905_v30 = vcombine.low %v1243_v17, %v1243_v17  ;;  %v2906_v21 = vcombine.high %v1243_v17, %v1243_v17  ;;  %v1419_v5 = vld [vmem:[#allocation2 + $0x70] sm:$0x1f] }
  0xa8   :  { %v1370_v31 = vrot.slane %v2904_v6, 5  ;;  %v1163_v46 = vshrl.u32 %v2873_v22, 16  ;;  %v1166_v47 = vshll.u32 %v2873_v22, 16  ;;  %v1172_v49 = vshll.u32 %v2874_v44, 16 }
  0xa9   :  { %v1133_v40 = vsel %vm3641_vm15, %v1128_v16, %v1132_v25  ;;  %v1147_v51 = vsel %vm3641_vm15, %v1142_v29, %v1146_v48  ;;  %v2926_v52 = vrot.slane %v2905_v30, 9  ;;  %v1374_v53 = vrot.slane %v2906_v21, 5  ;;  %v422_v16 = vld [vmem:[#allocation2 + $0x70] sm:$0x1f] }
  0xaa   :  { %v1371_v41 = vsel %vm3529_vm12, %v2925_v58, %v1370_v31  ;;  %2059 = vrot.lane.b32.xlu1 %v3309_v36, %s3413_s28  ;;  %v1165_v54 = vrot.slane %v1163_v46, 4  ;;  %v1168_v56 = vrot.slane %v1166_v47, 5  ;;  %v1174_v24 = vrot.slane %v1172_v49, 5  ;;  %v3927_v36 = vpop.permute.xlu1 %2051  ;;  %v3933_v17 = vpop.permute.xlu0 %2129 }
  0xab   :  { %v3047_v59 = vcombine.low %v1133_v40, %v1147_v51  ;;  %v1375_v61 = vsel %vm3529_vm12, %v2926_v52, %v1374_v53  ;;  %v2923_v63 = vrot.slane %v2899_v0, 9  ;;  %v1362_v43 = vrot.slane %v2900_v2, 5 }
  0xac   :  { %v2924_v3 = vrot.slane %v2901_v35, 9  ;;  %v1169_v8 = vor.u32 %v1168_v56, %v1165_v54  ;;  %v3056_v9 = vcombine.low %v1371_v41, %v1375_v61  ;;  %v1366_v62 = vrot.slane %v2902_v38, 5  ;;  %v3329_v38 = vld [vmem:[#allocation2 + $0x60] ss:$8 sps:$4 sm:$0xff]  }
  0xad   :  { %2097 = vrot.lane.b32.xlu0 %v3047_v59, %s3418_s8  ;;  %v89_v10 = vsel %vm3451_vm3, 0, %v88_v50  ;;  %v1363_v0 = vsel %vm3529_vm12, %v2923_v63, %v1362_v43  ;;  %v152_v23 = vsel %vm3457_vm5, 0, %v151_v60  ;;  %v299_v2 = vshrl.u32 %v3327_v55, 16  ;;  %v1737_v56 = vld [vmem:[#allocation2 + $0x60] sm:$0x1e] }
  0xae   :  { %90 = vst [vmem:[#allocation2 + $0x78] sm:$0x1] %v89_v10  ;;  %v302_v14 = vshll.u32 %v3327_v55, 16  ;;  %v1170_v15 = vrot.slane %v1169_v8, 4  ;;  %v1367_v25 = vsel %vm3529_vm12, %v2924_v3, %v1366_v62  ;;  %153 = vst [vmem:[#allocation2 + $0x78] sm:$0x10] %v152_v23  ;;  %v2951_v26 = vcombine.low %v1419_v5, %v1419_v5  ;;  %v3942_v60 = vpop.permute.xlu1 %2187  ;;  %v3945_v8 = vpop.permute.xlu0 %2265 }
  0xaf   :  { %v2952_v32 = vcombine.high %v1419_v5, %v1419_v5  ;;  %v3055_v34 = vcombine.low %v1363_v0, %v1367_v25  ;;  %v301_v18 = vrot.slane %v299_v2, 7  ;;  %v2949_v28 = vcombine.low %v1418_v13, %v1418_v13  ;;  %v1738_v5 = vld [vmem:[#allocation2 + $0x68] sm:$0x1e]  ;;  %v91_v23 = vld [vmem:[#allocation2 + $0x80] sm:$0x1] }
  0xb0   :  { %v2950_v6 = vcombine.high %v1418_v13, %v1418_v13  ;;  %v1175_v33 = vsel %vm3641_vm15, %v1170_v15, %v1174_v24  ;;  %v1646_v48 = vshrl.u32 %v2951_v26, 16  ;;  %v1649_v58 = vshll.u32 %v2951_v26, 16  ;;  %v94_v2 = vld [vmem:[#allocation2 + $0x88] sm:$0x1]  ;;  %v3346_v26 = vld [vmem:[%s4390_s0 + $0x34] ss:$0 sps:$4 sm:$0xff]  }
  0xb1   :  { %v1655_v35 = vshll.u32 %v2952_v32, 16  ;;  %v3048_v19 = vcombine.low %v3894_v45, %v1175_v33  ;;  %2137 = vrot.lane.b32.xlu0 %v3055_v34, %s3415_s30  ;;  %v304_v37 = vor.u32 %v302_v14, %v301_v18  ;;  %v1618_v22 = vshrl.u32 %v3885_v39, 16  ;;  %v157_v33 = vld [vmem:[#allocation2 + $0x88] sm:$0x10] }
  0xb2   :  { %v1621_v44 = vshll.u32 %v3885_v39, 16  ;;  %v1648_v29 = vrot.slane %v1646_v48, 4  ;;  %v1651_v30 = vrot.slane %v1649_v58, 5  ;;  %v1627_v31 = vshll.u32 %v2948_v11, 16 }
  0xb3   :  { %v1657_v21 = vrot.slane %v1655_v35, 5  ;;  %2099 = vrot.lane.b32.xlu1 %v3048_v19, %s3418_s8  ;;  %v1620_v45 = vrot.slane %v1618_v22, 4  ;;  %v1632_v47 = vshrl.u32 %v2949_v28, 16  ;;  %v1635_v49 = vshll.u32 %v2949_v28, 16 }
  0xb4   :  { %v1623_v46 = vrot.slane %v1621_v44, 5  ;;  %v1652_v40 = vor.u32 %v1651_v30, %v1648_v29  ;;  %v1629_v50 = vrot.slane %v1627_v31, 5  ;;  %v1641_v51 = vshll.u32 %v2950_v6, 16  ;;  %v154_v6 = vld [vmem:[#allocation2 + $0x80] sm:$0x10]  ;;  %v3968_v30 = vpop.permute.xlu1 %1993 }
  0xb5   :  { %v2795_v39 = vcombine.low %v422_v16, %v422_v16  ;;  %v382_v41 = vld [vmem:[#allocation2 + $0x78] sm:$0x1f]  ;;  %2193 = vrot.lane.b32.xlu0 %v3329_v38, %s3414_s29  ;;  %v1634_v53 = vrot.slane %v1632_v47, 4  ;;  %v1637_v55 = vrot.slane %v1635_v49, 5  ;;  %v2796_v54 = vcombine.high %v422_v16, %v422_v16  ;;  %v3964_v38 = vld [vmem:[#allocation2 + $0x70] sm:$0x1e]  ;;  %v3977_v49 = vpop.permute.xlu0 %2267 }
  0xb6   :  { %v1624_v52 = vor.u32 %v1623_v46, %v1620_v45  ;;  %v383_v57 = vsel %vm3484_vm8, %v304_v37, %v382_v41  ;;  %v1653_v11 = vrot.slane %v1652_v40, 4  ;;  %v1643_v24 = vrot.slane %v1641_v51, 5  ;;  %v3962_v37 = vld [vmem:[#allocation2 + $0x70] sm:$0x1e]  ;;  %v3347_v46 = vld [vmem:[%s4390_s0 + $0x38] ss:$0 sps:$4 sm:$0xff]  }
  0xb7   :  { %v678_v59 = vshrl.u32 %v2795_v39, 16  ;;  %2139 = vrot.lane.b32.xlu1 %v3056_v9, %s3415_s30  ;;  %384 = vst [vmem:[#allocation2 + $0x78] sm:$0x1f] %v383_v57  ;;  %v1638_v63 = vor.u32 %v1637_v55, %v1634_v53  ;;  %v681_v43 = vshll.u32 %v2795_v39, 16  ;;  %v687_v3 = vshll.u32 %v2796_v54, 16 }
  0xb8   :  { %v1625_v61 = vrot.slane %v1624_v52, 4  ;;  %v3949_v62 = vsel %vm3641_vm15, %v1653_v11, %v1657_v21  ;;  %v2979_v13 = vcombine.low %v1737_v56, %v1737_v56  ;;  %v2980_v0 = vcombine.high %v1737_v56, %v1737_v56 }
  0xb9   :  { %v680_v10 = vrot.slane %v678_v59, 4  ;;  %v1639_v14 = vrot.slane %v1638_v63, 4  ;;  %v683_v15 = vrot.slane %v681_v43, 5  ;;  %v689_v25 = vrot.slane %v687_v3, 5 }
  0xba   :  { %v1630_v9 = vsel %vm3641_vm15, %v1625_v61, %v1629_v50  ;;  %v2981_v32 = vcombine.low %v1738_v5, %v1738_v5  ;;  %v2982_v34 = vcombine.high %v1738_v5, %v1738_v5  ;;  %v3003_v18 = vrot.slane %v2979_v13, 9 }
  0xbb   :  { %v1859_v28 = vrot.slane %v2980_v0, 5  ;;  %v1644_v48 = vsel %vm3641_vm15, %v1639_v14, %v1643_v24  ;;  %v684_v58 = vor.u32 %v683_v15, %v680_v10  ;;  %v92_v35 = vsel %vm3451_vm3, 0, %v91_v23 }
  0xbc   :  { %v95_v19 = vsel %vm3451_vm3, 0, %v94_v2  ;;  %v3071_v22 = vcombine.low %v1630_v9, %v1644_v48  ;;  %v3004_v16 = vrot.slane %v2981_v32, 9  ;;  %v1863_v29 = vrot.slane %v2982_v34, 5  ;;  %93 = vst [vmem:[#allocation2 + $0x80] sm:$0x1] %v92_v35  ;;  %v3994_v9 = vpop.permute.xlu1 %1995  ;;  %v3996_v34 = vpop.permute.xlu0 %1953 }
  0xbd   :  { %v1860_v44 = vsel %vm3529_vm12, %v3003_v18, %v1859_v28  ;;  %96 = vst [vmem:[#allocation2 + $0x88] sm:$0x1] %v95_v19  ;;  %v685_v21 = vrot.slane %v684_v58, 4  ;;  %v155_v31 = vsel %vm3457_vm5, 0, %v154_v6  ;;  %v158_v45 = vsel %vm3457_vm5, 0, %v157_v33 }
  0xbe   :  { %v306_v47 = vshrl.u32 %v3346_v26, 16  ;;  %v3328_v40 = vld [vmem:[#allocation2 + $0x70] ss:$8 sps:$4 sm:$0xff]   ;;  %2233 = vrot.lane.b32.xlu0 %v3071_v22, %s3419_s9  ;;  %v1864_v51 = vsel %vm3529_vm12, %v3004_v16, %v1863_v29  ;;  %156 = vst [vmem:[#allocation2 + $0x80] sm:$0x10] %v155_v31  ;;  %v2983_v39 = vcombine.low %v3962_v37, %v3962_v37  ;;  %v2984_v41 = vcombine.high %v3962_v37, %v3962_v37 }
  0xbf   :  { %v1420_v50 = vld [vmem:[#allocation2 + $0x78] sm:$0x1f]  ;;  %159 = vst [vmem:[#allocation2 + $0x88] sm:$0x10] %v158_v45  ;;  %v2827_v52 = vcombine.low %v3964_v38, %v3964_v38  ;;  %v3990_v56 = vsel %vm3641_vm15, %v685_v21, %v689_v25  ;;  %v3079_v57 = vcombine.low %v1860_v44, %v1864_v51  ;;  %2195 = vrot.lane.b32.xlu1 %v3328_v40, %s3414_s29  ;;  %v309_v61 = vshll.u32 %v3346_v26, 16 }
  0xc0   :  { %v2953_v53 = vcombine.low %v1420_v50, %v1420_v50  ;;  %v2954_v55 = vcombine.high %v1420_v50, %v1420_v50  ;;  %v423_v54 = vld [vmem:[#allocation2 + $0x78] sm:$0x1f]  ;;  %v308_v59 = vrot.slane %v306_v47, 7  ;;  %v313_v5 = vshrl.u32 %v3347_v46, 16 }
  0xc1   :  { %v2797_v11 = vcombine.low %v423_v54, %v423_v54  ;;  %v2798_v24 = vcombine.high %v423_v54, %v423_v54  ;;  %v1740_v10 = vld [vmem:[#allocation2 + $0x78] sm:$0x1e]  ;;  %v316_v6 = vshll.u32 %v3347_v46, 16  ;;  %v3005_v22 = vrot.slane %v2983_v39, 9 }
  0xc2   :  { %v1660_v63 = vshrl.u32 %v2953_v53, 16  ;;  %v1663_v43 = vshll.u32 %v2953_v53, 16  ;;  %v1669_v3 = vshll.u32 %v2954_v55, 16  ;;  %2273 = vrot.lane.b32.xlu0 %v3079_v57, %s3417_s7  ;;  %v311_v2 = vor.u32 %v309_v61, %v308_v59  ;;  %v746_v33 = vld [vmem:[#allocation2 + $0x78] sm:$0x1e]  ;;  %v4009_v55 = vpop.permute.xlu1 %2131  ;;  %v4015_v59 = vpop.permute.xlu0 %1955 }
  0xc3   :  { %v692_v13 = vshrl.u32 %v2797_v11, 16  ;;  %v695_v0 = vshll.u32 %v2797_v11, 16  ;;  %v701_v23 = vshll.u32 %v2798_v24, 16  ;;  %v315_v32 = vrot.slane %v313_v5, 7  ;;  %v97_v53 = vld [vmem:[#allocation2 + $0x90] sm:$0x1] }
  0xc4   :  { %v1662_v14 = vrot.slane %v1660_v63, 4  ;;  %v1665_v15 = vrot.slane %v1663_v43, 5  ;;  %v1671_v25 = vrot.slane %v1669_v3, 5  ;;  %v2985_v19 = vcombine.low %v1740_v10, %v1740_v10  ;;  %v160_v24 = vld [vmem:[#allocation2 + $0x90] sm:$0x10] }
  0xc5   :  { %v694_v26 = vrot.slane %v692_v13, 4  ;;  %v697_v18 = vrot.slane %v695_v0, 5  ;;  %v703_v28 = vrot.slane %v701_v23, 5  ;;  %v385_v58 = vld [vmem:[#allocation2 + $0x80] sm:$0x1f]  ;;  %v2986_v37 = vcombine.high %v1740_v10, %v1740_v10 }
  0xc6   :  { %v1666_v48 = vor.u32 %v1665_v15, %v1662_v14  ;;  %v388_v35 = vld [vmem:[#allocation2 + $0x88] sm:$0x1f]  ;;  %v318_v16 = vor.u32 %v316_v6, %v315_v32  ;;  %v386_v29 = vsel %vm3484_vm8, %v311_v2, %v385_v58  ;;  %v1867_v21 = vrot.slane %v2984_v41, 5  ;;  %v3364_v41 = vld [vmem:[%s4390_s0 + $0x3c] ss:$0 sps:$4 sm:$0xff]  }
  0xc7   :  { %v698_v44 = vor.u32 %v697_v18, %v694_v26  ;;  %387 = vst [vmem:[#allocation2 + $0x80] sm:$0x1f] %v386_v29  ;;  %v3006_v45 = vrot.slane %v2985_v19, 9  ;;  %v1871_v47 = vrot.slane %v2986_v37, 5  ;;  %v2828_v46 = vcombine.high %v3964_v38, %v3964_v38  ;;  %v4020_v5 = vld [vmem:[#allocation2 + $0x78] sm:$0x1f] }
  0xc8   :  { %v1667_v31 = vrot.slane %v1666_v48, 4  ;;  %v389_v50 = vsel %vm3484_vm8, %v318_v16, %v388_v35  ;;  %v1868_v51 = vsel %vm3529_vm12, %v3005_v22, %v1867_v21  ;;  %v2829_v39 = vcombine.low %v746_v33, %v746_v33  ;;  %v100_v10 = vld [vmem:[#allocation2 + $0x98] sm:$0x1]  ;;  %v4025_v2 = vld [vmem:[#allocation2 + $0x78] sm:$0x1e]  ;;  %v4045_v35 = vpop.permute.xlu1 %2091  ;;  %v4051_v21 = vpop.permute.xlu0 %2089 }
  0xc9   :  { %v699_v40 = vrot.slane %v698_v44, 4  ;;  %390 = vst [vmem:[#allocation2 + $0x88] sm:$0x1f] %v389_v50  ;;  %v1872_v38 = vsel %vm3529_vm12, %v3006_v45, %v1871_v47  ;;  %v2830_v57 = vcombine.high %v746_v33, %v746_v33  ;;  %v2847_v11 = vrot.slane %v2827_v52, 9 }
  0xca   :  { %v1672_v54 = vsel %vm3641_vm15, %v1667_v31, %v1671_v25  ;;  %v3080_v43 = vcombine.low %v1868_v51, %v1872_v38  ;;  %v882_v3 = vrot.slane %v2828_v46, 5  ;;  %v2848_v0 = vrot.slane %v2829_v39, 9 }
  0xcb   :  { %v3072_v61 = vcombine.low %v3949_v62, %v1672_v54  ;;  %v704_v63 = vsel %vm3641_vm15, %v699_v40, %v703_v28  ;;  %v886_v23 = vrot.slane %v2830_v57, 5  ;;  %v98_v52 = vsel %vm3451_vm3, 0, %v97_v53 }
  0xcc   :  { %v3025_v13 = vcombine.low %v3990_v56, %v704_v63  ;;  %2275 = vrot.lane.b32.xlu0 %v3080_v43, %s3417_s7  ;;  %v883_v62 = vsel %vm3529_vm12, %v2847_v11, %v882_v3  ;;  %99 = vst [vmem:[#allocation2 + $0x90] sm:$0x1] %v98_v52  ;;  %v161_v14 = vsel %vm3457_vm5, 0, %v160_v24  ;;  %v320_v15 = vshrl.u32 %v3364_v41, 16 }
  0xcd   :  { %2235 = vrot.lane.b32.xlu1 %v3072_v61, %s3419_s9  ;;  %v323_v56 = vshll.u32 %v3364_v41, 16  ;;  %v887_v25 = vsel %vm3529_vm12, %v2848_v0, %v886_v23  ;;  %162 = vst [vmem:[#allocation2 + $0x90] sm:$0x10] %v161_v14  ;;  %v4037_v32 = vcombine.low %v4020_v5, %v4020_v5  ;;  %v2876_v26 = vcombine.high %v4020_v5, %v4020_v5  ;;  %v4060_v23 = vpop.permute.xlu1 %2227 }
  0xce   :  { %v424_v18 = vld [vmem:[#allocation2 + $0x80] sm:$0x1f]  ;;  %v3033_v6 = vcombine.low %v883_v62, %v887_v25  ;;  %v322_v33 = vrot.slane %v320_v15, 7  ;;  %v2907_v48 = vcombine.low %v4025_v2, %v4025_v2  ;;  %v101_v58 = vsel %vm3451_vm3, 0, %v100_v10 }
  0xcf   :  { %v747_v28 = vld [vmem:[#allocation2 + $0x80] sm:$0x1e]  ;;  %v2799_v19 = vcombine.low %v424_v18, %v424_v18  ;;  %v2800_v37 = vcombine.high %v424_v18, %v424_v18  ;;  %v2908_v29 = vcombine.high %v4025_v2, %v4025_v2  ;;  %102 = vst [vmem:[#allocation2 + $0x98] sm:$0x1] %v101_v58  ;;  %vm2356_vm3 = vcmask 162816  }
  0xd0   :  { %v2831_v22 = vcombine.low %v747_v28, %v747_v28  ;;  %v3366_v44 = vld [vmem:[#allocation2 + $0x78] ss:$8 sps:$4 sm:$0xff]   ;;  %v425_v31 = vld [vmem:[#allocation2 + $0x88] sm:$0x1f]  ;;  %v2832_v1 = vcombine.high %v747_v28, %v747_v28  ;;  %2005 = vrot.lane.b32.xlu0 %v3033_v6, %s3416_s6  ;;  %v325_v47 = vor.u32 %v323_v56, %v322_v33  ;;  %v4062_v56 = vpop.permute.xlu0 %2225  ;;  %vm2468_vm4 = vcmask 1041408  }
  0xd1   :  { %v4047_v16 = vld [vmem:[#allocation2 + $0x80] sm:$0x1f]  ;;  %1965 = vrot.lane.b32.xlu1 %v3025_v13, %s3420_s12  ;;  %v748_v45 = vld [vmem:[#allocation2 + $0x88] sm:$0x1e]  ;;  %v2801_v40 = vcombine.low %v425_v31, %v425_v31  ;;  %v2802_v50 = vcombine.high %v425_v31, %v425_v31  ;;  %v706_v51 = vshrl.u32 %v2799_v19, 16  ;;  %v709_v39 = vshll.u32 %v2799_v19, 16 }
  0xd2   :  { %v4057_v46 = vcombine.low %v4047_v16, %v4047_v16  ;;  %v715_v53 = vshll.u32 %v2800_v37, 16  ;;  %v2833_v41 = vcombine.low %v748_v45, %v748_v45  ;;  %v2834_v54 = vcombine.high %v748_v45, %v748_v45  ;;  %v926_v57 = vld [vmem:[#allocation2 + $0x88] sm:$0x1f] }
  0xd3   :  { %v2849_v38 = vrot.slane %v2831_v22, 9  ;;  %v708_v11 = vrot.slane %v706_v51, 4  ;;  %v711_v24 = vrot.slane %v709_v39, 5  ;;  %v720_v61 = vshrl.u32 %v2801_v40, 16 }
  0xd4   :  { %v723_v63 = vshll.u32 %v2801_v40, 16  ;;  %v717_v43 = vrot.slane %v715_v53, 5  ;;  %v729_v3 = vshll.u32 %v2802_v50, 16  ;;  %v890_v10 = vrot.slane %v2832_v1, 5  ;;  %v391_v0 = vld [vmem:[#allocation2 + $0x90] sm:$0x1f]  ;;  %2061 = vrot.lane.b32.xlu0 %v3366_v44, %s3413_s28  ;;  %v4079_v53 = vpop.permute.xlu1 %1957 }
  0xd5   :  { %v2850_v13 = vrot.slane %v2833_v41, 9  ;;  %v712_v52 = vor.u32 %v711_v24, %v708_v11  ;;  %v722_v62 = vrot.slane %v720_v61, 4  ;;  %v894_v15 = vrot.slane %v2834_v54, 5  ;;  %v1246_v11 = vld [vmem:[#allocation2 + $0x88] sm:$0x1e]  ;;  %v4084_v61 = vpop.permute.xlu0 %1997 }
  0xd6   :  { %v725_v14 = vrot.slane %v723_v63, 5  ;;  %v731_v25 = vrot.slane %v729_v3, 5  ;;  %v392_v18 = vsel %vm3484_vm8, %v325_v47, %v391_v0  ;;  %v2879_v28 = vcombine.low %v926_v57, %v926_v57  ;;  %v1245_v24 = vld [vmem:[#allocation2 + $0x80] sm:$0x1e] }
  0xd7   :  { %v2878_v6 = vcombine.high %v4047_v16, %v4047_v16  ;;  %v713_v33 = vrot.slane %v712_v52, 4  ;;  %v891_v19 = vsel %vm3529_vm12, %v2849_v38, %v890_v10  ;;  %393 = vst [vmem:[#allocation2 + $0x90] sm:$0x1f] %v392_v18  ;;  %v2880_v37 = vcombine.high %v926_v57, %v926_v57  ;;  %v4087_v0 = vld [vmem:[#allocation2 + $0x80] sm:$0x1f] }
  0xd8   :  { %v726_v58 = vor.u32 %v725_v14, %v722_v62  ;;  %v895_v22 = vsel %vm3529_vm12, %v2850_v13, %v894_v15  ;;  %v1205_v44 = vshrl.u32 %v2879_v28, 16  ;;  %v1208_v31 = vshll.u32 %v2879_v28, 16 }
  0xd9   :  { %v1177_v45 = vshrl.u32 %v4037_v32, 16  ;;  %v718_v27 = vsel %vm3641_vm15, %v713_v33, %v717_v43  ;;  %v1214_v47 = vshll.u32 %v2880_v37, 16  ;;  %v1180_v16 = vshll.u32 %v4037_v32, 16 }
  0xda   :  { %v727_v1 = vrot.slane %v726_v58, 4  ;;  %v1207_v40 = vrot.slane %v1205_v44, 4  ;;  %v1210_v50 = vrot.slane %v1208_v31, 5  ;;  %v1186_v39 = vshll.u32 %v2876_v26, 16  ;;  %v4094_v44 = vpop.permute.xlu1 %1959 }
  0xdb   :  { %v1179_v51 = vrot.slane %v1177_v45, 4  ;;  %v3034_v54 = vcombine.low %v891_v19, %v895_v22  ;;  %v1182_v38 = vrot.slane %v1180_v16, 5  ;;  %v1191_v57 = vshrl.u32 %v4057_v46, 16 }
  0xdc   :  { %v732_v41 = vsel %vm3641_vm15, %v727_v1, %v731_v25  ;;  %v1211_v63 = vor.u32 %v1210_v50, %v1207_v40  ;;  %v1216_v43 = vrot.slane %v1214_v47, 5  ;;  %v1194_v3 = vshll.u32 %v4057_v46, 16  ;;  %v4096_v47 = vpop.permute.xlu0 %2053 }
  0xdd   :  { %v3026_v32 = vcombine.low %v718_v27, %v732_v41  ;;  %v1183_v5 = vor.u32 %v1182_v38, %v1179_v51  ;;  %v1188_v26 = vrot.slane %v1186_v39, 5  ;;  %v1193_v10 = vrot.slane %v1191_v57, 4  ;;  %v163_v41 = vld [vmem:[#allocation2 + $0x98] sm:$0x10] }
  0xde   :  { %v1200_v13 = vshll.u32 %v2878_v6, 16  ;;  %v927_v52 = vld [vmem:[#allocation2 + $0x90] sm:$0x1f]  ;;  %v2911_v62 = vcombine.low %v1246_v11, %v1246_v11  ;;  %v2912_v14 = vcombine.high %v1246_v11, %v1246_v11  ;;  %v2909_v15 = vcombine.low %v1245_v24, %v1245_v24 }
  0xdf   :  { %1967 = vrot.lane.b32.xlu1 %v3026_v32, %s3420_s12  ;;  %v2910_v25 = vcombine.high %v1245_v24, %v1245_v24  ;;  %v2881_v18 = vcombine.low %v927_v52, %v927_v52  ;;  %v2882_v28 = vcombine.high %v927_v52, %v927_v52  ;;  %v1212_v33 = vrot.slane %v1211_v63, 4  ;;  %v1247_v19 = vld [vmem:[#allocation2 + $0x90] sm:$0x1e] }
  0xe0   :  { %v1184_v58 = vrot.slane %v1183_v5, 4  ;;  %v1196_v37 = vrot.slane %v1194_v3, 5  ;;  %v2913_v46 = vcombine.low %v1247_v19, %v1247_v19  ;;  %v2914_v22 = vcombine.high %v1247_v19, %v1247_v19  ;;  %v3365_v16 = vld [vmem:[#allocation2 + $0x88] ss:$8 sps:$4 sm:$0xff]  }
  0xe1   :  { %v4092_v6 = vcombine.low %v4087_v0, %v4087_v0  ;;  %v1219_v31 = vshrl.u32 %v2881_v18, 16  ;;  %v1222_v45 = vshll.u32 %v2881_v18, 16  ;;  %v1228_v27 = vshll.u32 %v2882_v28, 16  ;;  %v1423_v32 = vld [vmem:[#allocation2 + $0x90] sm:$0x1f]  ;;  %v4116_v28 = vpop.permute.xlu1 %1999 }
  0xe2   :  { %v1202_v1 = vrot.slane %v1200_v13, 5  ;;  %v1217_v40 = vsel %vm3641_vm15, %v1212_v33, %v1216_v43  ;;  %v1197_v50 = vor.u32 %v1196_v37, %v1193_v10  ;;  %v2929_v51 = vrot.slane %v2911_v62, 9 }
  0xe3   :  { %2007 = vrot.lane.b32.xlu1 %v3034_v54, %s3416_s6  ;;  %v1386_v39 = vrot.slane %v2912_v14, 5  ;;  %v1221_v38 = vrot.slane %v1219_v31, 4  ;;  %v1224_v57 = vrot.slane %v1222_v45, 5  ;;  %v1189_v11 = vsel %vm3641_vm15, %v1184_v58, %v1188_v26 }
  0xe4   :  { %v2930_v24 = vrot.slane %v2913_v46, 9  ;;  %v1230_v63 = vrot.slane %v1228_v27, 5  ;;  %v1198_v3 = vrot.slane %v1197_v50, 4  ;;  %v1390_v5 = vrot.slane %v2914_v22, 5 }
  0xe5   :  { %v2927_v54 = vrot.slane %v2907_v48, 9  ;;  %v1225_v13 = vor.u32 %v1224_v57, %v1221_v38  ;;  %v1378_v43 = vrot.slane %v2908_v29, 5  ;;  %v2928_v10 = vrot.slane %v2909_v15, 9  ;;  %v1422_v48 = vld [vmem:[#allocation2 + $0x88] sm:$0x1f] }
  0xe6   :  { %v1382_v52 = vrot.slane %v2910_v25, 5  ;;  %v1203_v26 = vsel %vm3641_vm15, %v1198_v3, %v1202_v1  ;;  %v1387_v62 = vsel %vm3529_vm12, %v2929_v51, %v1386_v39  ;;  %v164_v14 = vsel %vm3457_vm5, 0, %v163_v41  ;;  %v4122_v25 = vpop.permute.xlu0 %2093  ;;  %v1743_v57 = vld [vmem:[#allocation2 + $0x90] sm:$0x1e]  ;;  %v4134_v3 = vpop.permute.xlu1 %2055 }
  0xe7   :  { %2063 = vrot.lane.b32.xlu1 %v3365_v16, %s3413_s28  ;;  %v2959_v18 = vcombine.low %v1423_v32, %v1423_v32  ;;  %v1226_v33 = vrot.slane %v1225_v13, 4  ;;  %v3049_v2 = vcombine.low %v1189_v11, %v1203_v26  ;;  %v1391_v29 = vsel %vm3529_vm12, %v2930_v24, %v1390_v5  ;;  %165 = vst [vmem:[#allocation2 + $0x98] sm:$0x10] %v164_v14 }
  0xe8   :  { %v1379_v15 = vsel %vm3529_vm12, %v2927_v54, %v1378_v43  ;;  %v1383_v58 = vsel %vm3529_vm12, %v2928_v10, %v1382_v52  ;;  %v2960_v4 = vcombine.high %v1423_v32, %v1423_v32  ;;  %v2956_v31 = vcombine.high %v4087_v0, %v4087_v0  ;;  %v3384_v0 = vld [vmem:[#allocation2 + $0x80] ss:$8 sps:$4 sm:$0xff]  }
  0xe9   :  { %v1702_v19 = vshrl.u32 %v2959_v18, 16  ;;  %v1705_v37 = vshll.u32 %v2959_v18, 16  ;;  %v1231_v46 = vsel %vm3641_vm15, %v1226_v33, %v1230_v63  ;;  %2101 = vrot.lane.b32.xlu0 %v3049_v2, %s3418_s8  ;;  %v3057_v22 = vcombine.low %v1379_v15, %v1383_v58 }
  0xea   :  { %v2957_v45 = vcombine.low %v1422_v48, %v1422_v48  ;;  %v3050_v27 = vcombine.low %v1217_v40, %v1231_v46  ;;  %v1711_v50 = vshll.u32 %v2960_v4, 16  ;;  %v2958_v51 = vcombine.high %v1422_v48, %v1422_v48  ;;  %v4137_v43 = vpop.permute.xlu0 %2133 }
  0xeb   :  { %v1704_v1 = vrot.slane %v1702_v19, 4  ;;  %v1707_v16 = vrot.slane %v1705_v37, 5  ;;  %v1674_v39 = vshrl.u32 %v4092_v6, 16  ;;  %v1677_v41 = vshll.u32 %v4092_v6, 16 }
  0xec   :  { %v1683_v38 = vshll.u32 %v2956_v31, 16  ;;  %2103 = vrot.lane.b32.xlu1 %v3050_v27, %s3418_s8  ;;  %v3058_v11 = vcombine.low %v1387_v62, %v1391_v29  ;;  %v1688_v32 = vshrl.u32 %v2957_v45, 16  ;;  %v1691_v63 = vshll.u32 %v2957_v45, 16  ;;  %v3383_v29 = vld [vmem:[#allocation2 + $0x90] ss:$8 sps:$4 sm:$0xff]  }
  0xed   :  { %v1708_v24 = vor.u32 %v1707_v16, %v1704_v1  ;;  %2141 = vrot.lane.b32.xlu0 %v3057_v22, %s3415_s30  ;;  %v1713_v40 = vrot.slane %v1711_v50, 5  ;;  %v1676_v5 = vrot.slane %v1674_v39, 4  ;;  %v1679_v54 = vrot.slane %v1677_v41, 5  ;;  %v1741_v50 = vld [vmem:[#allocation2 + $0x80] sm:$0x1e] }
  0xee   :  { %v1697_v13 = vshll.u32 %v2958_v51, 16  ;;  %v1424_v6 = vld [vmem:[#allocation2 + $0x98] sm:$0x1f]  ;;  %v1685_v10 = vrot.slane %v1683_v38, 5  ;;  %v1690_v52 = vrot.slane %v1688_v32, 4  ;;  %v1693_v26 = vrot.slane %v1691_v63, 5  ;;  %v4141_v51 = vpop.permute.xlu1 %2095 }
  0xef   :  { %v2991_v14 = vcombine.low %v1743_v57, %v1743_v57  ;;  %v2961_v62 = vcombine.low %v1424_v6, %v1424_v6  ;;  %v2962_v18 = vcombine.high %v1424_v6, %v1424_v6  ;;  %v1709_v48 = vrot.slane %v1708_v24, 4  ;;  %v1744_v2 = vld [vmem:[#allocation2 + $0x98] sm:$0x1e]  ;;  %v4147_v24 = vpop.permute.xlu0 %2189 }
  0xf0   :  { %v1680_v33 = vor.u32 %v1679_v54, %v1676_v5  ;;  %2143 = vrot.lane.b32.xlu1 %v3058_v11, %s3415_s30  ;;  %v1694_v15 = vor.u32 %v1693_v26, %v1690_v52  ;;  %v1699_v58 = vrot.slane %v1697_v13, 5  ;;  %v2992_v4 = vcombine.high %v1743_v57, %v1743_v57  ;;  %v1742_v11 = vld [vmem:[#allocation2 + $0x88] sm:$0x1e] }
  0xf1   :  { %v2993_v19 = vcombine.low %v1744_v2, %v1744_v2  ;;  %2197 = vrot.lane.b32.xlu0 %v3384_v0, %s3414_s29  ;;  %v1716_v37 = vshrl.u32 %v2961_v62, 16  ;;  %v1719_v46 = vshll.u32 %v2961_v62, 16  ;;  %v1725_v22 = vshll.u32 %v2962_v18, 16  ;;  %v3401_v54 = vld [vmem:[#allocation2] ss:$8 sps:$4 sm:$0xff]  }
  0xf2   :  { %v1681_v31 = vrot.slane %v1680_v33, 4  ;;  %v1695_v45 = vrot.slane %v1694_v15, 4  ;;  %v2994_v27 = vcombine.high %v1744_v2, %v1744_v2  ;;  %v3009_v1 = vrot.slane %v2991_v14, 9  ;;  %v3403_v62 = vld [vmem:[#allocation2 + $0x10] ss:$8 sps:$4 sm:$0xff]  }
  0xf3   :  { %v1883_v16 = vrot.slane %v2992_v4, 5  ;;  %v1714_v39 = vsel %vm3641_vm15, %v1709_v48, %v1713_v40  ;;  %v1718_v41 = vrot.slane %v1716_v37, 4  ;;  %v1721_v38 = vrot.slane %v1719_v46, 5  ;;  %v2136_v4 = vpop.permute.xlu1 %2135 }
  0xf4   :  { %v1686_v57 = vsel %vm3641_vm15, %v1681_v31, %v1685_v10  ;;  %2199 = vrot.lane.b32.xlu1 %v3383_v29, %s3414_s29  ;;  %v1727_v32 = vrot.slane %v1725_v22, 5  ;;  %v1700_v63 = vsel %vm3641_vm15, %v1695_v45, %v1699_v58  ;;  %v3010_v0 = vrot.slane %v2993_v19, 9  ;;  %v3405_v22 = vld [vmem:[#allocation2 + $0x20] ss:$8 sps:$4 sm:$0xff]   ;;  %v2230_v45 = vpop.permute.xlu0 %2229 }
  0xf5   :  { %v1887_v5 = vrot.slane %v2994_v27, 5  ;;  %v1722_v13 = vor.u32 %v1721_v38, %v1718_v41  ;;  %v3073_v6 = vcombine.low %v1686_v57, %v1700_v63  ;;  %v2987_v40 = vcombine.low %v1741_v50, %v1741_v50  ;;  %v3406_v31 = vld [vmem:[%s4391_s1 + $0x10] ss:$0 sps:$4 sm:$0x33]  }
  0xf6   :  { %v2988_v52 = vcombine.high %v1741_v50, %v1741_v50  ;;  %v1884_v26 = vsel %vm3529_vm12, %v3009_v1, %v1883_v16  ;;  %v2989_v10 = vcombine.low %v1742_v11, %v1742_v11  ;;  %v2990_v14 = vcombine.high %v1742_v11, %v1742_v11  ;;  %3166 = vmatprep.subr.msk.bf16.mxu0 %vm2468_vm4, %v3406_v31  ;;  %v3407_v41 = vld [vmem:[#allocation2 + $0x30] ss:$8 sps:$4 sm:$0xff]  }
  0xf7   :  { %v1723_v18 = vrot.slane %v1722_v13, 4  ;;  %2237 = vrot.lane.b32.xlu0 %v3073_v6, %s3419_s9  ;;  %v1888_v48 = vsel %vm3529_vm12, %v3010_v0, %v1887_v5  ;;  %v3007_v33 = vrot.slane %v2987_v40, 9  ;;  %v2283_v58 = vsel %vm34_vm9, %v3401_v54, %v3996_v34  ;;  %v2192_v38 = vpop.permute.xlu1 %2191  ;;  %3167 = vmatprep.subr.msk.bf16.mxu1 %vm2468_vm4, %v3406_v31 }
  0xf8   :  { %v1875_v2 = vrot.slane %v2988_v52, 5  ;;  %v3008_v29 = vrot.slane %v2989_v10, 9  ;;  %v1879_v15 = vrot.slane %v2990_v14, 5  ;;  %v2307_v46 = vsel %vm2305_vm0, %v2283_v58, %v3968_v30  ;;  %v3408_v14 = vld [vmem:[#allocation2 + $0x50] ss:$8 sps:$4 sm:$0xff]  }
  0xf9   :  { %v1728_v19 = vsel %vm3641_vm15, %v1723_v18, %v1727_v32  ;;  %v2286_v42 = vsel %vm34_vm9, %v3403_v62, %v4015_v59  ;;  %v2324_v30 = vsel %vm2322_vm1, %v2307_v46, %v3889_v20  ;;  %v3082_v50 = vcombine.low %v1884_v26, %v1888_v48  ;;  %v2270_v57 = vpop.permute.xlu0 %2269 }
  0xfa   :  { %v1876_v37 = vsel %vm3529_vm12, %v3007_v33, %v1875_v2  ;;  %v3074_v27 = vcombine.low %v1714_v39, %v1728_v19  ;;  %v1880_v34 = vsel %vm3529_vm12, %v3008_v29, %v1879_v15  ;;  %v2309_v16 = vsel %vm2305_vm0, %v2286_v42, %v3994_v9 }
  0xfb   :  { %v3081_v1 = vcombine.low %v1876_v37, %v1880_v34  ;;  %v2326_v39 = vsel %vm2322_vm1, %v2309_v16, %v3927_v36  ;;  %v2341_v12 = vsel %vm2339_vm2, %v2324_v30, %v4051_v21  ;;  %v2289_v9 = vsel %vm34_vm9, %v3405_v22, %v4079_v53  ;;  %v2232_v63 = vpop.permute.xlu1 %2231  ;;  %v3409_v22 = vld [vmem:[#allocation2 + $0x60] ss:$8 sps:$4 sm:$0xff]  }
  0xfc   :  { %2239 = vrot.lane.b32.xlu1 %v3074_v27, %s3419_s9  ;;  %v2343_v59 = vsel %vm2339_vm2, %v2326_v39, %v4045_v35  ;;  %v2358_v20 = vsel %vm2356_vm3, %v2341_v12, %v3933_v17  ;;  %vm2373_vm5 = vcmask 195584   ;;  %vm2390_vm6 = vcmask 228352  }
  0xfd   :  { %2277 = vrot.lane.b32.xlu0 %v3081_v1, %s3417_s7  ;;  %v2375_v36 = vsel %vm2373_vm5, %v2358_v20, %v3914_v7  ;;  %v2470_v21 = vsel %vm2468_vm4, %v3406_v31, 0  ;;  %vm2451_vm7 = vcmask 293888   ;;  %vm2407_vm8 = vcmask 261120  }
  0xfe   :  { %v2392_v35 = vsel %vm2390_vm6, %v2375_v36, %v4062_v56  ;;  %3143 = vmatpush3.bf16.msra.mxu0 %v2470_v21  ;;  %v2311_v53 = vsel %vm2305_vm0, %v2289_v9, %v4084_v61  ;;  %v2360_v17 = vsel %vm2356_vm3, %v2343_v59, %v4009_v55  ;;  %v2292_v32 = vsel %vm34_vm9, %v3407_v41, %v4094_v44 }
  0xff   :  { %v2409_v7 = vsel %vm2407_vm8, %v2392_v35, %v3945_v8  ;;  %v2377_v11 = vsel %vm2373_vm5, %v2360_v17, %v3942_v60  ;;  %v2328_v56 = vsel %vm2322_vm1, %v2311_v53, %v4096_v47  ;;  %3165 = vmatpush3.bf16.msra.mxu1 %v2470_v21  ;;  %v2313_v8 = vsel %vm2305_vm0, %v2292_v32, %v4116_v28 }
 0x100   :  { %2279 = vrot.lane.b32.xlu1 %v3082_v50, %s3417_s7  ;;  %3144 = vmatprep.mubr.msk.bf16.mxu0 %vm2451_vm7, %v2409_v7  ;;  %v2394_v55 = vsel %vm2390_vm6, %v2377_v11, %v4060_v23  ;;  %v2345_v61 = vsel %vm2339_vm2, %v2328_v56, %v4122_v25  ;;  %v2330_v44 = vsel %vm2322_vm1, %v2313_v8, %v4134_v3  ;;  %v3410_v11 = vld [vmem:[#allocation2 + $0x70] ss:$8 sps:$4 sm:$0xff]   ;;  %v3411_v56 = vld [vmem:[#allocation2 + $0x80] ss:$8 sps:$4 sm:$0xff]   ;;  %vm2687_vm10 = vcmask 57344  }
 0x101   :  { %v2411_v60 = vsel %vm2407_vm8, %v2394_v55, %v3977_v49  ;;  %v2362_v47 = vsel %vm2356_vm3, %v2345_v61, %v4137_v43  ;;  %v2347_v25 = vsel %vm2339_vm2, %v2330_v44, %v4141_v51  ;;  %v2272_v5 = vpop.permute.xlu0 %2271 }
 0x102   :  { %3145 = vmatmul.mubr.msk.bf16.vlgmr.msra.gmra.mrb[0].mxu0 %vm2451_vm7, %v2411_v60  ;;  %v2379_v23 = vsel %vm2373_vm5, %v2362_v47, %v4147_v24  ;;  %v2364_v0 = vsel %vm2356_vm3, %v2347_v25, %v2136_v4 }
 0x103   :  { %v2396_v28 = vsel %vm2390_vm6, %v2379_v23, %v2230_v45  ;;  %v2381_v43 = vsel %vm2373_vm5, %v2364_v0, %v2192_v38 }
 0x104   :  { %v2413_v49 = vsel %vm2407_vm8, %v2396_v28, %v2270_v57  ;;  %v2398_v3 = vsel %vm2390_vm6, %v2381_v43, %v2232_v63 }
 0x105   :  { %3148 = vmatprep.mubr.msk.bf16.mxu0 %vm2451_vm7, %v2413_v49  ;;  %v2415_v54 = vsel %vm2407_vm8, %v2398_v3, %v2272_v5 }
 0x107   :  { %v2002_v24 = vpop.permute.xlu0 %2001 }
 0x10a   :  { %3149 = vmatmul.mubr.msk.bf16.gmra.mrb[4].mxu0 %vm2451_vm7, %v2415_v54 }
 0x10b   :  { %v2058_v13 = vpop.permute.xlu0 %2057 }
 0x10c   :  { %v1962_v51 = vpop.permute.xlu1 %1961 }
 0x10d   :  { %v2295_v48 = vsel %vm34_vm9, %v3408_v14, %v1962_v51 }
 0x10e   :  { %v2315_v33 = vsel %vm2305_vm0, %v2295_v48, %v2002_v24 }
 0x10f   :  { %v2332_v2 = vsel %vm2322_vm1, %v2315_v33, %v2058_v13 }
 0x114   :  { %v1964_v6 = vpop.permute.xlu1 %1963 }
 0x115   :  { %v2298_v27 = vsel %vm34_vm9, %v3409_v22, %v1964_v6 }
 0x118   :  { %v2004_v52 = vpop.permute.xlu1 %2003 }
 0x119   :  { %v2317_v34 = vsel %vm2305_vm0, %v2298_v27, %v2004_v52 }
 0x11c   :  { %v2060_v10 = vpop.permute.xlu1 %2059 }
 0x11d   :  { %v2334_v42 = vsel %vm2322_vm1, %v2317_v34, %v2060_v10 }
 0x11f   :  { %v2098_v40 = vpop.permute.xlu0 %2097 }
 0x120   :  { %v2349_v15 = vsel %vm2339_vm2, %v2332_v2, %v2098_v40  ;;  %v4270_v40 = vld [vmem:[%s4392_s2] ss:$0 sm:$0xff] }
 0x123   :  { %v2138_v26 = vpop.permute.xlu0 %2137 }
 0x124   :  { %v2366_v4 = vsel %vm2356_vm3, %v2349_v15, %v2138_v26 }
 0x125   :  { %v2100_v18 = vpop.permute.xlu1 %2099 }
 0x126   :  { %v2351_v1 = vsel %vm2339_vm2, %v2334_v42, %v2100_v18 }
 0x127   :  { %v2194_v62 = vpop.permute.xlu0 %2193 }
 0x128   :  { %v2383_v19 = vsel %vm2373_vm5, %v2366_v4, %v2194_v62 }
 0x129   :  { %v2140_v58 = vpop.permute.xlu1 %2139 }
 0x12a   :  { %v2368_v16 = vsel %vm2356_vm3, %v2351_v1, %v2140_v58 }
 0x130   :  { %v2234_v29 = vpop.permute.xlu0 %2233 }
 0x131   :  { %v2400_v37 = vsel %vm2390_vm6, %v2383_v19, %v2234_v29  ;;  %v2196_v45 = vpop.permute.xlu1 %2195 }
 0x132   :  { %v2385_v30 = vsel %vm2373_vm5, %v2368_v16, %v2196_v45 }
 0x134   :  { %v2274_v46 = vpop.permute.xlu0 %2273 }
 0x135   :  { %v2417_v31 = vsel %vm2407_vm8, %v2400_v37, %v2274_v46 }
 0x136   :  { %3152 = vmatprep.mubr.msk.bf16.mxu1 %vm2451_vm7, %v2417_v31 }
 0x13e   :  { %v2276_v39 = vpop.permute.xlu0 %2275 }
 0x13f   :  { %v2236_v50 = vpop.permute.xlu1 %2235 }
 0x140   :  { %v2402_v12 = vsel %vm2390_vm6, %v2385_v30, %v2236_v50 }
 0x141   :  { %v2419_v59 = vsel %vm2407_vm8, %v2402_v12, %v2276_v39 }
 0x142   :  { %3153 = vmatmul.mubr.msk.bf16.vlgmr.msra.gmra.mrb[0].mxu1 %vm2451_vm7, %v2419_v59  ;;  %v2006_v20 = vpop.permute.xlu0 %2005 }
 0x143   :  { %v1966_v9 = vpop.permute.xlu1 %1965 }
 0x144   :  { %v2301_v55 = vsel %vm34_vm9, %v3410_v11, %v1966_v9 }
 0x145   :  { %v2319_v8 = vsel %vm2305_vm0, %v2301_v55, %v2006_v20 }
 0x146   :  { %v2062_v21 = vpop.permute.xlu0 %2061 }
 0x147   :  { %v2336_v60 = vsel %vm2322_vm1, %v2319_v8, %v2062_v21 }
 0x151   :  { %v1968_v41 = vpop.permute.xlu1 %1967 }
 0x152   :  { %v2304_v47 = vsel %vm34_vm9, %v3411_v56, %v1968_v41  ;;  %vm2633_vm9 = vcmask 60416  }
 0x155   :  { %v2008_v36 = vpop.permute.xlu1 %2007 }
 0x156   :  { %v2321_v23 = vsel %vm2305_vm0, %v2304_v47, %v2008_v36 }
 0x159   :  { %v2064_v38 = vpop.permute.xlu1 %2063 }
 0x15a   :  { %v2338_v63 = vsel %vm2322_vm1, %v2321_v23, %v2064_v38 }
 0x15b   :  { %v2102_v35 = vpop.permute.xlu0 %2101 }
 0x15c   :  { %v2353_v44 = vsel %vm2339_vm2, %v2336_v60, %v2102_v35 }
 0x15e   :  { %v2104_v53 = vpop.permute.xlu1 %2103 }
 0x15f   :  { %v2142_v17 = vpop.permute.xlu0 %2141  ;;  %v2355_v49 = vsel %vm2339_vm2, %v2338_v63, %v2104_v53 }
 0x160   :  { %v2370_v25 = vsel %vm2356_vm3, %v2353_v44, %v2142_v17 }
 0x162   :  { %v2144_v57 = vpop.permute.xlu1 %2143 }
 0x163   :  { %v2198_v7 = vpop.permute.xlu0 %2197  ;;  %v2372_v3 = vsel %vm2356_vm3, %v2355_v49, %v2144_v57 }
 0x164   :  { %v2387_v28 = vsel %vm2373_vm5, %v2370_v25, %v2198_v7 }
 0x166   :  { %v2200_v32 = vpop.permute.xlu1 %2199 }
 0x167   :  { %v2389_v24 = vsel %vm2373_vm5, %v2372_v3, %v2200_v32 }
 0x169   :  { %v2238_v61 = vpop.permute.xlu0 %2237 }
 0x16a   :  { %v2404_v5 = vsel %vm2390_vm6, %v2387_v28, %v2238_v61 }
 0x16e   :  { %v2240_v0 = vpop.permute.xlu1 %2239 }
 0x16f   :  { %v2278_v43 = vpop.permute.xlu0 %2277  ;;  %v2406_v51 = vsel %vm2390_vm6, %v2389_v24, %v2240_v0 }
 0x170   :  { %v2421_v54 = vsel %vm2407_vm8, %v2404_v5, %v2278_v43 }
 0x171   :  { %3156 = vmatprep.mubr.msk.bf16.mxu1 %vm2451_vm7, %v2421_v54 }
 0x172   :  { %v2280_v13 = vpop.permute.xlu1 %2279 }
 0x173   :  { %v2423_v6 = vsel %vm2407_vm8, %v2406_v51, %v2280_v13 }
 0x174   :  { %3157 = vmatmul.mubr.msk.bf16.gmra.mrb[4].mxu1 %vm2451_vm7, %v2423_v6 }
 0x1d5   :  { %v3146_v52 = vpop.f32.mrb[0].mxu0 }
 0x1d6   :  { %v2515_v26 = vadd.f32 %v3146_v52, %v4270_v40  ;;  %v2506_v10 = vpop.f32.mrb[1].mxu0 }
 0x1d7   :  { %v2507_v14 = vadd.f32 %v4270_v40, %v2506_v10  ;;  %v3147_v62 = vpop.f32.mrb[2].mxu0 }
 0x1d8   :  { %v3113_v18 = vpack.c.bf16 %v2515_v26, %v2515_v26  ;;  %v2518_v48 = vadd.f32 %v3147_v62, %v4270_v40  ;;  %v2509_v33 = vpop.f32.mrb[3].mxu0  ;;  %v2691_v58 = vmul.f32 %v2515_v26, %v2515_v26  ;;  %v2653_v27 = vsel %vm2305_vm0, %v2515_v26, 0.0 }
 0x1d9   :  { %v3111_v2 = vpack.c.bf16 %v2507_v14, %v2507_v14  ;;  %v2689_v29 = vmul.f32 %v2507_v14, %v2507_v14  ;;  %v2510_v15 = vadd.f32 %v4270_v40, %v2509_v33  ;;  %v2650_v19 = vsel %vm2305_vm0, %v2507_v14, 0.0 }
 0x1da   :  { %2636 = vst.msk [vmem:[%s4393_s3 + $0x8] sm:$0xf] %vm2633_vm9, %v3113_v18  ;;  %v3114_v4 = vpack.c.bf16 %v2518_v48, %v2518_v48  ;;  %v2692_v31 = vmul.f32 %v2518_v48, %v2518_v48  ;;  %v2708_v12 = vsel %vm2305_vm0, %v2691_v58, 0.0  ;;  %v2655_v20 = vsel %vm2305_vm0, %v2518_v48, 0.0 }
 0x1db   :  { %2634 = vst.msk [vmem:[%s4393_s3] sm:$0xf] %vm2633_vm9, %v3111_v2  ;;  %v3112_v37 = vpack.c.bf16 %v2510_v15, %v2510_v15  ;;  %v2651_v46 = vsel %vm2305_vm0, %v2510_v15, 0.0  ;;  %v2690_v22 = vmul.f32 %v2510_v15, %v2510_v15  ;;  %v2705_v34 = vsel %vm2305_vm0, %v2689_v29, 0.0 }
 0x1dc   :  { %2637 = vst.msk [vmem:[%s4393_s3 + $0xc] sm:$0xf] %vm2633_vm9, %v3114_v4  ;;  %v2652_v45 = vadd.f32 %v2651_v46, %v2650_v19  ;;  %v2710_v41 = vsel %vm2305_vm0, %v2692_v31, 0.0 }
 0x1dd   :  { %2635 = vst.msk [vmem:[%s4393_s3 + $0x4] sm:$0xf] %vm2633_vm9, %v3112_v37  ;;  %v2706_v42 = vsel %vm2305_vm0, %v2690_v22, 0.0  ;;  %v3150_v1 = vpop.f32.mrb[4].mxu0 }
 0x1de   :  { %v2654_v16 = vadd.f32 %v2653_v27, %v2652_v45  ;;  %v2707_v30 = vadd.f32 %v2706_v42, %v2705_v34  ;;  %v2531_v50 = vadd.f32 %v3150_v1, %v4270_v40  ;;  %v2522_v39 = vpop.f32.mrb[5].mxu0 }
 0x1df   :  { %v2523_v59 = vadd.f32 %v4270_v40, %v2522_v39  ;;  %v3151_v9 = vpop.f32.mrb[6].mxu0 }
 0x1e0   :  { %v2709_v36 = vadd.f32 %v2708_v12, %v2707_v30  ;;  %v3117_v21 = vpack.c.bf16 %v2531_v50, %v2531_v50  ;;  %v2525_v38 = vpop.f32.mrb[7].mxu0  ;;  %v2656_v53 = vadd.f32 %v2655_v20, %v2654_v16  ;;  %v2534_v11 = vadd.f32 %v3151_v9, %v4270_v40 }
 0x1e1   :  { %v3115_v35 = vpack.c.bf16 %v2523_v59, %v2523_v59  ;;  %v2657_v17 = vsel %vm2305_vm0, %v2523_v59, 0.0  ;;  %v2693_v57 = vmul.f32 %v2523_v59, %v2523_v59  ;;  %v2526_v56 = vadd.f32 %v4270_v40, %v2525_v38 }
 0x1e2   :  { %2640 = vst.msk [vmem:[%s4393_s3 + $0x18] sm:$0xf] %vm2633_vm9, %v3117_v21  ;;  %v2711_v7 = vadd.f32 %v2710_v41, %v2709_v36  ;;  %v2658_v32 = vadd.f32 %v2657_v17, %v2656_v53  ;;  %v3118_v8 = vpack.c.bf16 %v2534_v11, %v2534_v11  ;;  %v2695_v60 = vmul.f32 %v2531_v50, %v2531_v50 }
 0x1e3   :  { %2638 = vst.msk [vmem:[%s4393_s3 + $0x10] sm:$0xf] %vm2633_vm9, %v3115_v35  ;;  %v2712_v55 = vsel %vm2305_vm0, %v2693_v57, 0.0  ;;  %v3116_v47 = vpack.c.bf16 %v2526_v56, %v2526_v56  ;;  %v2659_v44 = vsel %vm2305_vm0, %v2526_v56, 0.0  ;;  %v2694_v23 = vmul.f32 %v2526_v56, %v2526_v56 }
 0x1e4   :  { %v2713_v61 = vadd.f32 %v2712_v55, %v2711_v7  ;;  %2641 = vst.msk [vmem:[%s4393_s3 + $0x1c] sm:$0xf] %vm2633_vm9, %v3118_v8  ;;  %v2660_v25 = vadd.f32 %v2659_v44, %v2658_v32  ;;  %v2661_v63 = vsel %vm2305_vm0, %v2531_v50, 0.0  ;;  %v2696_v28 = vmul.f32 %v2534_v11, %v2534_v11 }
 0x1e5   :  { %2639 = vst.msk [vmem:[%s4393_s3 + $0x14] sm:$0xf] %vm2633_vm9, %v3116_v47  ;;  %v2714_v0 = vsel %vm2305_vm0, %v2694_v23, 0.0  ;;  %v2716_v43 = vsel %vm2305_vm0, %v2695_v60, 0.0  ;;  %v2663_v3 = vsel %vm2305_vm0, %v2534_v11, 0.0 }
 0x1e6   :  { %v2662_v49 = vadd.f32 %v2661_v63, %v2660_v25  ;;  %v2715_v5 = vadd.f32 %v2714_v0, %v2713_v61  ;;  %v2718_v51 = vsel %vm2305_vm0, %v2696_v28, 0.0 }
 0x1e8   :  { %v2717_v54 = vadd.f32 %v2716_v43, %v2715_v5  ;;  %v2664_v24 = vadd.f32 %v2663_v3, %v2662_v49 }
 0x1ea   :  { %v2719_v13 = vadd.f32 %v2718_v51, %v2717_v54 }
 0x215   :  { %v3154_v6 = vpop.f32.mrb[0].mxu1 }
 0x216   :  { %v2547_v52 = vadd.f32 %v3154_v6, %v4270_v40  ;;  %v2538_v26 = vpop.f32.mrb[1].mxu1 }
 0x217   :  { %v2539_v10 = vadd.f32 %v4270_v40, %v2538_v26  ;;  %v3155_v14 = vpop.f32.mrb[2].mxu1 }
 0x218   :  { %v3121_v62 = vpack.c.bf16 %v2547_v52, %v2547_v52  ;;  %v2550_v18 = vadd.f32 %v3155_v14, %v4270_v40  ;;  %v2541_v48 = vpop.f32.mrb[3].mxu1  ;;  %v2699_v22 = vmul.f32 %v2547_v52, %v2547_v52  ;;  %v2669_v34 = vsel %vm2305_vm0, %v2547_v52, 0.0 }
 0x219   :  { %v3119_v33 = vpack.c.bf16 %v2539_v10, %v2539_v10  ;;  %v2665_v2 = vsel %vm2305_vm0, %v2539_v10, 0.0  ;;  %v2697_v29 = vmul.f32 %v2539_v10, %v2539_v10  ;;  %v2542_v15 = vadd.f32 %v4270_v40, %v2541_v48 }
 0x21a   :  { %2644 = vst.msk [vmem:[%s4393_s3 + $0x28] sm:$0xf] %vm2633_vm9, %v3121_v62  ;;  %v2666_v58 = vadd.f32 %v2665_v2, %v2664_v24  ;;  %v3122_v4 = vpack.c.bf16 %v2550_v18, %v2550_v18  ;;  %v2700_v42 = vmul.f32 %v2550_v18, %v2550_v18  ;;  %v2671_v30 = vsel %vm2305_vm0, %v2550_v18, 0.0 }
 0x21b   :  { %2642 = vst.msk [vmem:[%s4393_s3 + $0x20] sm:$0xf] %vm2633_vm9, %v3119_v33  ;;  %v2720_v19 = vsel %vm2305_vm0, %v2697_v29, 0.0  ;;  %v3120_v37 = vpack.c.bf16 %v2542_v15, %v2542_v15  ;;  %v2667_v46 = vsel %vm2305_vm0, %v2542_v15, 0.0  ;;  %v2698_v27 = vmul.f32 %v2542_v15, %v2542_v15 }
 0x21c   :  { %v2721_v31 = vadd.f32 %v2720_v19, %v2719_v13  ;;  %2645 = vst.msk [vmem:[%s4393_s3 + $0x2c] sm:$0xf] %vm2633_vm9, %v3122_v4  ;;  %v2668_v45 = vadd.f32 %v2667_v46, %v2666_v58  ;;  %v2724_v39 = vsel %vm2305_vm0, %v2699_v22, 0.0  ;;  %v2726_v9 = vsel %vm2305_vm0, %v2700_v42, 0.0 }
 0x21d   :  { %2643 = vst.msk [vmem:[%s4393_s3 + $0x24] sm:$0xf] %vm2633_vm9, %v3120_v37  ;;  %v2722_v16 = vsel %vm2305_vm0, %v2698_v27, 0.0 }
 0x21e   :  { %v2670_v1 = vadd.f32 %v2669_v34, %v2668_v45  ;;  %v2723_v50 = vadd.f32 %v2722_v16, %v2721_v31 }
 0x220   :  { %v2672_v12 = vadd.f32 %v2671_v30, %v2670_v1  ;;  %v2725_v59 = vadd.f32 %v2724_v39, %v2723_v50 }
 0x222   :  { %v2727_v20 = vadd.f32 %v2726_v9, %v2725_v59 }
 0x247   :  { %v3158_v41 = vpop.f32.mrb[4].mxu1 }
 0x248   :  { %v2563_v36 = vadd.f32 %v3158_v41, %v4270_v40  ;;  %v2554_v21 = vpop.f32.mrb[5].mxu1 }
 0x249   :  { %v2555_v38 = vadd.f32 %v4270_v40, %v2554_v21  ;;  %v3159_v35 = vpop.f32.mrb[6].mxu1 }
 0x24a   :  { %v3125_v53 = vpack.c.bf16 %v2563_v36, %v2563_v36  ;;  %v2566_v17 = vadd.f32 %v3159_v35, %v4270_v40  ;;  %v2557_v57 = vpop.f32.mrb[7].mxu1  ;;  %v2703_v44 = vmul.f32 %v2563_v36, %v2563_v36  ;;  %v2677_v63 = vsel %vm2305_vm0, %v2563_v36, 0.0 }
 0x24b   :  { %v3123_v7 = vpack.c.bf16 %v2555_v38, %v2555_v38  ;;  %v2673_v11 = vsel %vm2305_vm0, %v2555_v38, 0.0  ;;  %v2701_v56 = vmul.f32 %v2555_v38, %v2555_v38  ;;  %v2558_v32 = vadd.f32 %v4270_v40, %v2557_v57 }
 0x24c   :  { %2648 = vst.msk [vmem:[%s4393_s3 + $0x38] sm:$0xf] %vm2633_vm9, %v3125_v53  ;;  %v2674_v55 = vadd.f32 %v2673_v11, %v2672_v12  ;;  %v3126_v61 = vpack.c.bf16 %v2566_v17, %v2566_v17  ;;  %v2704_v28 = vmul.f32 %v2566_v17, %v2566_v17  ;;  %v2679_v5 = vsel %vm2305_vm0, %v2566_v17, 0.0 }
 0x24d   :  { %2646 = vst.msk [vmem:[%s4393_s3 + $0x30] sm:$0xf] %vm2633_vm9, %v3123_v7  ;;  %v2728_v8 = vsel %vm2305_vm0, %v2701_v56, 0.0  ;;  %v3124_v60 = vpack.c.bf16 %v2558_v32, %v2558_v32  ;;  %v2675_v47 = vsel %vm2305_vm0, %v2558_v32, 0.0  ;;  %v2702_v25 = vmul.f32 %v2558_v32, %v2558_v32 }
 0x24e   :  { %v2729_v23 = vadd.f32 %v2728_v8, %v2727_v20  ;;  %2649 = vst.msk [vmem:[%s4393_s3 + $0x3c] sm:$0xf] %vm2633_vm9, %v3126_v61  ;;  %v2676_v40 = vadd.f32 %v2675_v47, %v2674_v55  ;;  %v2732_v3 = vsel %vm2305_vm0, %v2703_v44, 0.0  ;;  %v2734_v51 = vsel %vm2305_vm0, %v2704_v28, 0.0 }
 0x24f   :  { %2647 = vst.msk [vmem:[%s4393_s3 + $0x34] sm:$0xf] %vm2633_vm9, %v3124_v60  ;;  %v2730_v49 = vsel %vm2305_vm0, %v2702_v25, 0.0 }
 0x250   :  { %v2678_v0 = vadd.f32 %v2677_v63, %v2676_v40  ;;  %v2731_v43 = vadd.f32 %v2730_v49, %v2729_v23 }
 0x252   :  { %v2680_v54 = vadd.f32 %v2679_v5, %v2678_v0  ;;  %v2733_v24 = vadd.f32 %v2732_v3, %v2731_v43 }
 0x254   :  { %v2681_v13 = vrot.slane %v2680_v54, 4  ;;  %v2735_v6 = vadd.f32 %v2734_v51, %v2733_v24 }
 0x256   :  { %v2682_v52 = vadd.f32 %v2681_v13, %v2680_v54  ;;  %v2736_v26 = vrot.slane %v2735_v6, 4 }
 0x258   :  { %v2683_v10 = vrot.slane %v2682_v52, 2  ;;  %v2737_v14 = vadd.f32 %v2736_v26, %v2735_v6 }
 0x25a   :  { %v2684_v62 = vadd.f32 %v2683_v10, %v2682_v52  ;;  %v2738_v18 = vrot.slane %v2737_v14, 2 }
 0x25c   :  { %v2685_v48 = vrot.slane %v2684_v62, 1  ;;  %v2739_v33 = vadd.f32 %v2738_v18, %v2737_v14 }
 0x25e   :  { %v2686_v2 = vadd.f32 %v2685_v48, %v2684_v62  ;;  %v2740_v29 = vrot.slane %v2739_v33, 1 }
 0x260   :  { %2688 = vst.msk [vmem:[%s4394_s4] sm:$0x1] %vm2687_vm10, %v2686_v2  ;;  %v2741_v15 = vadd.f32 %v2740_v29, %v2739_v33 }
 0x262   :  { %2742 = vst.msk [vmem:[%s4395_s5] sm:$0x1] %vm2687_vm10, %v2741_v15 }

// kernel: down_forward.3
= control target key start
LH: loop header
LB: loop body
LE: loop exit
PB: predicated region body
PF: predicated region fallthrough
CT: control target
= control target key end

     0   :  { %vm140_vm0 = vcmask 57344   ;;  %vm141_vm1 = vsmask.f32 256  ;;  %v152_v0 = vld [vmem:[#allocation2 + $0x18] sm:$0x1]  ;;  %vm203_vm2 = vcmask 61444   ;;  %s4470_s0 = inlined_call_operand.vmem [shape: bf16[2,8,8,8], index: 0, kind: input, shape index: {}]   ;;  %s4471_s1 = inlined_call_operand.vmem [shape: f32[1,8], index: 1, kind: input, shape index: {}]   ;;  %s4472_s2 = inlined_call_operand.vmem [shape: f32[1,8], index: 2, kind: input, shape index: {}]   ;;  %s4473_s3 = inlined_call_operand.vmem [shape: bf16[72,8], index: 3, kind: input, shape index: {}]   ;;  %s4474_s4 = inlined_call_operand.vmem [shape: f32[1,8], index: 4, kind: input, shape index: {}]   ;;  %s4475_s5 = inlined_call_operand.vmem [shape: bf16[2,64,8], index: 5, kind: output, shape index: {0}]   ;;  %s4476_s6 = inlined_call_operand.vmem [shape: f32[1,1,8], index: 6, kind: output, shape index: {1}]   ;;  %s4477_s7 = inlined_call_operand.vmem [shape: f32[1,1,8], index: 7, kind: output, shape index: {2}]  }
   0x1   :  { %v3215_v1 = vld [vmem:[%s4470_s0 + $0x8] sm:$0xff]   ;;  %v3560_v2 = vld [vmem:[%s4471_s1] ss:$0 sm:$0xff]  ;;  %vm3563_vm3 = vmand %vm140_vm0, %vm141_vm1  ;;  %vm204_vm4 = vsmask.f32 7954  ;;  %vm395_vm6 = vcmask 61440  }
   0x2   :  { %v3189_v3 = vunpack.c.l.bf16 %v3215_v1  ;;  %v3190_v4 = vunpack.c.h.bf16 %v3215_v1  ;;  %v155_v6 = vld [vmem:[#allocation2 + $0x20] sm:$0x1]  ;;  %v215_v7 = vld [vmem:[#allocation2 + $0x18] sm:$0x10]  ;;  %v153_v9 = vsel %vm3563_vm3, 0, %v152_v0  ;;  %vm3576_vm5 = vmand %vm203_vm2, %vm204_vm4  ;;  %vm134_vm9 = vcmask 64512  }
   0x3   :  { %v3570_v8 = vld [vmem:[%s4472_s2] ss:$0 sm:$0xff]  ;;  %v156_v10 = vsel %vm3563_vm3, 0, %v155_v6  ;;  %v218_v12 = vld [vmem:[#allocation2 + $0x20] sm:$0x10]  ;;  %v216_v15 = vsel %vm3576_vm5, 0, %v215_v7 }
   0x4   :  { %v66_v13 = vmul.f32 %v3189_v3, %v3560_v2  ;;  %v67_v14 = vmul.f32 %v3190_v4, %v3560_v2  ;;  %154 = vst [vmem:[#allocation2 + $0x18] sm:$0x1] %v153_v9  ;;  %157 = vst [vmem:[#allocation2 + $0x20] sm:$0x1] %v156_v10  ;;  %v219_v16 = vsel %vm3576_vm5, 0, %v218_v12  ;;  %v3184_v17 = vld [vmem:[%s4470_s0] sm:$0xff]  }
   0x5   :  { %vm396_vm7 = vsmask.f32 4354  ;;  %v146_v18 = vld [vmem:[#allocation2 + $0x8] sm:$0x1]  ;;  %217 = vst [vmem:[#allocation2 + $0x18] sm:$0x10] %v216_v15  ;;  %v3185_v19 = vunpack.c.l.bf16 %v3184_v17  ;;  %v3186_v20 = vunpack.c.h.bf16 %v3184_v17 }
   0x6   :  { %220 = vst [vmem:[#allocation2 + $0x20] sm:$0x10] %v219_v16  ;;  %v147_v21 = vsel %vm3563_vm3, 0, %v146_v18  ;;  %v149_v22 = vld [vmem:[#allocation2 + $0x10] sm:$0x1]  ;;  %v88_v25 = vadd.f32 %v3570_v8, %v66_v13  ;;  %v89_v26 = vadd.f32 %v3570_v8, %v67_v14  ;;  %v3217_v36 = vld [vmem:[%s4470_s0 + $0x18] sm:$0xff]   ;;  %vm3627_vm8 = vmand %vm395_vm6, %vm396_vm7 }
   0x7   :  { %v209_v23 = vld [vmem:[#allocation2 + $0x8] sm:$0x10]  ;;  %v3594_v24 = vld [vmem:[%s4470_s0 + $0x10] sm:$0xff]   ;;  %148 = vst [vmem:[#allocation2 + $0x8] sm:$0x1] %v147_v21  ;;  %v150_v27 = vsel %vm3563_vm3, 0, %v149_v22  ;;  %v64_v31 = vmul.f32 %v3185_v19, %v3560_v2  ;;  %v65_v32 = vmul.f32 %v3186_v20, %v3560_v2  ;;  %v3197_v45 = vunpack.c.l.bf16 %v3217_v36 }
   0x8   :  { %v210_v28 = vsel %vm3576_vm5, 0, %v209_v23  ;;  %v212_v29 = vld [vmem:[#allocation2 + $0x10] sm:$0x10]  ;;  %v158_v30 = vld [vmem:[#allocation2 + $0x28] sm:$0x1]  ;;  %v3193_v34 = vunpack.c.l.bf16 %v3594_v24  ;;  %v104_v37 = vmax.f32 %v88_v25, 0.0  ;;  %v3198_v48 = vunpack.c.h.bf16 %v3217_v36 }
   0x9   :  { %151 = vst [vmem:[#allocation2 + $0x10] sm:$0x1] %v150_v27  ;;  %211 = vst [vmem:[#allocation2 + $0x8] sm:$0x10] %v210_v28  ;;  %v213_v33 = vsel %vm3576_vm5, 0, %v212_v29  ;;  %v105_v38 = vmax.f32 %v89_v26, 0.0  ;;  %v86_v42 = vadd.f32 %v3570_v8, %v64_v31  ;;  %v87_v43 = vadd.f32 %v3570_v8, %v65_v32 }
   0xa   :  { %v221_v35 = vld [vmem:[#allocation2 + $0x28] sm:$0x10]  ;;  %214 = vst [vmem:[#allocation2 + $0x10] sm:$0x10] %v213_v33  ;;  %v159_v39 = vsel %vm3563_vm3, 0, %v158_v30  ;;  %v68_v44 = vmul.f32 %v3193_v34, %v3560_v2  ;;  %v120_v46 = vpack.c.bf16 %v104_v37, %v104_v37  ;;  %v70_v53 = vmul.f32 %v3197_v45, %v3560_v2  ;;  %s3506_s17 = smov 24  }
   0xb   :  { %v222_v40 = vsel %vm3576_vm5, 0, %v221_v35  ;;  %v164_v41 = vld [vmem:[#allocation2 + $0x38] sm:$0x1]  ;;  %160 = vst [vmem:[#allocation2 + $0x28] sm:$0x1] %v159_v39  ;;  %v121_v47 = vpack.c.bf16 %v105_v38, %v105_v38  ;;  %v102_v50 = vmax.f32 %v86_v42, 0.0  ;;  %v71_v62 = vmul.f32 %v3198_v48, %v3560_v2 }
   0xc   :  { %223 = vst [vmem:[#allocation2 + $0x28] sm:$0x10] %v222_v40  ;;  %v165_v49 = vsel %vm3563_vm3, 0, %v164_v41  ;;  %v103_v51 = vmax.f32 %v87_v43, 0.0  ;;  %v90_v52 = vadd.f32 %v3570_v8, %v68_v44  ;;  %v167_v54 = vld [vmem:[#allocation2 + $0x40] sm:$0x1]  ;;  %v92_v4 = vadd.f32 %v3570_v8, %v70_v53 }
   0xd   :  { %166 = vst [vmem:[#allocation2 + $0x38] sm:$0x1] %v165_v49  ;;  %v281_v55 = vshrl.u32 %v120_v46, 16  ;;  %v284_v56 = vshll.u32 %v120_v46, 16  ;;  %v288_v57 = vshrl.u32 %v121_v47, 16  ;;  %v291_v58 = vshll.u32 %v121_v47, 16 }
   0xe   :  { %v118_v59 = vpack.c.bf16 %v102_v50, %v102_v50  ;;  %v119_v60 = vpack.c.bf16 %v103_v51, %v103_v51  ;;  %v106_v61 = vmax.f32 %v90_v52, 0.0  ;;  %v227_v63 = vld [vmem:[#allocation2 + $0x38] sm:$0x10]  ;;  %v168_v6 = vsel %vm3563_vm3, 0, %v167_v54  ;;  %v407_v9 = vld [vmem:[#allocation2 + $0x20] sm:$0x1f] }
   0xf   :  { %v283_v0 = vrot.slane %v281_v55, 7  ;;  %v290_v1 = vrot.slane %v288_v57, 7  ;;  %v404_v3 = vld [vmem:[#allocation2 + $0x18] sm:$0x1f]  ;;  %169 = vst [vmem:[#allocation2 + $0x40] sm:$0x1] %v168_v6  ;;  %v93_v18 = vadd.f32 %v3570_v8, %v71_v62  ;;  %v3194_v39 = vunpack.c.h.bf16 %v3594_v24 }
  0x10   :  { %v267_v10 = vshrl.u32 %v118_v59, 16  ;;  %v270_v12 = vshll.u32 %v118_v59, 16  ;;  %v274_v13 = vshrl.u32 %v119_v60, 16  ;;  %v277_v14 = vshll.u32 %v119_v60, 16  ;;  %v230_v19 = vld [vmem:[#allocation2 + $0x40] sm:$0x10] }
  0x11   :  { %v286_v15 = vor.u32 %v284_v56, %v283_v0  ;;  %v293_v16 = vor.u32 %v291_v58, %v290_v1  ;;  %v122_v17 = vpack.c.bf16 %v106_v61, %v106_v61  ;;  %v108_v22 = vmax.f32 %v92_v4, 0.0  ;;  %v161_v25 = vld [vmem:[#allocation2 + $0x30] sm:$0x1]  ;;  %v398_v28 = vld [vmem:[#allocation2 + $0x8] sm:$0x1f]  ;;  %v3218_v52 = vld [vmem:[%s4470_s0 + $0x20] sm:$0xff]  }
  0x12   :  { %v269_v20 = vrot.slane %v267_v10, 7  ;;  %v276_v21 = vrot.slane %v274_v13, 7  ;;  %v228_v23 = vsel %vm3576_vm5, 0, %v227_v63  ;;  %v401_v29 = vld [vmem:[#allocation2 + $0x10] sm:$0x1f]  ;;  %v109_v34 = vmax.f32 %v93_v18, 0.0 }
  0x13   :  { %v405_v26 = vsel %vm3627_vm8, %v286_v15, %v404_v3  ;;  %v408_v27 = vsel %vm3627_vm8, %v293_v16, %v407_v9  ;;  %v295_v30 = vshrl.u32 %v122_v17, 16  ;;  %v298_v31 = vshll.u32 %v122_v17, 16  ;;  %229 = vst [vmem:[#allocation2 + $0x38] sm:$0x10] %v228_v23  ;;  %v224_v36 = vld [vmem:[#allocation2 + $0x30] sm:$0x10] }
  0x14   :  { %406 = vst [vmem:[#allocation2 + $0x18] sm:$0x1f] %v405_v26  ;;  %409 = vst [vmem:[#allocation2 + $0x20] sm:$0x1f] %v408_v27  ;;  %v272_v32 = vor.u32 %v270_v12, %v269_v20  ;;  %v279_v33 = vor.u32 %v277_v14, %v276_v21  ;;  %v124_v35 = vpack.c.bf16 %v108_v22, %v108_v22  ;;  %v231_v38 = vsel %vm3576_vm5, 0, %v230_v19  ;;  %v3219_v53 = vld [vmem:[%s4470_s0 + $0x28] sm:$0xff]  }
  0x15   :  { %v297_v37 = vrot.slane %v295_v30, 7  ;;  %v162_v40 = vsel %vm3563_vm3, 0, %v161_v25  ;;  %v410_v43 = vld [vmem:[#allocation2 + $0x28] sm:$0x1f]  ;;  %v125_v44 = vpack.c.bf16 %v109_v34, %v109_v34  ;;  %232 = vst [vmem:[#allocation2 + $0x40] sm:$0x10] %v231_v38  ;;  %v69_v24 = vmul.f32 %v3194_v39, %v3560_v2 }
  0x16   :  { %v399_v41 = vsel %vm3627_vm8, %v272_v32, %v398_v28  ;;  %v402_v42 = vsel %vm3627_vm8, %v279_v33, %v401_v29  ;;  %v309_v45 = vshrl.u32 %v124_v35, 16  ;;  %163 = vst [vmem:[#allocation2 + $0x30] sm:$0x1] %v162_v40  ;;  %v312_v47 = vshll.u32 %v124_v35, 16  ;;  %v176_v56 = vld [vmem:[#allocation2 + $0x58] sm:$0x1] }
  0x17   :  { %400 = vst [vmem:[#allocation2 + $0x8] sm:$0x1f] %v399_v41  ;;  %403 = vst [vmem:[#allocation2 + $0x10] sm:$0x1f] %v402_v42  ;;  %v300_v46 = vor.u32 %v298_v31, %v297_v37  ;;  %v225_v48 = vsel %vm3576_vm5, 0, %v224_v36  ;;  %v316_v50 = vshrl.u32 %v125_v44, 16  ;;  %v91_v55 = vadd.f32 %v3570_v8, %v69_v24 }
  0x18   :  { %v311_v49 = vrot.slane %v309_v45, 7  ;;  %v319_v51 = vshll.u32 %v125_v44, 16  ;;  %226 = vst [vmem:[#allocation2 + $0x30] sm:$0x10] %v225_v48  ;;  %vm881_vm10 = vcmask 1042432   ;;  %v3505_v61 = vmov 0  }
  0x19   :  { %v411_v54 = vsel %vm3627_vm8, %v300_v46, %v410_v43  ;;  %v318_v58 = vrot.slane %v316_v50, 7  ;;  %135 = vst.msk [vmem:[#allocation2] sm:$0xff] %vm134_vm9, %v3505_v61  ;;  %136 = vst.msk [vmem:[#allocation2 + $0x50] sm:$0xff] %vm134_vm9, %v3505_v61  ;;  %v3201_v62 = vunpack.c.l.bf16 %v3218_v52  ;;  %v3202_v63 = vunpack.c.h.bf16 %v3218_v52  ;;  %s3507_s18 = smov 48   ;;  %s3508_s19 = smov 40  }
  0x1a   :  { %412 = vst [vmem:[#allocation2 + $0x28] sm:$0x1f] %v411_v54  ;;  %v314_v57 = vor.u32 %v312_v47, %v311_v49  ;;  %v416_v59 = vld [vmem:[#allocation2 + $0x38] sm:$0x1f]  ;;  %138 = vst.msk [vmem:[#allocation2 + $0x48] sm:$0xff] %vm134_vm9, %v3505_v61  ;;  %v3205_v0 = vunpack.c.l.bf16 %v3219_v53  ;;  %v3206_v1 = vunpack.c.h.bf16 %v3219_v53  ;;  %v107_v6 = vmax.f32 %v91_v55, 0.0 }
  0x1b   :  { %v3282_v60 = vld [vmem:[#allocation2 + $0x18] ss:$8 sps:$4 sm:$0xff]   ;;  %139 = vst.msk [vmem:[#allocation2 + $0x98] sm:$0xff] %vm134_vm9, %v3505_v61  ;;  %v321_v3 = vor.u32 %v319_v51, %v318_v58  ;;  %v177_v9 = vsel %vm3563_vm3, 0, %v176_v56  ;;  %v72_v14 = vmul.f32 %v3201_v62, %v3560_v2  ;;  %v73_v15 = vmul.f32 %v3202_v63, %v3560_v2  ;;  %s3509_s20 = smov 16   ;;  %s3510_s21 = smov 64  }
  0x1c   :  { %v417_v4 = vsel %vm3627_vm8, %v314_v57, %v416_v59  ;;  %2103 = vrot.lane.b32.xlu1 %v3282_v60, %s3506_s17  ;;  %v419_v10 = vld [vmem:[#allocation2 + $0x40] sm:$0x1f]  ;;  %v3668_v12 = vld [vmem:[#allocation2 + $0x18] sm:$0x1e]  ;;  %178 = vst [vmem:[#allocation2 + $0x58] sm:$0x1] %v177_v9  ;;  %v74_v16 = vmul.f32 %v3205_v0, %v3560_v2  ;;  %v123_v19 = vpack.c.bf16 %v107_v6, %v107_v6 }
  0x1d   :  { %418 = vst [vmem:[#allocation2 + $0x38] sm:$0x1f] %v417_v4  ;;  %v3670_v13 = vld [vmem:[#allocation2 + $0x18] sm:$0x1e]  ;;  %v420_v18 = vsel %vm3627_vm8, %v321_v3, %v419_v10  ;;  %v3019_v20 = vcombine.low %v3668_v12, %v3668_v12  ;;  %v75_v21 = vmul.f32 %v3206_v1, %v3560_v2  ;;  %vm882_vm11 = vcmask 1046532   ;;  %s3511_s22 = smov 32  }
  0x1e   :  { %v3283_v17 = vld [vmem:[#allocation2 + $0x8] ss:$8 sps:$4 sm:$0xff]   ;;  %421 = vst [vmem:[#allocation2 + $0x40] sm:$0x1f] %v420_v18  ;;  %v3020_v23 = vcombine.high %v3668_v12, %v3668_v12  ;;  %v2863_v25 = vcombine.low %v3670_v13, %v3670_v13  ;;  %v2864_v26 = vcombine.high %v3670_v13, %v3670_v13  ;;  %v302_v27 = vshrl.u32 %v123_v19, 16  ;;  %vm3695_vm12 = vmor %vm881_vm10, %vm882_vm11  ;;  %s3512_s23 = smov 56  }
  0x1f   :  { %v3285_v22 = vld [vmem:[#allocation2 + $0x10] ss:$8 sps:$4 sm:$0xff]   ;;  %2101 = vrot.lane.b32.xlu0 %v3283_v17, %s3506_s17  ;;  %v305_v28 = vshll.u32 %v123_v19, 16  ;;  %v1284_v29 = vld [vmem:[#allocation2 + $0x8] sm:$0x1e]  ;;  %v3688_v2 = vadd.f32 %v3570_v8, %v72_v14  ;;  %v3691_v31 = vadd.f32 %v3570_v8, %v73_v15  ;;  %v3050_v42 = vrot.slane %v3019_v20, 9 }
  0x20   :  { %v1285_v30 = vld [vmem:[#allocation2 + $0x10] sm:$0x1e]  ;;  %v2937_v34 = vcombine.low %v1284_v29, %v1284_v29  ;;  %v2938_v35 = vcombine.high %v1284_v29, %v1284_v29  ;;  %v304_v38 = vrot.slane %v302_v27, 7  ;;  %v206_v40 = vld [vmem:[#allocation2] sm:$0x10]  ;;  %v3700_v43 = vadd.f32 %v3570_v8, %v74_v16  ;;  %s3513_s24 = smov 8  }
  0x21   :  { %v3284_v32 = vld [vmem:[#allocation2 + $0x20] ss:$8 sps:$4 sm:$0xff]   ;;  %v413_v33 = vld [vmem:[#allocation2 + $0x30] sm:$0x1f]  ;;  %v2939_v36 = vcombine.low %v1285_v30, %v1285_v30  ;;  %v2940_v37 = vcombine.high %v1285_v30, %v1285_v30  ;;  %v3703_v44 = vadd.f32 %v3570_v8, %v75_v21  ;;  %v207_v50 = vsel %vm3576_vm5, 0, %v206_v40 }
  0x22   :  { %v786_v41 = vld [vmem:[#allocation2 + $0x8] sm:$0x1e]  ;;  %2239 = vrot.lane.b32.xlu1 %v3284_v32, %s3507_s18  ;;  %v2969_v45 = vrot.slane %v2937_v34, 9  ;;  %v1382_v46 = vrot.slane %v2938_v35, 5  ;;  %v1781_v48 = vld [vmem:[#allocation2 + $0x10] sm:$0x1e]  ;;  %v307_v49 = vor.u32 %v305_v28, %v304_v38 }
  0x23   :  { %v2970_v47 = vrot.slane %v2939_v36, 9  ;;  %v1386_v24 = vrot.slane %v2940_v37, 5  ;;  %2237 = vrot.lane.b32.xlu0 %v3285_v22, %s3507_s18  ;;  %v2859_v51 = vcombine.low %v786_v41, %v786_v41  ;;  %v2860_v52 = vcombine.high %v786_v41, %v786_v41  ;;  %v787_v53 = vld [vmem:[#allocation2 + $0x10] sm:$0x1e]  ;;  %208 = vst [vmem:[#allocation2] sm:$0x10] %v207_v50 }
  0x24   :  { %v1383_v8 = vsel %vm3695_vm12, %v2969_v45, %v1382_v46  ;;  %v3017_v55 = vcombine.low %v1781_v48, %v1781_v48  ;;  %v3018_v56 = vcombine.high %v1781_v48, %v1781_v48  ;;  %v1783_v57 = vld [vmem:[#allocation2 + $0x20] sm:$0x1e]  ;;  %v414_v59 = vsel %vm3627_vm8, %v307_v49, %v413_v33  ;;  %v1784_v12 = vld [vmem:[#allocation2 + $0x28] sm:$0x1e]  ;;  %v1286_v13 = vld [vmem:[#allocation2 + $0x18] sm:$0x1e] }
  0x25   :  { %v1387_v54 = vsel %vm3695_vm12, %v2970_v47, %v1386_v24  ;;  %v3286_v58 = vld [vmem:[#allocation2 + $0x38] ss:$8 sps:$4 sm:$0xff]   ;;  %v2890_v61 = vrot.slane %v2859_v51, 9  ;;  %v890_v62 = vrot.slane %v2860_v52, 5  ;;  %415 = vst [vmem:[#allocation2 + $0x30] sm:$0x1f] %v414_v59  ;;  %v2861_v3 = vcombine.low %v787_v53, %v787_v53 }
  0x26   :  { %v3715_v60 = vcombine.low %v1383_v8, %v1387_v54  ;;  %v3049_v63 = vrot.slane %v3017_v55, 9  ;;  %v1879_v0 = vrot.slane %v3018_v56, 5  ;;  %v1883_v1 = vrot.slane %v3020_v23, 5  ;;  %2107 = vrot.lane.b32.xlu1 %v3286_v58, %s3506_s17  ;;  %v1287_v18 = vld [vmem:[#allocation2 + $0x20] sm:$0x1e] }
  0x27   :  { %v891_v4 = vsel %vm3695_vm12, %v2890_v61, %v890_v62  ;;  %v2862_v6 = vcombine.high %v787_v53, %v787_v53  ;;  %v2892_v9 = vrot.slane %v2863_v25, 9  ;;  %v898_v10 = vrot.slane %v2864_v26, 5  ;;  %v789_v38 = vld [vmem:[#allocation2 + $0x20] sm:$0x1e]  ;;  %v790_v40 = vld [vmem:[#allocation2 + $0x28] sm:$0x1e] }
  0x28   :  { %v1880_v14 = vsel %vm3695_vm12, %v3049_v63, %v1879_v0  ;;  %v1884_v15 = vsel %vm3695_vm12, %v3050_v42, %v1883_v1  ;;  %v2891_v16 = vrot.slane %v2861_v3, 9  ;;  %v3021_v17 = vcombine.low %v1783_v57, %v1783_v57  ;;  %v792_v59 = vld [vmem:[#allocation2 + $0x38] sm:$0x1e] }
  0x29   :  { %v3724_v19 = vcombine.low %v1880_v14, %v1884_v15  ;;  %v894_v20 = vrot.slane %v2862_v6, 5  ;;  %v899_v21 = vsel %vm3695_vm12, %v2892_v9, %v898_v10  ;;  %v3022_v22 = vcombine.high %v1783_v57, %v1783_v57  ;;  %v966_v1 = vld [vmem:[#allocation2 + $0x18] sm:$0x1f]  ;;  %v967_v15 = vld [vmem:[#allocation2 + $0x20] sm:$0x1f] }
  0x2a   :  { %v3023_v23 = vcombine.low %v1784_v12, %v1784_v12  ;;  %v3024_v25 = vcombine.high %v1784_v12, %v1784_v12  ;;  %v3051_v26 = vrot.slane %v3021_v17, 9  ;;  %v2941_v27 = vcombine.low %v1286_v13, %v1286_v13  ;;  %v785_v28 = vld [vmem:[#allocation2] sm:$0x1e] }
  0x2b   :  { %v895_v29 = vsel %vm3695_vm12, %v2891_v16, %v894_v20  ;;  %v1887_v30 = vrot.slane %v3022_v22, 5  ;;  %v2942_v32 = vcombine.high %v1286_v13, %v1286_v13  ;;  %v2943_v33 = vcombine.low %v1287_v18, %v1287_v18 }
  0x2c   :  { %v2857_v34 = vcombine.low %v785_v28, %v785_v28  ;;  %v2858_v35 = vcombine.high %v785_v28, %v785_v28  ;;  %v3082_v36 = vcombine.low %v895_v29, %v899_v21  ;;  %v3052_v37 = vrot.slane %v3023_v23, 9  ;;  %v3287_v41 = vld [vmem:[#allocation2 + $0x28] ss:$8 sps:$4 sm:$0xff]   ;;  %v143_v28 = vld [vmem:[#allocation2] sm:$0x1] }
  0x2d   :  { %v1888_v42 = vsel %vm3695_vm12, %v3051_v26, %v1887_v30  ;;  %v1891_v45 = vrot.slane %v3024_v25, 5  ;;  %v2944_v46 = vcombine.high %v1287_v18, %v1287_v18  ;;  %v2971_v47 = vrot.slane %v2941_v27, 9  ;;  %2105 = vrot.lane.b32.xlu0 %v3287_v41, %s3506_s17  ;;  %v791_v54 = vld [vmem:[#allocation2 + $0x30] sm:$0x1e]  ;;  %v463_v29 = vld [vmem:[#allocation2 + $0x8] sm:$0x1f] }
  0x2e   :  { %v2889_v24 = vrot.slane %v2857_v34, 9  ;;  %v886_v48 = vrot.slane %v2858_v35, 5  ;;  %v1390_v49 = vrot.slane %v2942_v32, 5  ;;  %v2972_v50 = vrot.slane %v2943_v33, 9  ;;  %v1463_v35 = vld [vmem:[#allocation2 + $0x20] sm:$0x1f] }
  0x2f   :  { %v1892_v51 = vsel %vm3695_vm12, %v3052_v37, %v1891_v45  ;;  %v1394_v52 = vrot.slane %v2944_v46, 5  ;;  %v2865_v53 = vcombine.low %v789_v38, %v789_v38  ;;  %v2866_v8 = vcombine.high %v789_v38, %v789_v38 }
  0x30   :  { %v887_v55 = vsel %vm3695_vm12, %v2889_v24, %v886_v48  ;;  %v3130_v56 = vcombine.low %v1888_v42, %v1892_v51  ;;  %v1391_v57 = vsel %vm3695_vm12, %v2971_v47, %v1390_v49  ;;  %v2867_v58 = vcombine.low %v790_v40, %v790_v40  ;;  %v1464_v49 = vld [vmem:[#allocation2 + $0x28] sm:$0x1f] }
  0x31   :  { %v3081_v61 = vcombine.low %v887_v55, %v891_v4  ;;  %v1395_v62 = vsel %vm3695_vm12, %v2972_v50, %v1394_v52  ;;  %v2868_v63 = vcombine.high %v790_v40, %v790_v40  ;;  %v2893_v0 = vrot.slane %v2865_v53, 9  ;;  %2181 = vrot.lane.b32.xlu0 %v3715_v60, %s3508_s19 }
  0x32   :  { %vm558_vm13 = vsmask.f32 3328  ;;  %v3106_v3 = vcombine.low %v1391_v57, %v1395_v62  ;;  %v902_v6 = vrot.slane %v2866_v8, 5  ;;  %v2894_v9 = vrot.slane %v2867_v58, 9 }
  0x33   :  { %v2869_v10 = vcombine.low %v791_v54, %v791_v54  ;;  %2045 = vrot.lane.b32.xlu1 %v3081_v61, %s3509_s20  ;;  %v906_v12 = vrot.slane %v2868_v63, 5  ;;  %v2870_v4 = vcombine.high %v791_v54, %v791_v54  ;;  %v2871_v13 = vcombine.low %v792_v59, %v792_v59 }
  0x34   :  { %v2872_v14 = vcombine.high %v792_v59, %v792_v59  ;;  %v903_v16 = vsel %vm3695_vm12, %v2893_v0, %v902_v6  ;;  %vm559_vm14 = vsmask.f32 7440  ;;  %v2909_v18 = vcombine.low %v966_v1, %v966_v1 }
  0x35   :  { %v2895_v17 = vrot.slane %v2869_v10, 9  ;;  %v907_v20 = vsel %vm3695_vm12, %v2894_v9, %v906_v12  ;;  %v910_v21 = vrot.slane %v2870_v4, 5  ;;  %v2896_v22 = vrot.slane %v2871_v13, 9  ;;  %2317 = vrot.lane.b32.xlu0 %v3724_v19, %s3510_s21  ;;  %vm3761_vm15 = vmor %vm558_vm13, %vm559_vm14 }
  0x36   :  { %v914_v60 = vrot.slane %v2872_v14, 5  ;;  %v3083_v23 = vcombine.low %v903_v16, %v907_v20  ;;  %v2910_v25 = vcombine.high %v966_v1, %v966_v1  ;;  %v2911_v26 = vcombine.low %v967_v15, %v967_v15  ;;  %v464_v16 = vld [vmem:[#allocation2 + $0x10] sm:$0x1f] }
  0x37   :  { %v2912_v27 = vcombine.high %v967_v15, %v967_v15  ;;  %2047 = vrot.lane.b32.xlu1 %v3082_v36, %s3509_s20  ;;  %v911_v30 = vsel %vm3695_vm12, %v2895_v17, %v910_v21  ;;  %v1089_v33 = vshrl.u32 %v2909_v18, 16  ;;  %v1092_v34 = vshll.u32 %v2909_v18, 16 }
  0x38   :  { %v915_v32 = vsel %vm3695_vm12, %v2896_v22, %v914_v60  ;;  %v1098_v38 = vshll.u32 %v2910_v25, 16  ;;  %v1103_v40 = vshrl.u32 %v2911_v26, 16  ;;  %v1106_v41 = vshll.u32 %v2911_v26, 16 }
  0x39   :  { %v3084_v37 = vcombine.low %v911_v30, %v915_v32  ;;  %v1091_v42 = vrot.slane %v1089_v33, 4  ;;  %v1094_v45 = vrot.slane %v1092_v34, 5  ;;  %v1112_v46 = vshll.u32 %v2912_v27, 16  ;;  %2319 = vrot.lane.b32.xlu0 %v3130_v56, %s3510_s21  ;;  %v465_v27 = vld [vmem:[#allocation2 + $0x18] sm:$0x1f] }
  0x3a   :  { %v144_v19 = vsel %vm3563_vm3, 0, %v143_v28  ;;  %v1100_v36 = vrot.slane %v1098_v38, 5  ;;  %v1105_v47 = vrot.slane %v1103_v40, 4  ;;  %v1108_v24 = vrot.slane %v1106_v41, 5 }
  0x3b   :  { %145 = vst [vmem:[#allocation2] sm:$0x1] %v144_v19  ;;  %v2827_v48 = vcombine.low %v463_v29, %v463_v29  ;;  %2183 = vrot.lane.b32.xlu1 %v3106_v3, %s3508_s19  ;;  %v1095_v50 = vor.u32 %v1094_v45, %v1091_v42  ;;  %v1114_v51 = vrot.slane %v1112_v46, 5  ;;  %v2828_v52 = vcombine.high %v463_v29, %v463_v29 }
  0x3c   :  { %v2989_v53 = vcombine.low %v1463_v35, %v1463_v35  ;;  %v1109_v54 = vor.u32 %v1108_v24, %v1105_v47  ;;  %v2990_v58 = vcombine.high %v1463_v35, %v1463_v35  ;;  %v2991_v62 = vcombine.low %v1464_v49, %v1464_v49 }
  0x3d   :  { %v576_v55 = vshrl.u32 %v2827_v48, 16  ;;  %v579_v57 = vshll.u32 %v2827_v48, 16  ;;  %v1096_v59 = vrot.slane %v1095_v50, 4  ;;  %v585_v61 = vshll.u32 %v2828_v52, 16  ;;  %2049 = vrot.lane.b32.xlu0 %v3083_v23, %s3509_s20 }
  0x3e   :  { %v2992_v56 = vcombine.high %v1464_v49, %v1464_v49  ;;  %v1110_v63 = vrot.slane %v1109_v54, 4  ;;  %v1586_v3 = vshrl.u32 %v2989_v53, 16  ;;  %v1589_v10 = vshll.u32 %v2989_v53, 16  ;;  %v466_v54 = vld [vmem:[#allocation2 + $0x20] sm:$0x1f] }
  0x3f   :  { %v578_v0 = vrot.slane %v576_v55, 4  ;;  %v581_v1 = vrot.slane %v579_v57, 5  ;;  %2051 = vrot.lane.b32.xlu1 %v3084_v37, %s3509_s20  ;;  %v1101_v6 = vsel %vm3761_vm15, %v1096_v59, %v1100_v36  ;;  %v587_v9 = vrot.slane %v585_v61, 5  ;;  %v467_v61 = vld [vmem:[#allocation2 + $0x28] sm:$0x1f] }
  0x40   :  { %v1595_v12 = vshll.u32 %v2990_v58, 16  ;;  %v1115_v4 = vsel %vm3761_vm15, %v1110_v63, %v1114_v51  ;;  %v1588_v14 = vrot.slane %v1586_v3, 4  ;;  %v1600_v15 = vshrl.u32 %v2991_v62, 16 }
  0x41   :  { %v582_v13 = vor.u32 %v581_v1, %v578_v0  ;;  %v3098_v17 = vcombine.low %v1101_v6, %v1115_v4  ;;  %v1591_v20 = vrot.slane %v1589_v10, 5  ;;  %v1603_v22 = vshll.u32 %v2991_v62, 16 }
  0x42   :  { %v462_v18 = vld [vmem:[#allocation2] sm:$0x1f]  ;;  %v1597_v21 = vrot.slane %v1595_v12, 5  ;;  %v1602_v26 = vrot.slane %v1600_v15, 4  ;;  %v1609_v30 = vshll.u32 %v2992_v56, 16  ;;  %v2829_v32 = vcombine.low %v464_v16, %v464_v16 }
  0x43   :  { %v2825_v60 = vcombine.low %v462_v18, %v462_v18  ;;  %v2826_v23 = vcombine.high %v462_v18, %v462_v18  ;;  %v583_v25 = vrot.slane %v582_v13, 4  ;;  %2143 = vrot.lane.b32.xlu1 %v3098_v17, %s3511_s22  ;;  %v1592_v28 = vor.u32 %v1591_v20, %v1588_v14 }
  0x44   :  { %v1605_v29 = vrot.slane %v1603_v22, 5  ;;  %v1611_v41 = vrot.slane %v1609_v30, 5  ;;  %v2830_v42 = vcombine.high %v464_v16, %v464_v16  ;;  %v2831_v36 = vcombine.low %v465_v27, %v465_v27 }
  0x45   :  { %v562_v33 = vshrl.u32 %v2825_v60, 16  ;;  %v565_v34 = vshll.u32 %v2825_v60, 16  ;;  %v571_v35 = vshll.u32 %v2826_v23, 16  ;;  %v588_v37 = vsel %vm3761_vm15, %v583_v25, %v587_v9  ;;  %v964_v60 = vld [vmem:[#allocation2 + $0x8] sm:$0x1f] }
  0x46   :  { %v1593_v38 = vrot.slane %v1592_v28, 4  ;;  %v1606_v40 = vor.u32 %v1605_v29, %v1602_v26  ;;  %v2832_v48 = vcombine.high %v465_v27, %v465_v27  ;;  %v590_v49 = vshrl.u32 %v2829_v32, 16  ;;  %v965_v28 = vld [vmem:[#allocation2 + $0x10] sm:$0x1f] }
  0x47   :  { %v564_v45 = vrot.slane %v562_v33, 4  ;;  %v567_v46 = vrot.slane %v565_v34, 5  ;;  %v573_v19 = vrot.slane %v571_v35, 5  ;;  %v593_v51 = vshll.u32 %v2829_v32, 16 }
  0x48   :  { %v1598_v47 = vsel %vm3761_vm15, %v1593_v38, %v1597_v21  ;;  %v1607_v24 = vrot.slane %v1606_v40, 4  ;;  %v599_v52 = vshll.u32 %v2830_v42, 16  ;;  %v604_v53 = vshrl.u32 %v2831_v36, 16 }
  0x49   :  { %v568_v50 = vor.u32 %v567_v46, %v564_v45  ;;  %v592_v57 = vrot.slane %v590_v49, 4  ;;  %v607_v58 = vshll.u32 %v2831_v36, 16  ;;  %v613_v59 = vshll.u32 %v2832_v48, 16 }
  0x4a   :  { %v1612_v55 = vsel %vm3761_vm15, %v1607_v24, %v1611_v41  ;;  %v595_v63 = vrot.slane %v593_v51, 5  ;;  %v601_v0 = vrot.slane %v599_v52, 5  ;;  %v606_v1 = vrot.slane %v604_v53, 4  ;;  %v468_v51 = vld [vmem:[#allocation2 + $0x30] sm:$0x1f] }
  0x4b   :  { %v569_v62 = vrot.slane %v568_v50, 4  ;;  %v3122_v56 = vcombine.low %v1598_v47, %v1612_v55  ;;  %v609_v3 = vrot.slane %v607_v58, 5  ;;  %v615_v6 = vrot.slane %v613_v59, 5 }
  0x4c   :  { %v2833_v9 = vcombine.low %v466_v54, %v466_v54  ;;  %v596_v12 = vor.u32 %v595_v63, %v592_v57  ;;  %v2834_v4 = vcombine.high %v466_v54, %v466_v54  ;;  %v2835_v13 = vcombine.low %v467_v61, %v467_v61  ;;  %v469_v57 = vld [vmem:[#allocation2 + $0x38] sm:$0x1f] }
  0x4d   :  { %v574_v10 = vsel %vm3761_vm15, %v569_v62, %v573_v19  ;;  %2279 = vrot.lane.b32.xlu1 %v3122_v56, %s3512_s23  ;;  %v610_v15 = vor.u32 %v609_v3, %v606_v1  ;;  %v2836_v16 = vcombine.high %v467_v61, %v467_v61  ;;  %v2905_v38 = vcombine.low %v964_v60, %v964_v60 }
  0x4e   :  { %v3073_v14 = vcombine.low %v574_v10, %v588_v37  ;;  %v618_v17 = vshrl.u32 %v2833_v9, 16  ;;  %v597_v18 = vrot.slane %v596_v12, 4  ;;  %v621_v20 = vshll.u32 %v2833_v9, 16 }
  0x4f   :  { %v627_v21 = vshll.u32 %v2834_v4, 16  ;;  %v632_v22 = vshrl.u32 %v2835_v13, 16  ;;  %v611_v23 = vrot.slane %v610_v15, 4  ;;  %v635_v26 = vshll.u32 %v2835_v13, 16 }
  0x50   :  { %2005 = vrot.lane.b32.xlu0 %v3073_v14, %s3513_s24  ;;  %v620_v25 = vrot.slane %v618_v17, 4  ;;  %v641_v27 = vshll.u32 %v2836_v16, 16  ;;  %v602_v29 = vsel %vm3761_vm15, %v597_v18, %v601_v0  ;;  %v623_v30 = vrot.slane %v621_v20, 5  ;;  %v1461_v20 = vld [vmem:[#allocation2 + $0x10] sm:$0x1f] }
  0x51   :  { %v629_v32 = vrot.slane %v627_v21, 5  ;;  %v634_v33 = vrot.slane %v632_v22, 4  ;;  %v616_v34 = vsel %vm3761_vm15, %v611_v23, %v615_v6  ;;  %v637_v35 = vrot.slane %v635_v26, 5 }
  0x52   :  { %v643_v37 = vrot.slane %v641_v27, 5  ;;  %v3074_v40 = vcombine.low %v602_v29, %v616_v34  ;;  %v624_v41 = vor.u32 %v623_v30, %v620_v25  ;;  %v2906_v42 = vcombine.high %v964_v60, %v964_v60  ;;  %v1462_v25 = vld [vmem:[#allocation2 + $0x18] sm:$0x1f] }
  0x53   :  { %v2907_v45 = vcombine.low %v965_v28, %v965_v28  ;;  %v638_v46 = vor.u32 %v637_v35, %v634_v33  ;;  %v2908_v19 = vcombine.high %v965_v28, %v965_v28  ;;  %v1061_v36 = vshrl.u32 %v2905_v38, 16  ;;  %v970_v30 = vld [vmem:[#allocation2 + $0x38] sm:$0x1f] }
  0x54   :  { %v1064_v47 = vshll.u32 %v2905_v38, 16  ;;  %2007 = vrot.lane.b32.xlu0 %v3074_v40, %s3513_s24  ;;  %v625_v24 = vrot.slane %v624_v41, 4  ;;  %v1070_v48 = vshll.u32 %v2906_v42, 16  ;;  %v2837_v1 = vcombine.low %v468_v51, %v468_v51 }
  0x55   :  { %v1075_v49 = vshrl.u32 %v2907_v45, 16  ;;  %v1078_v50 = vshll.u32 %v2907_v45, 16  ;;  %v639_v52 = vrot.slane %v638_v46, 4  ;;  %v1063_v53 = vrot.slane %v1061_v36, 4 }
  0x56   :  { %v1066_v54 = vrot.slane %v1064_v47, 5  ;;  %v1084_v55 = vshll.u32 %v2908_v19, 16  ;;  %v630_v58 = vsel %vm3761_vm15, %v625_v24, %v629_v32  ;;  %v1072_v59 = vrot.slane %v1070_v48, 5 }
  0x57   :  { %v1077_v61 = vrot.slane %v1075_v49, 4  ;;  %v1080_v62 = vrot.slane %v1078_v50, 5  ;;  %v644_v56 = vsel %vm3761_vm15, %v639_v52, %v643_v37  ;;  %v2838_v9 = vcombine.high %v468_v51, %v468_v51 }
  0x58   :  { %v1067_v63 = vor.u32 %v1066_v54, %v1063_v53  ;;  %v1086_v0 = vrot.slane %v1084_v55, 5  ;;  %v3075_v3 = vcombine.low %v630_v58, %v644_v56  ;;  %v2839_v10 = vcombine.low %v469_v57, %v469_v57  ;;  %v971_v53 = vld [vmem:[#allocation2 + $0x40] sm:$0x1f] }
  0x59   :  { %v1081_v6 = vor.u32 %v1080_v62, %v1077_v61  ;;  %v2840_v4 = vcombine.high %v469_v57, %v469_v57  ;;  %v646_v13 = vshrl.u32 %v2837_v1, 16  ;;  %v649_v14 = vshll.u32 %v2837_v1, 16 }
  0x5a   :  { %v1068_v12 = vrot.slane %v1067_v63, 4  ;;  %2009 = vrot.lane.b32.xlu1 %v3075_v3, %s3513_s24  ;;  %v655_v16 = vshll.u32 %v2838_v9, 16  ;;  %v660_v17 = vshrl.u32 %v2839_v10, 16  ;;  %v663_v18 = vshll.u32 %v2839_v10, 16 }
  0x5b   :  { %v1082_v15 = vrot.slane %v1081_v6, 4  ;;  %v648_v22 = vrot.slane %v646_v13, 4  ;;  %v651_v60 = vrot.slane %v649_v14, 5  ;;  %v669_v23 = vshll.u32 %v2840_v4, 16 }
  0x5c   :  { %v1073_v21 = vsel %vm3761_vm15, %v1068_v12, %v1072_v59  ;;  %v657_v27 = vrot.slane %v655_v16, 5  ;;  %v662_v28 = vrot.slane %v660_v17, 4  ;;  %v665_v29 = vrot.slane %v663_v18, 5  ;;  %v968_v59 = vld [vmem:[#allocation2 + $0x28] sm:$0x1f] }
  0x5d   :  { %v1087_v26 = vsel %vm3761_vm15, %v1082_v15, %v1086_v0  ;;  %v652_v33 = vor.u32 %v651_v60, %v648_v22  ;;  %v671_v34 = vrot.slane %v669_v23, 5  ;;  %v2985_v35 = vcombine.low %v1461_v20, %v1461_v20  ;;  %v969_v17 = vld [vmem:[#allocation2 + $0x30] sm:$0x1f] }
  0x5e   :  { %v3097_v32 = vcombine.low %v1073_v21, %v1087_v26  ;;  %v666_v37 = vor.u32 %v665_v29, %v662_v28  ;;  %v2986_v38 = vcombine.high %v1461_v20, %v1461_v20  ;;  %v2987_v40 = vcombine.low %v1462_v25, %v1462_v25 }
  0x5f   :  { %v2988_v41 = vcombine.high %v1462_v25, %v1462_v25  ;;  %v653_v42 = vrot.slane %v652_v33, 4  ;;  %v1558_v45 = vshrl.u32 %v2985_v35, 16  ;;  %v1561_v46 = vshll.u32 %v2985_v35, 16 }
  0x60   :  { %2141 = vrot.lane.b32.xlu0 %v3097_v32, %s3511_s22  ;;  %v2917_v19 = vcombine.low %v970_v30, %v970_v30  ;;  %v667_v36 = vrot.slane %v666_v37, 4  ;;  %v1567_v47 = vshll.u32 %v2986_v38, 16  ;;  %v1572_v24 = vshrl.u32 %v2987_v40, 16 }
  0x61   :  { %v1575_v48 = vshll.u32 %v2987_v40, 16  ;;  %v658_v49 = vsel %vm3761_vm15, %v653_v42, %v657_v27  ;;  %v1560_v50 = vrot.slane %v1558_v45, 4  ;;  %v1563_v51 = vrot.slane %v1561_v46, 5  ;;  %v1290_v42 = vld [vmem:[#allocation2 + $0x38] sm:$0x1e] }
  0x62   :  { %v1581_v52 = vshll.u32 %v2988_v41, 16  ;;  %v672_v54 = vsel %vm3761_vm15, %v667_v36, %v671_v34  ;;  %v1569_v55 = vrot.slane %v1567_v47, 5  ;;  %v1574_v57 = vrot.slane %v1572_v24, 4  ;;  %v1291_v47 = vld [vmem:[#allocation2 + $0x40] sm:$0x1e] }
  0x63   :  { %v1577_v58 = vrot.slane %v1575_v48, 5  ;;  %v3076_v61 = vcombine.low %v658_v49, %v672_v54  ;;  %v1564_v62 = vor.u32 %v1563_v51, %v1560_v50  ;;  %v2918_v63 = vcombine.high %v970_v30, %v970_v30  ;;  %v1288_v51 = vld [vmem:[#allocation2 + $0x28] sm:$0x1e] }
  0x64   :  { %v1583_v56 = vrot.slane %v1581_v52, 5  ;;  %v2919_v1 = vcombine.low %v971_v53, %v971_v53  ;;  %v2920_v3 = vcombine.high %v971_v53, %v971_v53  ;;  %v1145_v6 = vshrl.u32 %v2917_v19, 16 }
  0x65   :  { %v1578_v0 = vor.u32 %v1577_v58, %v1574_v57  ;;  %2011 = vrot.lane.b32.xlu1 %v3076_v61, %s3513_s24  ;;  %v1565_v9 = vrot.slane %v1564_v62, 4  ;;  %v1148_v10 = vshll.u32 %v2917_v19, 16  ;;  %v1154_v12 = vshll.u32 %v2918_v63, 16  ;;  %v1289_v62 = vld [vmem:[#allocation2 + $0x30] sm:$0x1e] }
  0x66   :  { %v2913_v4 = vcombine.low %v968_v59, %v968_v59  ;;  %v1147_v14 = vrot.slane %v1145_v6, 4  ;;  %v1159_v15 = vshrl.u32 %v2919_v1, 16  ;;  %v1162_v16 = vshll.u32 %v2919_v1, 16 }
  0x67   :  { %v1579_v13 = vrot.slane %v1578_v0, 4  ;;  %v1570_v18 = vsel %vm3761_vm15, %v1565_v9, %v1569_v55  ;;  %v1150_v20 = vrot.slane %v1148_v10, 5  ;;  %v1156_v21 = vrot.slane %v1154_v12, 5 }
  0x68   :  { %v1168_v22 = vshll.u32 %v2920_v3, 16  ;;  %v1161_v23 = vrot.slane %v1159_v15, 4  ;;  %v1164_v25 = vrot.slane %v1162_v16, 5  ;;  %v2914_v26 = vcombine.high %v968_v59, %v968_v59  ;;  %v170_v15 = vld [vmem:[#allocation2 + $0x48] sm:$0x1] }
  0x69   :  { %v1584_v60 = vsel %vm3761_vm15, %v1579_v13, %v1583_v56  ;;  %v1151_v28 = vor.u32 %v1150_v20, %v1147_v14  ;;  %v2915_v30 = vcombine.low %v969_v17, %v969_v17  ;;  %v2916_v33 = vcombine.high %v969_v17, %v969_v17  ;;  %v233_v16 = vld [vmem:[#allocation2 + $0x48] sm:$0x10] }
  0x6a   :  { %v3121_v27 = vcombine.low %v1570_v18, %v1584_v60  ;;  %v1170_v29 = vrot.slane %v1168_v22, 5  ;;  %v1165_v32 = vor.u32 %v1164_v25, %v1161_v23  ;;  %v1117_v34 = vshrl.u32 %v2913_v4, 16  ;;  %v1467_v22 = vld [vmem:[#allocation2 + $0x40] sm:$0x1f]  ;;  %v1465_v60 = vld [vmem:[#allocation2 + $0x30] sm:$0x1f] }
  0x6b   :  { %v1120_v35 = vshll.u32 %v2913_v4, 16  ;;  %v1152_v37 = vrot.slane %v1151_v28, 4  ;;  %v1126_v38 = vshll.u32 %v2914_v26, 16  ;;  %v1131_v40 = vshrl.u32 %v2915_v30, 16  ;;  %v1466_v28 = vld [vmem:[#allocation2 + $0x38] sm:$0x1f] }
  0x6c   :  { %2277 = vrot.lane.b32.xlu0 %v3121_v27, %s3512_s23  ;;  %v1134_v41 = vshll.u32 %v2915_v30, 16  ;;  %v1166_v45 = vrot.slane %v1165_v32, 4  ;;  %v1119_v46 = vrot.slane %v1117_v34, 4  ;;  %v1140_v36 = vshll.u32 %v2916_v33, 16 }
  0x6d   :  { %v1122_v19 = vrot.slane %v1120_v35, 5  ;;  %v1157_v24 = vsel %vm3761_vm15, %v1152_v37, %v1156_v21  ;;  %v1128_v48 = vrot.slane %v1126_v38, 5  ;;  %v1133_v49 = vrot.slane %v1131_v40, 4 }
  0x6e   :  { %v1136_v50 = vrot.slane %v1134_v41, 5  ;;  %v1171_v52 = vsel %vm3761_vm15, %v1166_v45, %v1170_v29  ;;  %v1142_v54 = vrot.slane %v1140_v36, 5  ;;  %v2949_v55 = vcombine.low %v1290_v42, %v1290_v42 }
  0x6f   :  { %v1123_v53 = vor.u32 %v1122_v19, %v1119_v46  ;;  %v3100_v57 = vcombine.low %v1157_v24, %v1171_v52  ;;  %v2950_v59 = vcombine.high %v1290_v42, %v1290_v42  ;;  %v2951_v61 = vcombine.low %v1291_v47, %v1291_v47  ;;  %v3369_v46 = vld [vmem:[#allocation2 + $0x30] ss:$8 sps:$4 sm:$0xff]  }
  0x70   :  { %v1137_v58 = vor.u32 %v1136_v50, %v1133_v49  ;;  %v2952_v63 = vcombine.high %v1291_v47, %v1291_v47  ;;  %v2975_v0 = vrot.slane %v2949_v55, 9  ;;  %v2945_v1 = vcombine.low %v1288_v51, %v1288_v51  ;;  %v173_v52 = vld [vmem:[#allocation2 + $0x50] sm:$0x1] }
  0x71   :  { %v1124_v56 = vrot.slane %v1123_v53, 4  ;;  %2147 = vrot.lane.b32.xlu1 %v3100_v57, %s3511_s22  ;;  %v1406_v6 = vrot.slane %v2950_v59, 5  ;;  %v2976_v9 = vrot.slane %v2951_v61, 9  ;;  %v2946_v10 = vcombine.high %v1288_v51, %v1288_v51 }
  0x72   :  { %v1138_v3 = vrot.slane %v1137_v58, 4  ;;  %v1410_v4 = vrot.slane %v2952_v63, 5  ;;  %v2947_v13 = vcombine.low %v1289_v62, %v1289_v62  ;;  %v2948_v14 = vcombine.high %v1289_v62, %v1289_v62  ;;  %v1785_v58 = vld [vmem:[#allocation2 + $0x30] sm:$0x1e] }
  0x73   :  { %v1129_v12 = vsel %vm3761_vm15, %v1124_v56, %v1128_v48  ;;  %v1407_v18 = vsel %vm3695_vm12, %v2975_v0, %v1406_v6  ;;  %v2973_v20 = vrot.slane %v2945_v1, 9  ;;  %v1398_v21 = vrot.slane %v2946_v10, 5  ;;  %v236_v6 = vld [vmem:[#allocation2 + $0x50] sm:$0x10] }
  0x74   :  { %v1143_v17 = vsel %vm3761_vm15, %v1138_v3, %v1142_v54  ;;  %v1411_v25 = vsel %vm3695_vm12, %v2976_v9, %v1410_v4  ;;  %v2974_v26 = vrot.slane %v2947_v13, 9  ;;  %v1402_v27 = vrot.slane %v2948_v14, 5 }
  0x75   :  { %v3099_v23 = vcombine.low %v1129_v12, %v1143_v17  ;;  %v3108_v29 = vcombine.low %v1407_v18, %v1411_v25  ;;  %v1399_v30 = vsel %vm3695_vm12, %v2973_v20, %v1398_v21  ;;  %v171_v32 = vsel %vm3563_vm3, 0, %v170_v15  ;;  %v239_v20 = vld [vmem:[#allocation2 + $0x58] sm:$0x10] }
  0x76   :  { %v234_v33 = vsel %vm3576_vm5, 0, %v233_v16  ;;  %v1403_v34 = vsel %vm3695_vm12, %v2974_v26, %v1402_v27  ;;  %172 = vst [vmem:[#allocation2 + $0x48] sm:$0x1] %v171_v32  ;;  %v2997_v35 = vcombine.low %v1467_v22, %v1467_v22  ;;  %v2998_v37 = vcombine.high %v1467_v22, %v1467_v22 }
  0x77   :  { %2145 = vrot.lane.b32.xlu0 %v3099_v23, %s3511_s22  ;;  %235 = vst [vmem:[#allocation2 + $0x48] sm:$0x10] %v234_v33  ;;  %v2993_v38 = vcombine.low %v1465_v60, %v1465_v60  ;;  %2187 = vrot.lane.b32.xlu1 %v3108_v29, %s3508_s19  ;;  %v3107_v40 = vcombine.low %v1399_v30, %v1403_v34  ;;  %v110_v1 = vmax.f32 %v3688_v2, 0.0  ;;  %v174_v3 = vsel %vm3563_vm3, 0, %v173_v52 }
  0x78   :  { %v2994_v41 = vcombine.high %v1465_v60, %v1465_v60  ;;  %v2995_v42 = vcombine.low %v1466_v28, %v1466_v28  ;;  %v2996_v45 = vcombine.high %v1466_v28, %v1466_v28  ;;  %v1642_v19 = vshrl.u32 %v2997_v35, 16  ;;  %175 = vst [vmem:[#allocation2 + $0x50] sm:$0x1] %v174_v3  ;;  %v1786_v28 = vld [vmem:[#allocation2 + $0x38] sm:$0x1e] }
  0x79   :  { %v1645_v36 = vshll.u32 %v2997_v35, 16  ;;  %v1651_v47 = vshll.u32 %v2998_v37, 16  ;;  %v1614_v24 = vshrl.u32 %v2993_v38, 16  ;;  %v1617_v48 = vshll.u32 %v2993_v38, 16 }
  0x7a   :  { %v1623_v49 = vshll.u32 %v2994_v41, 16  ;;  %v1628_v50 = vshrl.u32 %v2995_v42, 16  ;;  %v1631_v51 = vshll.u32 %v2995_v42, 16  ;;  %v1644_v53 = vrot.slane %v1642_v19, 4  ;;  %v182_v19 = vld [vmem:[#allocation2 + $0x68] sm:$0x1] }
  0x7b   :  { %2185 = vrot.lane.b32.xlu0 %v3107_v40, %s3508_s19  ;;  %v1647_v54 = vrot.slane %v1645_v36, 5  ;;  %v1653_v55 = vrot.slane %v1651_v47, 5  ;;  %v1616_v57 = vrot.slane %v1614_v24, 4  ;;  %v1619_v59 = vrot.slane %v1617_v48, 5  ;;  %v179_v40 = vld [vmem:[#allocation2 + $0x60] sm:$0x1] }
  0x7c   :  { %v1625_v61 = vrot.slane %v1623_v49, 5  ;;  %v1630_v62 = vrot.slane %v1628_v50, 4  ;;  %v1633_v56 = vrot.slane %v1631_v51, 5  ;;  %v1637_v0 = vshll.u32 %v2996_v45, 16  ;;  %v242_v36 = vld [vmem:[#allocation2 + $0x60] sm:$0x10] }
  0x7d   :  { %v1648_v63 = vor.u32 %v1647_v54, %v1644_v53  ;;  %v3368_v9 = vld [vmem:[#allocation2 + $0x40] ss:$8 sps:$4 sm:$0xff]   ;;  %v1620_v12 = vor.u32 %v1619_v59, %v1616_v57  ;;  %v3025_v13 = vcombine.low %v1785_v58, %v1785_v58  ;;  %v3026_v14 = vcombine.high %v1785_v58, %v1785_v58  ;;  %v245_v59 = vld [vmem:[#allocation2 + $0x68] sm:$0x10] }
  0x7e   :  { %v1468_v10 = vld [vmem:[#allocation2 + $0x48] sm:$0x1f]  ;;  %v1634_v4 = vor.u32 %v1633_v56, %v1630_v62  ;;  %v1639_v18 = vrot.slane %v1637_v0, 5  ;;  %2243 = vrot.lane.b32.xlu1 %v3368_v9, %s3507_s18  ;;  %v126_v22 = vpack.c.bf16 %v110_v1, %v110_v1  ;;  %v237_v60 = vsel %vm3576_vm5, 0, %v236_v6  ;;  %v1787_v6 = vld [vmem:[#allocation2 + $0x40] sm:$0x1e] }
  0x7f   :  { %2241 = vrot.lane.b32.xlu0 %v3369_v46, %s3507_s18  ;;  %v2999_v15 = vcombine.low %v1468_v10, %v1468_v10  ;;  %v3000_v16 = vcombine.high %v1468_v10, %v1468_v10  ;;  %v1649_v17 = vrot.slane %v1648_v63, 4  ;;  %v1621_v2 = vrot.slane %v1620_v12, 4  ;;  %238 = vst [vmem:[#allocation2 + $0x50] sm:$0x10] %v237_v60  ;;  %v1788_v9 = vld [vmem:[#allocation2 + $0x48] sm:$0x1e] }
  0x80   :  { %v1635_v21 = vrot.slane %v1634_v4, 4  ;;  %v240_v32 = vsel %vm3576_vm5, 0, %v239_v20  ;;  %v323_v33 = vshrl.u32 %v126_v22, 16  ;;  %v326_v42 = vshll.u32 %v126_v22, 16 }
  0x81   :  { %v3840_v23 = vsel %vm3761_vm15, %v1649_v17, %v1653_v55  ;;  %v1656_v25 = vshrl.u32 %v2999_v15, 16  ;;  %v1659_v26 = vshll.u32 %v2999_v15, 16  ;;  %v1665_v27 = vshll.u32 %v3000_v16, 16  ;;  %241 = vst [vmem:[#allocation2 + $0x58] sm:$0x10] %v240_v32 }
  0x82   :  { %v1626_v29 = vsel %vm3761_vm15, %v1621_v2, %v1625_v61  ;;  %v1640_v30 = vsel %vm3761_vm15, %v1635_v21, %v1639_v18  ;;  %v325_v41 = vrot.slane %v323_v33, 7  ;;  %v3027_v45 = vcombine.low %v1786_v28, %v1786_v28 }
  0x83   :  { %v1658_v34 = vrot.slane %v1656_v25, 4  ;;  %v1661_v35 = vrot.slane %v1659_v26, 5  ;;  %v1667_v37 = vrot.slane %v1665_v27, 5  ;;  %v3123_v38 = vcombine.low %v1626_v29, %v1640_v30  ;;  %v185_v29 = vld [vmem:[#allocation2 + $0x70] sm:$0x1]  ;;  %v3491_v30 = vld [vmem:[%s4473_s3 + $0x8] sm:$0xff]  }
  0x84   :  { %v3028_v46 = vcombine.high %v1786_v28, %v1786_v28  ;;  %v3053_v24 = vrot.slane %v3025_v13, 9  ;;  %v1895_v48 = vrot.slane %v3026_v14, 5  ;;  %v111_v49 = vmax.f32 %v3691_v31, 0.0 }
  0x85   :  { %v1662_v47 = vor.u32 %v1661_v35, %v1658_v34  ;;  %2281 = vrot.lane.b32.xlu0 %v3123_v38, %s3512_s23  ;;  %v328_v50 = vor.u32 %v326_v42, %v325_v41  ;;  %v3054_v51 = vrot.slane %v3027_v45, 9  ;;  %v112_v53 = vmax.f32 %v3700_v43, 0.0 }
  0x86   :  { %v1899_v52 = vrot.slane %v3028_v46, 5  ;;  %v1896_v55 = vsel %vm3695_vm12, %v3053_v24, %v1895_v48  ;;  %v127_v57 = vpack.c.bf16 %v111_v49, %v111_v49  ;;  %v180_v58 = vsel %vm3563_vm3, 0, %v179_v40  ;;  %v470_v61 = vld [vmem:[#allocation2 + $0x50] sm:$0x1f] }
  0x87   :  { %v1663_v54 = vrot.slane %v1662_v47, 4  ;;  %v128_v56 = vpack.c.bf16 %v112_v53, %v112_v53  ;;  %181 = vst [vmem:[#allocation2 + $0x60] sm:$0x1] %v180_v58  ;;  %v183_v31 = vsel %vm3563_vm3, 0, %v182_v19  ;;  %v243_v43 = vsel %vm3576_vm5, 0, %v242_v36  ;;  %v3493_v24 = vld [vmem:[%s4473_s3 + $0x10] sm:$0xff]  }
  0x88   :  { %v1900_v62 = vsel %vm3695_vm12, %v3054_v51, %v1899_v52  ;;  %v2841_v0 = vcombine.low %v470_v61, %v470_v61  ;;  %v2842_v1 = vcombine.high %v470_v61, %v470_v61  ;;  %184 = vst [vmem:[#allocation2 + $0x68] sm:$0x1] %v183_v31  ;;  %244 = vst [vmem:[#allocation2 + $0x60] sm:$0x10] %v243_v43  ;;  %v422_v12 = vld [vmem:[#allocation2 + $0x58] sm:$0x1f] }
  0x89   :  { %v1668_v63 = vsel %vm3761_vm15, %v1663_v54, %v1667_v37  ;;  %v3131_v3 = vcombine.low %v1896_v55, %v1900_v62  ;;  %v246_v4 = vsel %vm3576_vm5, 0, %v245_v59  ;;  %v330_v13 = vshrl.u32 %v127_v57, 16  ;;  %v793_v20 = vld [vmem:[#allocation2 + $0x50] sm:$0x1e] }
  0x8a   :  { %v3124_v10 = vcombine.low %v3840_v23, %v1668_v63  ;;  %v333_v14 = vshll.u32 %v127_v57, 16  ;;  %v423_v15 = vsel %vm3627_vm8, %v328_v50, %v422_v12  ;;  %v674_v16 = vshrl.u32 %v2841_v0, 16  ;;  %247 = vst [vmem:[#allocation2 + $0x68] sm:$0x10] %v246_v4  ;;  %v3490_v23 = vld [vmem:[%s4473_s3] sm:$0xff]  }
  0x8b   :  { %v677_v17 = vshll.u32 %v2841_v0, 16  ;;  %v683_v18 = vshll.u32 %v2842_v1, 16  ;;  %2321 = vrot.lane.b32.xlu0 %v3131_v3, %s3510_s21  ;;  %424 = vst [vmem:[#allocation2 + $0x58] sm:$0x1f] %v423_v15  ;;  %v332_v2 = vrot.slane %v330_v13, 7  ;;  %v337_v21 = vshrl.u32 %v128_v56, 16  ;;  %3235 = vmatprep.subr.bf16.mxu0 %v3490_v23 }
  0x8c   :  { %2283 = vrot.lane.b32.xlu1 %v3124_v10, %s3512_s23  ;;  %v340_v22 = vshll.u32 %v128_v56, 16  ;;  %v3029_v60 = vcombine.low %v1787_v6, %v1787_v6  ;;  %v676_v25 = vrot.slane %v674_v16, 4  ;;  %v3030_v28 = vcombine.high %v1787_v6, %v1787_v6  ;;  %v248_v37 = vld [vmem:[#allocation2 + $0x70] sm:$0x10]  ;;  %3261 = vmatprep.subr.bf16.mxu1 %v3490_v23  ;;  %v3495_v3 = vld [vmem:[%s4473_s3 + $0x18] sm:$0xff]  }
  0x8d   :  { %v679_v26 = vrot.slane %v677_v17, 5  ;;  %v685_v27 = vrot.slane %v683_v18, 5  ;;  %v335_v32 = vor.u32 %v333_v14, %v332_v2  ;;  %v339_v33 = vrot.slane %v337_v21, 7  ;;  %3236 = vmatpush3.bf16.msra.mxu0 %v3490_v23  ;;  %3266 = vmatpush3.bf16.msra.mxu1 %v3490_v23 }
  0x8e   :  { %v3031_v34 = vcombine.low %v1788_v9, %v1788_v9  ;;  %v3032_v35 = vcombine.high %v1788_v9, %v1788_v9  ;;  %v3055_v40 = vrot.slane %v3029_v60, 9  ;;  %v1903_v41 = vrot.slane %v3030_v28, 5  ;;  %3237 = vmatprep.subr.bf16.mxu0 %v3491_v30  ;;  %3262 = vmatprep.subr.bf16.mxu1 %v3491_v30 }
  0x8f   :  { %v680_v38 = vor.u32 %v679_v26, %v676_v25  ;;  %v2873_v42 = vcombine.low %v793_v20, %v793_v20  ;;  %v342_v45 = vor.u32 %v340_v22, %v339_v33  ;;  %v425_v46 = vld [vmem:[#allocation2 + $0x60] sm:$0x1f]  ;;  %v2874_v47 = vcombine.high %v793_v20, %v793_v20 }
  0x90   :  { %v3056_v19 = vrot.slane %v3031_v34, 9  ;;  %v1907_v36 = vrot.slane %v3032_v35, 5  ;;  %v426_v49 = vsel %vm3627_vm8, %v335_v32, %v425_v46  ;;  %v1904_v50 = vsel %vm3695_vm12, %v3055_v40, %v1903_v41 }
  0x91   :  { %v681_v48 = vrot.slane %v680_v38, 4  ;;  %v3883_v51 = vrot.slane %v2873_v42, 9  ;;  %427 = vst [vmem:[#allocation2 + $0x60] sm:$0x1f] %v426_v49  ;;  %v428_v52 = vld [vmem:[#allocation2 + $0x68] sm:$0x1f]  ;;  %3238 = vmatpush3.bf16.msra.mxu0 %v3491_v30  ;;  %3267 = vmatpush3.bf16.msra.mxu1 %v3491_v30 }
  0x92   :  { %v1908_v53 = vsel %vm3695_vm12, %v3056_v19, %v1907_v36  ;;  %v918_v54 = vrot.slane %v2874_v47, 5  ;;  %v113_v55 = vmax.f32 %v3703_v44, 0.0  ;;  %v186_v57 = vsel %vm3563_vm3, 0, %v185_v29  ;;  %v471_v58 = vld [vmem:[#allocation2 + $0x58] sm:$0x1f]  ;;  %3239 = vmatprep.subr.bf16.mxu0 %v3493_v24  ;;  %3263 = vmatprep.subr.bf16.mxu1 %v3493_v24 }
  0x93   :  { %v3892_v59 = vsel %vm3761_vm15, %v681_v48, %v685_v27  ;;  %v429_v61 = vsel %vm3627_vm8, %v342_v45, %v428_v52  ;;  %v3132_v62 = vcombine.low %v1904_v50, %v1908_v53  ;;  %v794_v56 = vld [vmem:[#allocation2 + $0x58] sm:$0x1e]  ;;  %187 = vst [vmem:[#allocation2 + $0x70] sm:$0x1] %v186_v57  ;;  %v249_v31 = vsel %vm3576_vm5, 0, %v248_v37 }
  0x94   :  { %v2843_v44 = vcombine.low %v471_v58, %v471_v58  ;;  %v2844_v43 = vcombine.high %v471_v58, %v471_v58  ;;  %430 = vst [vmem:[#allocation2 + $0x68] sm:$0x1f] %v429_v61  ;;  %v2875_v63 = vcombine.low %v794_v56, %v794_v56  ;;  %v2876_v0 = vcombine.high %v794_v56, %v794_v56  ;;  %v3898_v1 = vld [vmem:[#allocation2 + $0x58] sm:$0x1f] }
  0x95   :  { %250 = vst [vmem:[#allocation2 + $0x70] sm:$0x10] %v249_v31  ;;  %2323 = vrot.lane.b32.xlu0 %v3132_v62, %s3510_s21  ;;  %v919_v6 = vsel %vm3695_vm12, %v3883_v51, %v918_v54  ;;  %v129_v9 = vpack.c.bf16 %v113_v55, %v113_v55  ;;  %v3909_v10 = vcombine.low %v3898_v1, %v3898_v1  ;;  %v3913_v16 = vld [vmem:[#allocation2 + $0x58] sm:$0x1e]  ;;  %vm2357_vm1 = vcmask 130048  }
  0x96   :  { %v2922_v12 = vcombine.high %v3898_v1, %v3898_v1  ;;  %v688_v4 = vshrl.u32 %v2843_v44, 16  ;;  %v691_v13 = vshll.u32 %v2843_v44, 16  ;;  %v697_v14 = vshll.u32 %v2844_v43, 16  ;;  %3240 = vmatpush3.bf16.msra.mxu0 %v3493_v24  ;;  %3268 = vmatpush3.bf16.msra.mxu1 %v3493_v24  ;;  %v3220_v1 = vld [vmem:[%s4470_s0 + $0x30] sm:$0xff]  }
  0x97   :  { %v2898_v15 = vrot.slane %v2875_v63, 9  ;;  %v922_v17 = vrot.slane %v2876_v0, 5  ;;  %v344_v18 = vshrl.u32 %v129_v9, 16  ;;  %v347_v20 = vshll.u32 %v129_v9, 16  ;;  %3241 = vmatprep.subr.bf16.mxu0 %v3495_v3  ;;  %3264 = vmatprep.subr.bf16.mxu1 %v3495_v3 }
  0x98   :  { %v1173_v2 = vshrl.u32 %v3909_v10, 16  ;;  %v690_v21 = vrot.slane %v688_v4, 4  ;;  %v693_v22 = vrot.slane %v691_v13, 5  ;;  %v699_v60 = vrot.slane %v697_v14, 5  ;;  %v472_v25 = vld [vmem:[#allocation2 + $0x60] sm:$0x1f] }
  0x99   :  { %v1176_v23 = vshll.u32 %v3909_v10, 16  ;;  %v795_v26 = vld [vmem:[#allocation2 + $0x60] sm:$0x1e]  ;;  %v923_v27 = vsel %vm3695_vm12, %v2898_v15, %v922_v17  ;;  %v346_v28 = vrot.slane %v344_v18, 7  ;;  %v2953_v30 = vcombine.low %v3913_v16, %v3913_v16 }
  0x9a   :  { %v3919_v29 = vrot.slane %v1173_v2, 4  ;;  %v694_v32 = vor.u32 %v693_v22, %v690_v21  ;;  %v2845_v33 = vcombine.low %v472_v25, %v472_v25  ;;  %v2846_v34 = vcombine.high %v472_v25, %v472_v25  ;;  %v3923_v37 = vld [vmem:[#allocation2 + $0x60] sm:$0x1f]  ;;  %3242 = vmatpush3.bf16.msra.mxu0 %v3495_v3  ;;  %3269 = vmatpush3.bf16.msra.mxu1 %v3495_v3 }
  0x9b   :  { %v2877_v35 = vcombine.low %v795_v26, %v795_v26  ;;  %v473_v38 = vld [vmem:[#allocation2 + $0x68] sm:$0x1f]  ;;  %v2878_v41 = vcombine.high %v795_v26, %v795_v26  ;;  %v3085_v42 = vcombine.low %v919_v6, %v923_v27  ;;  %v349_v45 = vor.u32 %v347_v20, %v346_v28  ;;  %v3403_v48 = vld [vmem:[#allocation2 + $0x58] ss:$8 sps:$4 sm:$0xff]  }
  0x9c   :  { %v796_v40 = vld [vmem:[#allocation2 + $0x68] sm:$0x1e]  ;;  %v3927_v46 = vcombine.low %v3923_v37, %v3923_v37  ;;  %v695_v19 = vrot.slane %v694_v32, 4  ;;  %v2847_v36 = vcombine.low %v473_v38, %v473_v38  ;;  %v2848_v47 = vcombine.high %v473_v38, %v473_v38  ;;  %v431_v53 = vld [vmem:[#allocation2 + $0x70] sm:$0x1f] }
  0x9d   :  { %v702_v24 = vshrl.u32 %v2845_v33, 16  ;;  %v705_v49 = vshll.u32 %v2845_v33, 16  ;;  %v711_v50 = vshll.u32 %v2846_v34, 16  ;;  %v2879_v51 = vcombine.low %v796_v40, %v796_v40  ;;  %2053 = vrot.lane.b32.xlu0 %v3085_v42, %s3509_s20  ;;  %v974_v54 = vld [vmem:[#allocation2 + $0x68] sm:$0x1f]  ;;  %v3950_v34 = vpop.permute.xlu0 %2101 }
  0x9e   :  { %v2880_v52 = vcombine.high %v796_v40, %v796_v40  ;;  %v700_v55 = vsel %vm3761_vm15, %v695_v19, %v699_v60  ;;  %v716_v58 = vshrl.u32 %v2847_v36, 16  ;;  %v719_v61 = vshll.u32 %v2847_v36, 16 }
  0x9f   :  { %v704_v57 = vrot.slane %v702_v24, 4  ;;  %v3077_v62 = vcombine.low %v3892_v59, %v700_v55  ;;  %v707_v56 = vrot.slane %v705_v49, 5  ;;  %v713_v31 = vrot.slane %v711_v50, 5 }
  0xa0   :  { %v725_v44 = vshll.u32 %v2848_v47, 16  ;;  %v718_v43 = vrot.slane %v716_v58, 4  ;;  %v721_v63 = vrot.slane %v719_v61, 5  ;;  %v2899_v0 = vrot.slane %v2877_v35, 9 }
  0xa1   :  { %v926_v3 = vrot.slane %v2878_v41, 5  ;;  %2013 = vrot.lane.b32.xlu1 %v3077_v62, %s3513_s24  ;;  %v708_v6 = vor.u32 %v707_v56, %v704_v57  ;;  %v2900_v4 = vrot.slane %v2879_v51, 9  ;;  %v930_v13 = vrot.slane %v2880_v52, 5  ;;  %2109 = vrot.lane.b32.xlu0 %v3403_v48, %s3506_s17  ;;  %v1294_v41 = vld [vmem:[#allocation2 + $0x68] sm:$0x1e]  ;;  %v3965_v56 = vpop.permute.xlu0 %2237 }
  0xa2   :  { %v727_v9 = vrot.slane %v725_v44, 5  ;;  %v722_v14 = vor.u32 %v721_v63, %v718_v43  ;;  %v432_v59 = vsel %vm3627_vm8, %v349_v45, %v431_v53  ;;  %v2925_v17 = vcombine.low %v974_v54, %v974_v54 }
  0xa3   :  { %v927_v15 = vsel %vm3695_vm12, %v2899_v0, %v926_v3  ;;  %v709_v18 = vrot.slane %v708_v6, 4  ;;  %v931_v20 = vsel %vm3695_vm12, %v2900_v4, %v930_v13  ;;  %433 = vst [vmem:[#allocation2 + $0x70] sm:$0x1f] %v432_v59  ;;  %v2926_v2 = vcombine.high %v974_v54, %v974_v54 }
  0xa4   :  { %v2924_v21 = vcombine.high %v3923_v37, %v3923_v37  ;;  %v723_v22 = vrot.slane %v722_v14, 4  ;;  %v3086_v60 = vcombine.low %v927_v15, %v931_v20  ;;  %v1201_v25 = vshrl.u32 %v2925_v17, 16 }
  0xa5   :  { %v1204_v26 = vshll.u32 %v2925_v17, 16  ;;  %v714_v27 = vsel %vm3761_vm15, %v709_v18, %v713_v31  ;;  %v1210_v28 = vshll.u32 %v2926_v2, 16  ;;  %v1178_v32 = vrot.slane %v1176_v23, 5  ;;  %v1293_v23 = vld [vmem:[#allocation2 + $0x60] sm:$0x1e] }
  0xa6   :  { %v1182_v33 = vshll.u32 %v2922_v12, 16  ;;  %v728_v35 = vsel %vm3761_vm15, %v723_v22, %v727_v9  ;;  %v1203_v37 = vrot.slane %v1201_v25, 4  ;;  %v1187_v40 = vshrl.u32 %v3927_v46, 16 }
  0xa7   :  { %v1206_v38 = vrot.slane %v1204_v26, 5  ;;  %v3078_v42 = vcombine.low %v714_v27, %v728_v35  ;;  %v1212_v45 = vrot.slane %v1210_v28, 5  ;;  %v1179_v19 = vor.u32 %v1178_v32, %v3919_v29  ;;  %v251_v35 = vld [vmem:[#allocation2 + $0x78] sm:$0x10] }
  0xa8   :  { %v1184_v10 = vrot.slane %v1182_v33, 5  ;;  %v1189_v36 = vrot.slane %v1187_v40, 4  ;;  %v1190_v47 = vshll.u32 %v3927_v46, 16  ;;  %v1196_v24 = vshll.u32 %v2924_v21, 16  ;;  %v188_v33 = vld [vmem:[#allocation2 + $0x78] sm:$0x1] }
  0xa9   :  { %v1207_v12 = vor.u32 %v1206_v38, %v1203_v37  ;;  %2015 = vrot.lane.b32.xlu1 %v3078_v42, %s3513_s24  ;;  %v1180_v48 = vrot.slane %v1179_v19, 4  ;;  %v2957_v49 = vcombine.low %v1294_v41, %v1294_v41  ;;  %v2958_v50 = vcombine.high %v1294_v41, %v1294_v41  ;;  %v3978_v37 = vpop.permute.xlu0 %2105 }
  0xaa   :  { %v2954_v51 = vcombine.high %v3913_v16, %v3913_v16  ;;  %v975_v29 = vld [vmem:[#allocation2 + $0x70] sm:$0x1f]  ;;  %v2955_v52 = vcombine.low %v1293_v23, %v1293_v23  ;;  %v2956_v53 = vcombine.high %v1293_v23, %v1293_v23  ;;  %v3209_v54 = vunpack.c.l.bf16 %v3220_v1 }
  0xab   :  { %v3210_v55 = vunpack.c.h.bf16 %v3220_v1  ;;  %v2927_v57 = vcombine.low %v975_v29, %v975_v29  ;;  %v2928_v58 = vcombine.high %v975_v29, %v975_v29  ;;  %v1208_v61 = vrot.slane %v1207_v12, 4  ;;  %v1295_v62 = vld [vmem:[#allocation2 + $0x70] sm:$0x1e]  ;;  %v1470_v12 = vld [vmem:[#allocation2 + $0x68] sm:$0x1f] }
  0xac   :  { %v1185_v46 = vsel %vm3761_vm15, %v1180_v48, %v1184_v10  ;;  %v1192_v31 = vrot.slane %v1190_v47, 5  ;;  %v1198_v44 = vrot.slane %v1196_v24, 5  ;;  %v2959_v43 = vcombine.low %v1295_v62, %v1295_v62  ;;  %v3402_v0 = vld [vmem:[#allocation2 + $0x68] ss:$8 sps:$4 sm:$0xff]   ;;  %v3998_v47 = vld [vmem:[%s4472_s2] ss:$0 sm:$0xff] }
  0xad   :  { %v2960_v63 = vcombine.high %v1295_v62, %v1295_v62  ;;  %2055 = vrot.lane.b32.xlu1 %v3086_v60, %s3509_s20  ;;  %v1213_v3 = vsel %vm3761_vm15, %v1208_v61, %v1212_v45  ;;  %v1215_v6 = vshrl.u32 %v2927_v57, 16  ;;  %v1218_v9 = vshll.u32 %v2927_v57, 16  ;;  %v1471_v42 = vld [vmem:[#allocation2 + $0x70] sm:$0x1f]  ;;  %v1469_v45 = vld [vmem:[#allocation2 + $0x60] sm:$0x1f] }
  0xae   :  { %v1224_v4 = vshll.u32 %v2928_v58, 16  ;;  %v1193_v13 = vor.u32 %v1192_v31, %v1189_v36  ;;  %v2979_v14 = vrot.slane %v2957_v49, 9  ;;  %v1422_v15 = vrot.slane %v2958_v50, 5  ;;  %v4008_v31 = vpop.permute.xlu0 %2181 }
  0xaf   :  { %v2980_v59 = vrot.slane %v2959_v43, 9  ;;  %v1217_v17 = vrot.slane %v1215_v6, 4  ;;  %v1220_v18 = vrot.slane %v1218_v9, 5  ;;  %v1426_v2 = vrot.slane %v2960_v63, 5  ;;  %v3421_v43 = vld [vmem:[#allocation2 + $0x60] ss:$8 sps:$4 sm:$0xff]  }
  0xb0   :  { %v1226_v20 = vrot.slane %v1224_v4, 5  ;;  %v1194_v21 = vrot.slane %v1193_v13, 4  ;;  %v1423_v22 = vsel %vm3695_vm12, %v2979_v14, %v1422_v15  ;;  %v2977_v60 = vrot.slane %v2953_v30, 9  ;;  %v3987_v30 = vld [vmem:[%s4471_s1] ss:$0 sm:$0xff] }
  0xb1   :  { %v1414_v25 = vrot.slane %v2954_v51, 5  ;;  %2111 = vrot.lane.b32.xlu1 %v3402_v0, %s3506_s17  ;;  %v1221_v26 = vor.u32 %v1220_v18, %v1217_v17  ;;  %v1427_v27 = vsel %vm3695_vm12, %v2980_v59, %v1426_v2  ;;  %v2978_v28 = vrot.slane %v2955_v52, 9  ;;  %v474_v14 = vld [vmem:[#allocation2 + $0x70] sm:$0x1f] }
  0xb2   :  { %v1418_v32 = vrot.slane %v2956_v53, 5  ;;  %v1199_v38 = vsel %vm3761_vm15, %v1194_v21, %v1198_v44  ;;  %v3110_v40 = vcombine.low %v1423_v22, %v1427_v27  ;;  %v76_v41 = vmul.f32 %v3987_v30, %v3209_v54 }
  0xb3   :  { %v1415_v16 = vsel %vm3695_vm12, %v2977_v60, %v1414_v25  ;;  %v1222_v19 = vrot.slane %v1221_v26, 4  ;;  %v3101_v10 = vcombine.low %v1185_v46, %v1199_v38  ;;  %v3993_v1 = vmul.f32 %v3987_v30, %v3210_v55  ;;  %v4012_v25 = vpop.permute.xlu1 %2103 }
  0xb4   :  { %v1419_v23 = vsel %vm3695_vm12, %v2978_v28, %v1418_v32  ;;  %v98_v24 = vadd.f32 %v3998_v47, %v76_v41  ;;  %v189_v48 = vsel %vm3563_vm3, 0, %v188_v33  ;;  %v252_v49 = vsel %vm3576_vm5, 0, %v251_v35 }
  0xb5   :  { %v3109_v36 = vcombine.low %v1415_v16, %v1419_v23  ;;  %v1227_v50 = vsel %vm3761_vm15, %v1222_v19, %v1226_v20  ;;  %2149 = vrot.lane.b32.xlu0 %v3101_v10, %s3511_s22  ;;  %190 = vst [vmem:[#allocation2 + $0x78] sm:$0x1] %v189_v48  ;;  %253 = vst [vmem:[#allocation2 + $0x78] sm:$0x10] %v252_v49  ;;  %v3005_v51 = vcombine.low %v1471_v42, %v1471_v42  ;;  %v1789_v20 = vld [vmem:[#allocation2 + $0x60] sm:$0x1e] }
  0xb6   :  { %v3006_v29 = vcombine.high %v1471_v42, %v1471_v42  ;;  %v3001_v52 = vcombine.low %v1469_v45, %v1469_v45  ;;  %v3102_v53 = vcombine.low %v1213_v3, %v1227_v50  ;;  %v114_v54 = vmax.f32 %v98_v24, 0.0  ;;  %v4016_v42 = vpop.permute.xlu0 %2317  ;;  %v4025_v49 = vld [vmem:[%s4470_s0 + $0x38] sm:$0xff]  }
  0xb7   :  { %v3002_v55 = vcombine.high %v1469_v45, %v1469_v45  ;;  %v3003_v57 = vcombine.low %v1470_v12, %v1470_v12  ;;  %v1698_v58 = vshrl.u32 %v3005_v51, 16  ;;  %v1701_v61 = vshll.u32 %v3005_v51, 16 }
  0xb8   :  { %v1707_v46 = vshll.u32 %v3006_v29, 16  ;;  %v3004_v62 = vcombine.high %v1470_v12, %v1470_v12  ;;  %2151 = vrot.lane.b32.xlu1 %v3102_v53, %s3511_s22  ;;  %v130_v44 = vpack.c.bf16 %v114_v54, %v114_v54  ;;  %v1670_v63 = vshrl.u32 %v3001_v52, 16  ;;  %v1790_v12 = vld [vmem:[#allocation2 + $0x68] sm:$0x1e] }
  0xb9   :  { %v1673_v0 = vshll.u32 %v3001_v52, 16  ;;  %v1679_v6 = vshll.u32 %v3002_v55, 16  ;;  %2189 = vrot.lane.b32.xlu0 %v3109_v36, %s3508_s19  ;;  %v1700_v9 = vrot.slane %v1698_v58, 4  ;;  %v1703_v3 = vrot.slane %v1701_v61, 5  ;;  %v4031_v58 = vpop.permute.xlu1 %2239 }
  0xba   :  { %v1709_v4 = vrot.slane %v1707_v46, 5  ;;  %v1684_v13 = vshrl.u32 %v3003_v57, 16  ;;  %v351_v15 = vshrl.u32 %v130_v44, 16  ;;  %v354_v59 = vshll.u32 %v130_v44, 16 }
  0xbb   :  { %v1672_v17 = vrot.slane %v1670_v63, 4  ;;  %v1675_v18 = vrot.slane %v1673_v0, 5  ;;  %v1704_v2 = vor.u32 %v1703_v3, %v1700_v9  ;;  %v1681_v21 = vrot.slane %v1679_v6, 5  ;;  %v194_v63 = vld [vmem:[#allocation2 + $0x88] sm:$0x1] }
  0xbc   :  { %v1686_v22 = vrot.slane %v1684_v13, 4  ;;  %v1687_v60 = vshll.u32 %v3003_v57, 16  ;;  %2191 = vrot.lane.b32.xlu1 %v3110_v40, %s3508_s19  ;;  %v353_v26 = vrot.slane %v351_v15, 7  ;;  %v1693_v28 = vshll.u32 %v3004_v62, 16  ;;  %v434_v33 = vld [vmem:[#allocation2 + $0x78] sm:$0x1f] }
  0xbd   :  { %v1676_v27 = vor.u32 %v1675_v18, %v1672_v17  ;;  %v2849_v32 = vcombine.low %v474_v14, %v474_v14  ;;  %2245 = vrot.lane.b32.xlu0 %v3421_v43, %s3507_s18  ;;  %v1705_v35 = vrot.slane %v1704_v2, 4  ;;  %v2850_v16 = vcombine.high %v474_v14, %v474_v14  ;;  %v191_v43 = vld [vmem:[#allocation2 + $0x80] sm:$0x1]  ;;  %v257_v13 = vld [vmem:[#allocation2 + $0x88] sm:$0x10]  ;;  %v4038_v14 = vpop.permute.xlu0 %2319 }
  0xbe   :  { %v1689_v38 = vrot.slane %v1687_v60, 5  ;;  %v3033_v41 = vcombine.low %v1789_v20, %v1789_v20  ;;  %v356_v45 = vor.u32 %v354_v59, %v353_v26  ;;  %v1695_v10 = vrot.slane %v1693_v28, 5  ;;  %v4049_v60 = vld [vmem:[#allocation2 + $0x70] sm:$0x1e] }
  0xbf   :  { %v1677_v19 = vrot.slane %v1676_v27, 4  ;;  %v730_v23 = vshrl.u32 %v2849_v32, 16  ;;  %v4020_v40 = vsel %vm3761_vm15, %v1705_v35, %v1709_v4  ;;  %v733_v24 = vshll.u32 %v2849_v32, 16  ;;  %v254_v4 = vld [vmem:[#allocation2 + $0x80] sm:$0x10] }
  0xc0   :  { %v1690_v36 = vor.u32 %v1689_v38, %v1686_v22  ;;  %v739_v48 = vshll.u32 %v2850_v16, 16  ;;  %v435_v50 = vsel %vm3627_vm8, %v356_v45, %v434_v33  ;;  %v3034_v52 = vcombine.high %v1789_v20, %v1789_v20  ;;  %v4043_v20 = vld [vmem:[#allocation2 + $0x70] sm:$0x1e] }
  0xc1   :  { %v1682_v51 = vsel %vm3761_vm15, %v1677_v19, %v1681_v21  ;;  %v732_v29 = vrot.slane %v730_v23, 4  ;;  %436 = vst [vmem:[#allocation2 + $0x78] sm:$0x1f] %v435_v50  ;;  %v735_v54 = vrot.slane %v733_v24, 5  ;;  %v3035_v57 = vcombine.low %v1790_v12, %v1790_v12 }
  0xc2   :  { %v1691_v53 = vrot.slane %v1690_v36, 4  ;;  %v741_v55 = vrot.slane %v739_v48, 5  ;;  %v3036_v61 = vcombine.high %v1790_v12, %v1790_v12  ;;  %v3057_v46 = vrot.slane %v3033_v41, 9  ;;  %v4065_v41 = vpop.permute.xlu1 %2107 }
  0xc3   :  { %v1911_v62 = vrot.slane %v3034_v52, 5  ;;  %v3213_v44 = vunpack.c.l.bf16 %v4025_v49  ;;  %v736_v6 = vor.u32 %v735_v54, %v732_v29  ;;  %v3058_v9 = vrot.slane %v3035_v57, 9 }
  0xc4   :  { %v1696_v0 = vsel %vm3761_vm15, %v1691_v53, %v1695_v10  ;;  %v99_v3 = vadd.f32 %v3998_v47, %v3993_v1  ;;  %v1915_v17 = vrot.slane %v3036_v61, 5  ;;  %v192_v22 = vsel %vm3563_vm3, 0, %v191_v43  ;;  %v4074_v53 = vpop.permute.xlu0 %2049 }
  0xc5   :  { %v3125_v15 = vcombine.low %v1682_v51, %v1696_v0  ;;  %v1912_v59 = vsel %vm3695_vm12, %v3057_v46, %v1911_v62  ;;  %v78_v18 = vmul.f32 %v3987_v30, %v3213_v44  ;;  %v737_v2 = vrot.slane %v736_v6, 4  ;;  %193 = vst [vmem:[#allocation2 + $0x80] sm:$0x1] %v192_v22 }
  0xc6   :  { %v115_v21 = vmax.f32 %v99_v3, 0.0  ;;  %v195_v1 = vsel %vm3563_vm3, 0, %v194_v63  ;;  %v1916_v26 = vsel %vm3695_vm12, %v3058_v9, %v1915_v17  ;;  %v255_v28 = vsel %vm3576_vm5, 0, %v254_v4 }
  0xc7   :  { %2285 = vrot.lane.b32.xlu0 %v3125_v15, %s3512_s23  ;;  %v100_v27 = vadd.f32 %v3998_v47, %v78_v18  ;;  %196 = vst [vmem:[#allocation2 + $0x88] sm:$0x1] %v195_v1  ;;  %v258_v32 = vsel %vm3576_vm5, 0, %v257_v13  ;;  %v4061_v33 = vsel %vm3761_vm15, %v737_v2, %v741_v55  ;;  %v3133_v35 = vcombine.low %v1912_v59, %v1916_v26  ;;  %v4078_v59 = vpop.permute.xlu1 %2045 }
  0xc8   :  { %v131_v38 = vpack.c.bf16 %v115_v21, %v115_v21  ;;  %256 = vst [vmem:[#allocation2 + $0x80] sm:$0x10] %v255_v28  ;;  %259 = vst [vmem:[#allocation2 + $0x88] sm:$0x10] %v258_v32  ;;  %v3037_v16 = vcombine.low %v4043_v20, %v4043_v20  ;;  %v3420_v45 = vld [vmem:[#allocation2 + $0x70] ss:$8 sps:$4 sm:$0xff]   ;;  %v3038_v10 = vcombine.high %v4043_v20, %v4043_v20  ;;  %v3214_v36 = vunpack.c.h.bf16 %v4025_v49  ;;  %v2006_v32 = vpop.permute.xlu0 %2005 }
  0xc9   :  { %v1472_v19 = vld [vmem:[#allocation2 + $0x78] sm:$0x1f]  ;;  %v2881_v23 = vcombine.low %v4049_v60, %v4049_v60  ;;  %v2882_v12 = vcombine.high %v4049_v60, %v4049_v60  ;;  %v116_v51 = vmax.f32 %v100_v27, 0.0  ;;  %2247 = vrot.lane.b32.xlu1 %v3420_v45, %s3507_s18  ;;  %vm2374_vm2 = vcmask 195584  }
  0xca   :  { %v3007_v24 = vcombine.low %v1472_v19, %v1472_v19  ;;  %v3008_v48 = vcombine.high %v1472_v19, %v1472_v19  ;;  %v475_v50 = vld [vmem:[#allocation2 + $0x78] sm:$0x1f]  ;;  %v358_v29 = vshrl.u32 %v131_v38, 16  ;;  %v361_v57 = vshll.u32 %v131_v38, 16 }
  0xcb   :  { %v1792_v52 = vld [vmem:[#allocation2 + $0x78] sm:$0x1e]  ;;  %v2851_v54 = vcombine.low %v475_v50, %v475_v50  ;;  %v2852_v55 = vcombine.high %v475_v50, %v475_v50  ;;  %2325 = vrot.lane.b32.xlu0 %v3133_v35, %s3510_s21  ;;  %v132_v43 = vpack.c.bf16 %v116_v51, %v116_v51  ;;  %v3059_v19 = vrot.slane %v3037_v16, 9 }
  0xcc   :  { %v3039_v61 = vcombine.low %v1792_v52, %v1792_v52  ;;  %v1712_v46 = vshrl.u32 %v3007_v24, 16  ;;  %v1715_v62 = vshll.u32 %v3007_v24, 16  ;;  %v1721_v44 = vshll.u32 %v3008_v48, 16  ;;  %v798_v28 = vld [vmem:[#allocation2 + $0x78] sm:$0x1e] }
  0xcd   :  { %v744_v63 = vshrl.u32 %v2851_v54, 16  ;;  %v747_v0 = vshll.u32 %v2851_v54, 16  ;;  %v753_v6 = vshll.u32 %v2852_v55, 16  ;;  %v360_v9 = vrot.slane %v358_v29, 7 }
  0xce   :  { %v1714_v3 = vrot.slane %v1712_v46, 4  ;;  %v1717_v4 = vrot.slane %v1715_v62, 5  ;;  %v1723_v13 = vrot.slane %v1721_v44, 5  ;;  %v365_v15 = vshrl.u32 %v132_v43, 16  ;;  %v197_v46 = vld [vmem:[#allocation2 + $0x90] sm:$0x1] }
  0xcf   :  { %v746_v17 = vrot.slane %v744_v63, 4  ;;  %v749_v18 = vrot.slane %v747_v0, 5  ;;  %v755_v20 = vrot.slane %v753_v6, 5  ;;  %v363_v2 = vor.u32 %v361_v57, %v360_v9  ;;  %v437_v21 = vld [vmem:[#allocation2 + $0x80] sm:$0x1f]  ;;  %v4092_v63 = vpop.permute.xlu1 %2047 }
  0xd0   :  { %v1718_v22 = vor.u32 %v1717_v4, %v1714_v3  ;;  %v367_v1 = vrot.slane %v365_v15, 7  ;;  %v368_v26 = vshll.u32 %v132_v43, 16  ;;  %v3040_v27 = vcombine.high %v1792_v52, %v1792_v52  ;;  %v440_v45 = vld [vmem:[#allocation2 + $0x88] sm:$0x1f]  ;;  %v260_v62 = vld [vmem:[#allocation2 + $0x90] sm:$0x10] }
  0xd1   :  { %v750_v35 = vor.u32 %v749_v18, %v746_v17  ;;  %v438_v38 = vsel %vm3627_vm8, %v363_v2, %v437_v21  ;;  %v1919_v24 = vrot.slane %v3038_v10, 5  ;;  %v3060_v51 = vrot.slane %v3039_v61, 9  ;;  %v4090_v61 = vld [vmem:[#allocation2 + $0x78] sm:$0x1f]  ;;  %v3492_v0 = vld [vmem:[#allocation2] ss:$8 sps:$4 sm:$0xff]   ;;  %v2008_v2 = vpop.permute.xlu0 %2007 }
  0xd2   :  { %v1719_v48 = vrot.slane %v1718_v22, 4  ;;  %v370_v50 = vor.u32 %v368_v26, %v367_v1  ;;  %439 = vst [vmem:[#allocation2 + $0x80] sm:$0x1f] %v438_v38  ;;  %v1923_v29 = vrot.slane %v3040_v27, 5  ;;  %v2883_v57 = vcombine.low %v798_v28, %v798_v28  ;;  %v3494_v15 = vld [vmem:[#allocation2 + $0x10] ss:$8 sps:$4 sm:$0xff]  }
  0xd3   :  { %v751_v54 = vrot.slane %v750_v35, 4  ;;  %v1920_v55 = vsel %vm3695_vm12, %v3059_v19, %v1919_v24  ;;  %v2884_v52 = vcombine.high %v798_v28, %v798_v28  ;;  %v2901_v43 = vrot.slane %v2881_v23, 9 }
  0xd4   :  { %v1724_v44 = vsel %vm3761_vm15, %v1719_v48, %v1723_v13  ;;  %v441_v16 = vsel %vm3627_vm8, %v370_v50, %v440_v45  ;;  %v1924_v10 = vsel %vm3695_vm12, %v3060_v51, %v1923_v29  ;;  %v934_v4 = vrot.slane %v2882_v12, 5  ;;  %v4100_v13 = vld [vmem:[#allocation2 + $0x78] sm:$0x1e]  ;;  %v4135_v48 = vpop.permute.xlu1 %2183 }
  0xd5   :  { %v3126_v6 = vcombine.low %v4020_v40, %v1724_v44  ;;  %v756_v9 = vsel %vm3761_vm15, %v751_v54, %v755_v20  ;;  %442 = vst [vmem:[#allocation2 + $0x88] sm:$0x1f] %v441_v16  ;;  %v3134_v3 = vcombine.low %v1920_v55, %v1924_v10  ;;  %v2902_v17 = vrot.slane %v2883_v57, 9  ;;  %v4166_v7 = vpop.permute.xlu0 %2141 }
  0xd6   :  { %v3079_v23 = vcombine.low %v4061_v33, %v756_v9  ;;  %v938_v18 = vrot.slane %v2884_v52, 5  ;;  %v79_v40 = vmul.f32 %v3987_v30, %v3214_v36  ;;  %v935_v60 = vsel %vm3695_vm12, %v2901_v43, %v934_v4 }
  0xd7   :  { %2287 = vrot.lane.b32.xlu1 %v3126_v6, %s3512_s23  ;;  %2327 = vrot.lane.b32.xlu0 %v3134_v3, %s3510_s21  ;;  %v198_v12 = vsel %vm3563_vm3, 0, %v197_v46  ;;  %v261_v33 = vsel %vm3576_vm5, 0, %v260_v62  ;;  %v4116_v20 = vcombine.low %v4090_v61, %v4090_v61  ;;  %v2930_v36 = vcombine.high %v4090_v61, %v4090_v61 }
  0xd8   :  { %v939_v30 = vsel %vm3695_vm12, %v2902_v17, %v938_v18  ;;  %v101_v49 = vadd.f32 %v3998_v47, %v79_v40  ;;  %199 = vst [vmem:[#allocation2 + $0x90] sm:$0x1] %v198_v12  ;;  %262 = vst [vmem:[#allocation2 + $0x90] sm:$0x10] %v261_v33  ;;  %v2961_v21 = vcombine.low %v4100_v13, %v4100_v13  ;;  %vm2408_vm4 = vcmask 326656  }
  0xd9   :  { %v476_v22 = vld [vmem:[#allocation2 + $0x80] sm:$0x1f]  ;;  %v3087_v26 = vcombine.low %v935_v60, %v939_v30  ;;  %v2962_v27 = vcombine.high %v4100_v13, %v4100_v13  ;;  %v4128_v28 = vsel %vm134_vm9, %v3492_v0, %v2006_v32  ;;  %v4131_v35 = vsel %vm134_vm9, %v3494_v15, %v2008_v2  ;;  %v4149_v30 = vpop.permute.xlu1 %2051 }
  0xda   :  { %v799_v1 = vld [vmem:[#allocation2 + $0x80] sm:$0x1e]  ;;  %v2853_v47 = vcombine.low %v476_v22, %v476_v22  ;;  %v2854_v38 = vcombine.high %v476_v22, %v476_v22  ;;  %v117_v50 = vmax.f32 %v101_v49, 0.0  ;;  %v1229_v54 = vshrl.u32 %v4116_v20, 16 }
  0xdb   :  { %v2885_v45 = vcombine.low %v799_v1, %v799_v1  ;;  %v2886_v19 = vcombine.high %v799_v1, %v799_v1  ;;  %v4133_v24 = vld [vmem:[#allocation2 + $0x80] sm:$0x1f]  ;;  %2017 = vrot.lane.b32.xlu1 %v3079_v23, %s3513_s24  ;;  %2057 = vrot.lane.b32.xlu0 %v3087_v26, %s3509_s20  ;;  %vm2425_vm6 = vcmask 392192   ;;  %vm2442_vm7 = vcmask 457728  }
  0xdc   :  { %v3455_v51 = vld [vmem:[#allocation2 + $0x78] ss:$8 sps:$4 sm:$0xff]   ;;  %v4141_v32 = vcombine.low %v4133_v24, %v4133_v24  ;;  %v2932_v29 = vcombine.high %v4133_v24, %v4133_v24  ;;  %v477_v55 = vld [vmem:[#allocation2 + $0x88] sm:$0x1f]  ;;  %v758_v57 = vshrl.u32 %v2853_v47, 16  ;;  %v761_v52 = vshll.u32 %v2853_v47, 16 }
  0xdd   :  { %v767_v46 = vshll.u32 %v2854_v38, 16  ;;  %v2903_v62 = vrot.slane %v2885_v45, 9  ;;  %v2855_v44 = vcombine.low %v477_v55, %v477_v55  ;;  %v2856_v16 = vcombine.high %v477_v55, %v477_v55  ;;  %v800_v10 = vld [vmem:[#allocation2 + $0x88] sm:$0x1e] }
  0xde   :  { %v942_v43 = vrot.slane %v2886_v19, 5  ;;  %v133_v0 = vpack.c.bf16 %v117_v50, %v117_v50  ;;  %v760_v6 = vrot.slane %v758_v57, 4  ;;  %v763_v9 = vrot.slane %v761_v52, 5  ;;  %v978_v40 = vld [vmem:[#allocation2 + $0x88] sm:$0x1f] }
  0xdf   :  { %v769_v3 = vrot.slane %v767_v46, 5  ;;  %v2887_v4 = vcombine.low %v800_v10, %v800_v10  ;;  %v772_v15 = vshrl.u32 %v2855_v44, 16  ;;  %v775_v23 = vshll.u32 %v2855_v44, 16  ;;  %2113 = vrot.lane.b32.xlu0 %v3455_v51, %s3506_s17  ;;  %v443_v55 = vld [vmem:[#allocation2 + $0x90] sm:$0x1f] }
  0xe0   :  { %v781_v17 = vshll.u32 %v2856_v16, 16  ;;  %v2888_v18 = vcombine.high %v800_v10, %v800_v10  ;;  %v764_v2 = vor.u32 %v763_v9, %v760_v6  ;;  %v943_v60 = vsel %vm3695_vm12, %v2903_v62, %v942_v43 }
  0xe1   :  { %v2904_v12 = vrot.slane %v2887_v4, 9  ;;  %v372_v33 = vshrl.u32 %v133_v0, 16  ;;  %v774_v49 = vrot.slane %v772_v15, 4  ;;  %v777_v22 = vrot.slane %v775_v23, 5  ;;  %v1298_v23 = vld [vmem:[#allocation2 + $0x88] sm:$0x1e] }
  0xe2   :  { %v783_v1 = vrot.slane %v781_v17, 5  ;;  %v946_v26 = vrot.slane %v2888_v18, 5  ;;  %v765_v47 = vrot.slane %v764_v2, 4  ;;  %v375_v45 = vshll.u32 %v133_v0, 16  ;;  %v1297_v2 = vld [vmem:[#allocation2 + $0x80] sm:$0x1e] }
  0xe3   :  { %v374_v38 = vrot.slane %v372_v33, 7  ;;  %v2933_v19 = vcombine.low %v978_v40, %v978_v40  ;;  %v778_v50 = vor.u32 %v777_v22, %v774_v49  ;;  %v2934_v57 = vcombine.high %v978_v40, %v978_v40 }
  0xe4   :  { %v947_v51 = vsel %vm3695_vm12, %v2904_v12, %v946_v26  ;;  %v1231_v52 = vrot.slane %v1229_v54, 4  ;;  %v770_v46 = vsel %vm3761_vm15, %v765_v47, %v769_v3  ;;  %v1232_v9 = vshll.u32 %v4116_v20, 16  ;;  %v4162_v3 = vpop.permute.xlu1 %2143 }
  0xe5   :  { %v3088_v62 = vcombine.low %v943_v60, %v947_v51  ;;  %v377_v44 = vor.u32 %v375_v45, %v374_v38  ;;  %v1257_v16 = vshrl.u32 %v2933_v19, 16  ;;  %v779_v10 = vrot.slane %v778_v50, 4 }
  0xe6   :  { %v1260_v43 = vshll.u32 %v2933_v19, 16  ;;  %v1266_v6 = vshll.u32 %v2934_v57, 16  ;;  %v1238_v15 = vshll.u32 %v2930_v36, 16  ;;  %v1243_v54 = vshrl.u32 %v4141_v32, 16  ;;  %v1473_v57 = vld [vmem:[#allocation2 + $0x80] sm:$0x1f] }
  0xe7   :  { %v444_v0 = vsel %vm3627_vm8, %v377_v44, %v443_v55  ;;  %v1259_v4 = vrot.slane %v1257_v16, 4  ;;  %v784_v17 = vsel %vm3761_vm15, %v779_v10, %v783_v1  ;;  %v1234_v20 = vrot.slane %v1232_v9, 5  ;;  %v263_v9 = vld [vmem:[#allocation2 + $0x98] sm:$0x10] }
  0xe8   :  { %445 = vst [vmem:[#allocation2 + $0x90] sm:$0x1f] %v444_v0  ;;  %v1262_v18 = vrot.slane %v1260_v43, 5  ;;  %v1268_v40 = vrot.slane %v1266_v6, 5  ;;  %v3080_v60 = vcombine.low %v770_v46, %v784_v17  ;;  %v1240_v12 = vrot.slane %v1238_v15, 5  ;;  %v4187_v0 = vpop.permute.xlu0 %2277 }
  0xe9   :  { %v1245_v33 = vrot.slane %v1243_v54, 4  ;;  %v1246_v61 = vshll.u32 %v4141_v32, 16  ;;  %v1235_v49 = vor.u32 %v1234_v20, %v1231_v52  ;;  %v1252_v22 = vshll.u32 %v2932_v29, 16  ;;  %v4179_v29 = vpop.permute.xlu1 %2279  ;;  %v200_v6 = vld [vmem:[#allocation2 + $0x98] sm:$0x1] }
  0xea   :  { %v1263_v36 = vor.u32 %v1262_v18, %v1259_v4  ;;  %v2965_v26 = vcombine.low %v1298_v23, %v1298_v23  ;;  %2019 = vrot.lane.b32.xlu1 %v3080_v60, %s3513_s24  ;;  %v2966_v47 = vcombine.high %v1298_v23, %v1298_v23  ;;  %v2963_v38 = vcombine.low %v1297_v2, %v1297_v2 }
  0xeb   :  { %v1248_v1 = vrot.slane %v1246_v61, 5  ;;  %v2964_v45 = vcombine.high %v1297_v2, %v1297_v2  ;;  %v1236_v50 = vrot.slane %v1235_v49, 4  ;;  %v1254_v51 = vrot.slane %v1252_v22, 5 }
  0xec   :  { %v1264_v19 = vrot.slane %v1263_v36, 4  ;;  %v2983_v55 = vrot.slane %v2965_v26, 9  ;;  %v1438_v32 = vrot.slane %v2966_v47, 5  ;;  %v2981_v52 = vrot.slane %v2961_v21, 9  ;;  %v1474_v26 = vld [vmem:[#allocation2 + $0x88] sm:$0x1f] }
  0xed   :  { %v1249_v46 = vor.u32 %v1248_v1, %v1245_v33  ;;  %v1430_v24 = vrot.slane %v2962_v27, 5  ;;  %v1241_v16 = vsel %vm3761_vm15, %v1236_v50, %v1240_v12  ;;  %v2982_v10 = vrot.slane %v2963_v38, 9 }
  0xee   :  { %v4183_v44 = vsel %vm3761_vm15, %v1264_v19, %v1268_v40  ;;  %v1434_v43 = vrot.slane %v2964_v45, 5  ;;  %2059 = vrot.lane.b32.xlu1 %v3088_v62, %s3509_s20  ;;  %v1439_v27 = vsel %vm3695_vm12, %v2983_v55, %v1438_v32  ;;  %v3009_v15 = vcombine.low %v1473_v57, %v1473_v57  ;;  %v4203_v19 = vpop.permute.xlu1 %2009 }
  0xef   :  { %v3454_v21 = vld [vmem:[#allocation2 + $0x88] ss:$8 sps:$4 sm:$0xff]   ;;  %v1431_v4 = vsel %vm3695_vm12, %v2981_v52, %v1430_v24  ;;  %v3010_v54 = vcombine.high %v1473_v57, %v1473_v57  ;;  %v1250_v18 = vrot.slane %v1249_v46, 4  ;;  %v201_v12 = vsel %vm3563_vm3, 0, %v200_v6  ;;  %v4205_v46 = vpop.permute.xlu0 %2145 }
  0xf0   :  { %v979_v13 = vld [vmem:[#allocation2 + $0x90] sm:$0x1f]  ;;  %v1435_v20 = vsel %vm3695_vm12, %v2982_v10, %v1434_v43  ;;  %202 = vst [vmem:[#allocation2 + $0x98] sm:$0x1] %v201_v12  ;;  %v264_v45 = vsel %vm3576_vm5, 0, %v263_v9  ;;  %v3011_v52 = vcombine.low %v1474_v26, %v1474_v26  ;;  %v3012_v24 = vcombine.high %v1474_v26, %v1474_v26 }
  0xf1   :  { %v2935_v23 = vcombine.low %v979_v13, %v979_v13  ;;  %v2936_v17 = vcombine.high %v979_v13, %v979_v13  ;;  %v1299_v40 = vld [vmem:[#allocation2 + $0x90] sm:$0x1e]  ;;  %v3111_v62 = vcombine.low %v1431_v4, %v1435_v20  ;;  %v1255_v22 = vsel %vm3761_vm15, %v1250_v18, %v1254_v51  ;;  %265 = vst [vmem:[#allocation2 + $0x98] sm:$0x10] %v264_v45  ;;  %v3473_v20 = vld [vmem:[#allocation2 + $0x80] ss:$8 sps:$4 sm:$0xff]  }
  0xf2   :  { %v2967_v2 = vcombine.low %v1299_v40, %v1299_v40  ;;  %v2968_v60 = vcombine.high %v1299_v40, %v1299_v40  ;;  %v1475_v33 = vld [vmem:[#allocation2 + $0x90] sm:$0x1f]  ;;  %2115 = vrot.lane.b32.xlu1 %v3454_v21, %s3506_s17  ;;  %v3103_v1 = vcombine.low %v1241_v16, %v1255_v22  ;;  %v1726_v21 = vshrl.u32 %v3009_v15, 16 }
  0xf3   :  { %v1271_v61 = vshrl.u32 %v2935_v23, 16  ;;  %v1274_v36 = vshll.u32 %v2935_v23, 16  ;;  %v1280_v49 = vshll.u32 %v2936_v17, 16  ;;  %v3013_v57 = vcombine.low %v1475_v33, %v1475_v33  ;;  %v1795_v6 = vld [vmem:[#allocation2 + $0x90] sm:$0x1e] }
  0xf4   :  { %v2984_v47 = vrot.slane %v2967_v2, 9  ;;  %v1442_v38 = vrot.slane %v2968_v60, 5  ;;  %2153 = vrot.lane.b32.xlu0 %v3103_v1, %s3511_s22  ;;  %v3014_v32 = vcombine.high %v1475_v33, %v1475_v33  ;;  %v1729_v13 = vshll.u32 %v3009_v15, 16 }
  0xf5   :  { %v1273_v5 = vrot.slane %v1271_v61, 4  ;;  %v1276_v50 = vrot.slane %v1274_v36, 5  ;;  %v1282_v55 = vrot.slane %v1280_v49, 5  ;;  %v1754_v10 = vshrl.u32 %v3013_v57, 16  ;;  %v4211_v61 = vpop.permute.xlu1 %2011 }
  0xf6   :  { %v1443_v51 = vsel %vm3695_vm12, %v2984_v47, %v1442_v38  ;;  %v1757_v43 = vshll.u32 %v3013_v57, 16  ;;  %v1763_v9 = vshll.u32 %v3014_v32, 16  ;;  %v1735_v4 = vshll.u32 %v3010_v54, 16  ;;  %v4215_v54 = vpop.permute.xlu0 %2185 }
  0xf7   :  { %v1277_v16 = vor.u32 %v1276_v50, %v1273_v5  ;;  %v3112_v11 = vcombine.low %v1439_v27, %v1443_v51  ;;  %v1756_v17 = vrot.slane %v1754_v10, 4  ;;  %v1740_v40 = vshrl.u32 %v3011_v52, 16 }
  0xf8   :  { %v1759_v18 = vrot.slane %v1757_v43, 5  ;;  %2193 = vrot.lane.b32.xlu0 %v3111_v62, %s3508_s19  ;;  %v1765_v2 = vrot.slane %v1763_v9, 5  ;;  %v1728_v60 = vrot.slane %v1726_v21, 4  ;;  %v3045_v12 = vcombine.low %v1795_v6, %v1795_v6  ;;  %v1476_v26 = vld [vmem:[#allocation2 + $0x98] sm:$0x1f] }
  0xf9   :  { %v1278_v23 = vrot.slane %v1277_v16, 4  ;;  %v3046_v33 = vcombine.high %v1795_v6, %v1795_v6  ;;  %v1731_v49 = vrot.slane %v1729_v13, 5  ;;  %v1737_v15 = vrot.slane %v1735_v4, 5  ;;  %v1796_v57 = vld [vmem:[#allocation2 + $0x98] sm:$0x1e] }
  0xfa   :  { %v1760_v36 = vor.u32 %v1759_v18, %v1756_v17  ;;  %v1742_v1 = vrot.slane %v1740_v40, 4  ;;  %v1743_v62 = vshll.u32 %v3011_v52, 16  ;;  %v1749_v47 = vshll.u32 %v3012_v24, 16  ;;  %v1793_v24 = vld [vmem:[#allocation2 + $0x80] sm:$0x1e] }
  0xfb   :  { %v1283_v27 = vsel %vm3761_vm15, %v1278_v23, %v1282_v55  ;;  %v3015_v38 = vcombine.low %v1476_v26, %v1476_v26  ;;  %v3016_v45 = vcombine.high %v1476_v26, %v1476_v26  ;;  %v1732_v50 = vor.u32 %v1731_v49, %v1728_v60  ;;  %v1794_v4 = vld [vmem:[#allocation2 + $0x88] sm:$0x1e]  ;;  %v4222_v23 = vpop.permute.xlu1 %2147  ;;  %v4224_v60 = vpop.permute.xlu0 %2241 }
  0xfc   :  { %v3104_v22 = vcombine.low %v4183_v44, %v1283_v27  ;;  %v1761_v5 = vrot.slane %v1760_v36, 4  ;;  %2249 = vrot.lane.b32.xlu0 %v3473_v20, %s3507_s18  ;;  %v1745_v55 = vrot.slane %v1743_v62, 5  ;;  %v1751_v51 = vrot.slane %v1749_v47, 5 }
  0xfd   :  { %v3047_v32 = vcombine.low %v1796_v57, %v1796_v57  ;;  %v3048_v16 = vcombine.high %v1796_v57, %v1796_v57  ;;  %v1768_v10 = vshrl.u32 %v3015_v38, 16  ;;  %v1771_v43 = vshll.u32 %v3015_v38, 16 }
  0xfe   :  { %2155 = vrot.lane.b32.xlu1 %v3104_v22, %s3511_s22  ;;  %v1766_v44 = vsel %vm3761_vm15, %v1761_v5, %v1765_v2  ;;  %v1777_v52 = vshll.u32 %v3016_v45, 16  ;;  %v1733_v6 = vrot.slane %v1732_v50, 4  ;;  %v1746_v9 = vor.u32 %v1745_v55, %v1742_v1  ;;  %v3472_v2 = vld [vmem:[#allocation2 + $0x90] ss:$8 sps:$4 sm:$0xff]   ;;  %v3496_v50 = vld [vmem:[#allocation2 + $0x20] ss:$8 sps:$4 sm:$0xff]  }
  0xff   :  { %v3063_v21 = vrot.slane %v3045_v12, 9  ;;  %v1935_v13 = vrot.slane %v3046_v33, 5  ;;  %v1770_v17 = vrot.slane %v1768_v10, 4  ;;  %v1773_v18 = vrot.slane %v1771_v43, 5  ;;  %v2188_v10 = vpop.permute.xlu1 %2187 }
 0x100   :  { %v1779_v40 = vrot.slane %v1777_v52, 5  ;;  %v3064_v20 = vrot.slane %v3047_v32, 9  ;;  %v1738_v27 = vsel %vm3761_vm15, %v1733_v6, %v1737_v15  ;;  %v1747_v36 = vrot.slane %v1746_v9, 4  ;;  %v2282_v6 = vpop.permute.xlu0 %2281 }
 0x101   :  { %v1936_v12 = vsel %vm3695_vm12, %v3063_v21, %v1935_v13  ;;  %v1939_v33 = vrot.slane %v3048_v16, 5  ;;  %v1774_v49 = vor.u32 %v1773_v18, %v1770_v17  ;;  %v3041_v22 = vcombine.low %v1793_v24, %v1793_v24 }
 0x102   :  { %2195 = vrot.lane.b32.xlu1 %v3112_v11, %s3508_s19  ;;  %v3042_v26 = vcombine.high %v1793_v24, %v1793_v24  ;;  %v3043_v1 = vcombine.low %v1794_v4, %v1794_v4  ;;  %v1752_v62 = vsel %vm3761_vm15, %v1747_v36, %v1751_v51  ;;  %v3044_v11 = vcombine.high %v1794_v4, %v1794_v4  ;;  %v3498_v51 = vld [vmem:[#allocation2 + $0x30] ss:$8 sps:$4 sm:$0xff]   ;;  %v3497_v24 = vld [vmem:[%s4473_s3 + $0x20] ss:$0 sps:$4 sm:$0xff]  }
 0x103   :  { %v1940_v47 = vsel %vm3695_vm12, %v3064_v20, %v1939_v33  ;;  %v1775_v38 = vrot.slane %v1774_v49, 4  ;;  %v3127_v45 = vcombine.low %v1738_v27, %v1752_v62  ;;  %v3061_v5 = vrot.slane %v3041_v22, 9 }
 0x104   :  { %v3136_v15 = vcombine.low %v1936_v12, %v1940_v47  ;;  %v1927_v57 = vrot.slane %v3042_v26, 5  ;;  %v3062_v55 = vrot.slane %v3043_v1, 9  ;;  %v1931_v32 = vrot.slane %v3044_v11, 5  ;;  %v2322_v4 = vpop.permute.xlu0 %2321  ;;  %v3499_v1 = vld [vmem:[#allocation2 + $0x50] ss:$8 sps:$4 sm:$0xff]  }
 0x105   :  { %v2359_v16 = vsel %vm2357_vm1, %v4128_v28, %v4078_v59  ;;  %v1780_v43 = vsel %vm3761_vm15, %v1775_v38, %v1779_v40  ;;  %2289 = vrot.lane.b32.xlu0 %v3127_v45, %s3512_s23  ;;  %vm2391_vm3 = vcmask 261120   ;;  %v2361_v52 = vsel %vm2357_vm1, %v4131_v35, %v4092_v63 }
 0x106   :  { %2251 = vrot.lane.b32.xlu1 %v3472_v2, %s3507_s18  ;;  %v3128_v9 = vcombine.low %v1766_v44, %v1780_v43  ;;  %v1928_v59 = vsel %vm3695_vm12, %v3061_v5, %v1927_v57  ;;  %v1932_v8 = vsel %vm3695_vm12, %v3062_v55, %v1931_v32  ;;  %v2378_v28 = vsel %vm2374_vm2, %v2361_v52, %v4012_v25 }
 0x107   :  { %v3135_v21 = vcombine.low %v1928_v59, %v1932_v8  ;;  %v2395_v13 = vsel %vm2391_vm3, %v2378_v28, %v4162_v3  ;;  %v2341_v63 = vsel %vm134_vm9, %v3496_v50, %v4203_v19  ;;  %v2376_v39 = vsel %vm2374_vm2, %v2359_v16, %v3950_v34  ;;  %v2244_v34 = vpop.permute.xlu1 %2243 }
 0x108   :  { %v2363_v35 = vsel %vm2357_vm1, %v2341_v63, %v4074_v53  ;;  %vm2536_vm5 = vcmask 1043456   ;;  %v2344_v25 = vsel %vm134_vm9, %v3498_v51, %v4211_v61  ;;  %v2393_v3 = vsel %vm2391_vm3, %v2376_v39, %v4166_v7  ;;  %v2324_v20 = vpop.permute.xlu0 %2323 }
 0x109   :  { %2329 = vrot.lane.b32.xlu0 %v3135_v21, %s3510_s21  ;;  %3271 = vmatprep.subr.msk.bf16.mxu0 %vm2536_vm5, %v3497_v24  ;;  %v2365_v19 = vsel %vm2357_vm1, %v2344_v25, %v4149_v30  ;;  %v2410_v53 = vsel %vm2408_vm4, %v2393_v3, %v4008_v31  ;;  %v2538_v44 = vsel %vm2536_vm5, %v3497_v24, 0  ;;  %vm2459_vm8 = vcmask 523264  }
 0x10a   :  { %2291 = vrot.lane.b32.xlu1 %v3128_v9, %s3512_s23  ;;  %3272 = vmatprep.subr.msk.bf16.mxu1 %vm2536_vm5, %v3497_v24  ;;  %v2427_v61 = vsel %vm2425_vm6, %v2410_v53, %v3965_v56  ;;  %vm2519_vm10 = vcmask 588800   ;;  %v2380_v7 = vsel %vm2374_vm2, %v2363_v35, %v3978_v37  ;;  %v2412_v30 = vsel %vm2408_vm4, %v2395_v13, %v4135_v48 }
 0x10b   :  { %3244 = vmatpush3.bf16.msra.mxu0 %v2538_v44  ;;  %v2444_v31 = vsel %vm2442_vm7, %v2427_v61, %v4187_v0  ;;  %v2397_v17 = vsel %vm2391_vm3, %v2380_v7, %v4205_v46  ;;  %v2429_v56 = vsel %vm2425_vm6, %v2412_v30, %v4031_v58  ;;  %v2382_v37 = vsel %vm2374_vm2, %v2365_v19, %v4065_v41  ;;  %v3501_v7 = vld [vmem:[#allocation2 + $0x70] ss:$8 sps:$4 sm:$0xff]  }
 0x10c   :  { %v2461_v18 = vsel %vm2459_vm8, %v2444_v31, %v4016_v42  ;;  %v2446_v48 = vsel %vm2442_vm7, %v2429_v56, %v4179_v29  ;;  %v2414_v40 = vsel %vm2408_vm4, %v2397_v17, %v4215_v54  ;;  %3270 = vmatpush3.bf16.msra.mxu1 %v2538_v44  ;;  %v2399_v41 = vsel %vm2391_vm3, %v2382_v37, %v4222_v23  ;;  %v2284_v29 = vpop.permute.xlu1 %2283  ;;  %v3502_v31 = vld [vmem:[#allocation2 + $0x80] ss:$8 sps:$4 sm:$0xff]  }
 0x10d   :  { %3245 = vmatprep.mubr.msk.bf16.mxu0 %vm2519_vm10, %v2461_v18  ;;  %v2463_v0 = vsel %vm2459_vm8, %v2446_v48, %v4038_v14  ;;  %v2431_v58 = vsel %vm2425_vm6, %v2414_v40, %v4224_v60  ;;  %v2416_v54 = vsel %vm2408_vm4, %v2399_v41, %v2188_v10  ;;  %v3500_v10 = vld [vmem:[#allocation2 + $0x60] ss:$8 sps:$4 sm:$0xff]   ;;  %vm2701_vm11 = vcmask 60416  }
 0x10e   :  { %2331 = vrot.lane.b32.xlu1 %v3136_v15, %s3510_s21  ;;  %3246 = vmatmul.mubr.msk.bf16.vlgmr.msra.gmra.mrb[0].mxu0 %vm2519_vm10, %v2463_v0  ;;  %v2448_v42 = vsel %vm2442_vm7, %v2431_v58, %v2282_v6  ;;  %v2433_v14 = vsel %vm2425_vm6, %v2416_v54, %v2244_v34 }
 0x10f   :  { %v2465_v46 = vsel %vm2459_vm8, %v2448_v42, %v2322_v4  ;;  %v2450_v2 = vsel %vm2442_vm7, %v2433_v14, %v2284_v29  ;;  %v2054_v27 = vpop.permute.xlu0 %2053 }
 0x110   :  { %3249 = vmatprep.mubr.msk.bf16.mxu0 %vm2519_vm10, %v2465_v46  ;;  %v2467_v60 = vsel %vm2459_vm8, %v2450_v2, %v2324_v20 }
 0x113   :  { %v2014_v36 = vpop.permute.xlu1 %2013  ;;  %v2110_v12 = vpop.permute.xlu0 %2109 }
 0x114   :  { %v2347_v47 = vsel %vm134_vm9, %v3499_v1, %v2014_v36 }
 0x115   :  { %v2367_v38 = vsel %vm2357_vm1, %v2347_v47, %v2054_v27 }
 0x116   :  { %3250 = vmatmul.mubr.msk.bf16.gmra.mrb[4].mxu0 %vm2519_vm10, %v2467_v60  ;;  %v2384_v45 = vsel %vm2374_vm2, %v2367_v38, %v2110_v12 }
 0x11b   :  { %v2016_v23 = vpop.permute.xlu1 %2015 }
 0x11c   :  { %v2350_v52 = vsel %vm134_vm9, %v3500_v10, %v2016_v23 }
 0x11f   :  { %v2056_v49 = vpop.permute.xlu1 %2055 }
 0x120   :  { %v2369_v24 = vsel %vm2357_vm1, %v2350_v52, %v2056_v49 }
 0x123   :  { %v2112_v26 = vpop.permute.xlu1 %2111 }
 0x124   :  { %v2386_v6 = vsel %vm2374_vm2, %v2369_v24, %v2112_v26 }
 0x127   :  { %v2150_v33 = vpop.permute.xlu0 %2149 }
 0x128   :  { %v2401_v5 = vsel %vm2391_vm3, %v2384_v45, %v2150_v33  ;;  %v4348_v33 = vld [vmem:[%s4474_s4] ss:$0 sm:$0xff] }
 0x12a   :  { %v2152_v11 = vpop.permute.xlu1 %2151 }
 0x12b   :  { %v2190_v22 = vpop.permute.xlu0 %2189  ;;  %v2403_v9 = vsel %vm2391_vm3, %v2386_v6, %v2152_v11 }
 0x12c   :  { %v2418_v50 = vsel %vm2408_vm4, %v2401_v5, %v2190_v22 }
 0x12e   :  { %v2192_v55 = vpop.permute.xlu1 %2191 }
 0x12f   :  { %v2246_v62 = vpop.permute.xlu0 %2245  ;;  %v2420_v59 = vsel %vm2408_vm4, %v2403_v9, %v2192_v55 }
 0x130   :  { %v2435_v57 = vsel %vm2425_vm6, %v2418_v50, %v2246_v62 }
 0x139   :  { %v2286_v15 = vpop.permute.xlu0 %2285 }
 0x13a   :  { %v2452_v32 = vsel %vm2442_vm7, %v2435_v57, %v2286_v15 }
 0x13b   :  { %v2248_v43 = vpop.permute.xlu1 %2247 }
 0x13c   :  { %v2437_v8 = vsel %vm2425_vm6, %v2420_v59, %v2248_v43 }
 0x13d   :  { %v2326_v16 = vpop.permute.xlu0 %2325 }
 0x13e   :  { %v2469_v51 = vsel %vm2459_vm8, %v2452_v32, %v2326_v16 }
 0x13f   :  { %3253 = vmatprep.mubr.msk.bf16.mxu1 %vm2519_vm10, %v2469_v51 }
 0x149   :  { %v2288_v28 = vpop.permute.xlu1 %2287  ;;  %v2328_v21 = vpop.permute.xlu0 %2327 }
 0x14a   :  { %v2454_v13 = vsel %vm2442_vm7, %v2437_v8, %v2288_v28 }
 0x14b   :  { %v2471_v63 = vsel %vm2459_vm8, %v2454_v13, %v2328_v21 }
 0x14c   :  { %3254 = vmatmul.mubr.msk.bf16.vlgmr.msra.gmra.mrb[0].mxu1 %vm2519_vm10, %v2471_v63 }
 0x14d   :  { %v2018_v35 = vpop.permute.xlu1 %2017  ;;  %v2058_v39 = vpop.permute.xlu0 %2057 }
 0x14e   :  { %v2353_v17 = vsel %vm134_vm9, %v3501_v7, %v2018_v35 }
 0x14f   :  { %v2371_v56 = vsel %vm2357_vm1, %v2353_v17, %v2058_v39 }
 0x151   :  { %v2114_v3 = vpop.permute.xlu0 %2113 }
 0x152   :  { %v2388_v37 = vsel %vm2374_vm2, %v2371_v56, %v2114_v3 }
 0x15c   :  { %v2020_v25 = vpop.permute.xlu1 %2019 }
 0x15d   :  { %v2356_v40 = vsel %vm134_vm9, %v3502_v31, %v2020_v25 }
 0x160   :  { %v2060_v19 = vpop.permute.xlu1 %2059 }
 0x161   :  { %v2373_v58 = vsel %vm2357_vm1, %v2356_v40, %v2060_v19 }
 0x164   :  { %v2116_v44 = vpop.permute.xlu1 %2115 }
 0x165   :  { %v2390_v41 = vsel %vm2374_vm2, %v2373_v58, %v2116_v44 }
 0x166   :  { %v2154_v53 = vpop.permute.xlu0 %2153 }
 0x167   :  { %v2405_v0 = vsel %vm2391_vm3, %v2388_v37, %v2154_v53 }
 0x16a   :  { %v2194_v34 = vpop.permute.xlu0 %2193 }
 0x16b   :  { %v2422_v42 = vsel %vm2408_vm4, %v2405_v0, %v2194_v34 }
 0x16e   :  { %v2250_v30 = vpop.permute.xlu0 %2249 }
 0x16f   :  { %v2439_v29 = vsel %vm2425_vm6, %v2422_v42, %v2250_v30 }
 0x170   :  { %v2156_v61 = vpop.permute.xlu1 %2155 }
 0x171   :  { %v2407_v54 = vsel %vm2391_vm3, %v2390_v41, %v2156_v61 }
 0x174   :  { %v2196_v4 = vpop.permute.xlu1 %2195 }
 0x175   :  { %v2424_v2 = vsel %vm2408_vm4, %v2407_v54, %v2196_v4 }
 0x177   :  { %v2290_v48 = vpop.permute.xlu0 %2289 }
 0x178   :  { %v2252_v18 = vpop.permute.xlu1 %2251  ;;  %v2456_v20 = vsel %vm2442_vm7, %v2439_v29, %v2290_v48 }
 0x179   :  { %v2441_v27 = vsel %vm2425_vm6, %v2424_v2, %v2252_v18 }
 0x17b   :  { %v2330_v14 = vpop.permute.xlu0 %2329 }
 0x17c   :  { %v2292_v46 = vpop.permute.xlu1 %2291  ;;  %v2473_v60 = vsel %vm2459_vm8, %v2456_v20, %v2330_v14 }
 0x17d   :  { %3257 = vmatprep.mubr.msk.bf16.mxu1 %vm2519_vm10, %v2473_v60  ;;  %v2458_v36 = vsel %vm2442_vm7, %v2441_v27, %v2292_v46 }
 0x180   :  { %v2332_v12 = vpop.permute.xlu1 %2331 }
 0x181   :  { %v2475_v23 = vsel %vm2459_vm8, %v2458_v36, %v2332_v12 }
 0x182   :  { %3258 = vmatmul.mubr.msk.bf16.gmra.mrb[4].mxu1 %vm2519_vm10, %v2475_v23 }
 0x1e1   :  { %v3247_v49 = vpop.f32.mrb[0].mxu0 }
 0x1e2   :  { %v2583_v22 = vadd.f32 %v3247_v49, %v4348_v33  ;;  %v2574_v26 = vpop.f32.mrb[1].mxu0 }
 0x1e3   :  { %v2575_v1 = vadd.f32 %v4348_v33, %v2574_v26  ;;  %v3248_v62 = vpop.f32.mrb[2].mxu0 }
 0x1e4   :  { %v3169_v47 = vpack.c.bf16 %v2583_v22, %v2583_v22  ;;  %v2586_v11 = vadd.f32 %v3248_v62, %v4348_v33  ;;  %v2577_v38 = vpop.f32.mrb[3].mxu0  ;;  %v2759_v50 = vmul.f32 %v2583_v22, %v2583_v22  ;;  %v2721_v52 = vsel %vm134_vm9, %v2583_v22, 0.0 }
 0x1e5   :  { %v3167_v45 = vpack.c.bf16 %v2575_v1, %v2575_v1  ;;  %v2757_v15 = vmul.f32 %v2575_v1, %v2575_v1  ;;  %v2578_v5 = vadd.f32 %v4348_v33, %v2577_v38  ;;  %v2718_v55 = vsel %vm134_vm9, %v2575_v1, 0.0 }
 0x1e6   :  { %2704 = vst.msk [vmem:[%s4475_s5 + $0x8] sm:$0xf] %vm2701_vm11, %v3169_v47  ;;  %v3170_v57 = vpack.c.bf16 %v2586_v11, %v2586_v11  ;;  %v2760_v10 = vmul.f32 %v2586_v11, %v2586_v11  ;;  %v2776_v13 = vsel %vm134_vm9, %v2759_v50, 0.0  ;;  %v2723_v39 = vsel %vm134_vm9, %v2586_v11, 0.0 }
 0x1e7   :  { %2702 = vst.msk [vmem:[%s4475_s5] sm:$0xf] %vm2701_vm11, %v3167_v45  ;;  %v3168_v32 = vpack.c.bf16 %v2578_v5, %v2578_v5  ;;  %v2719_v16 = vsel %vm134_vm9, %v2578_v5, 0.0  ;;  %v2758_v51 = vmul.f32 %v2578_v5, %v2578_v5  ;;  %v2773_v24 = vsel %vm134_vm9, %v2757_v15, 0.0 }
 0x1e8   :  { %2705 = vst.msk [vmem:[%s4475_s5 + $0xc] sm:$0xf] %vm2701_vm11, %v3170_v57  ;;  %v2720_v43 = vadd.f32 %v2719_v16, %v2718_v55  ;;  %v2778_v25 = vsel %vm134_vm9, %v2760_v10, 0.0 }
 0x1e9   :  { %2703 = vst.msk [vmem:[%s4475_s5 + $0x4] sm:$0xf] %vm2701_vm11, %v3168_v32  ;;  %v2774_v6 = vsel %vm134_vm9, %v2758_v51, 0.0  ;;  %v3251_v9 = vpop.f32.mrb[4].mxu0 }
 0x1ea   :  { %v2722_v59 = vadd.f32 %v2721_v52, %v2720_v43  ;;  %v2775_v8 = vadd.f32 %v2774_v6, %v2773_v24  ;;  %v2599_v28 = vadd.f32 %v3251_v9, %v4348_v33  ;;  %v2590_v21 = vpop.f32.mrb[5].mxu0 }
 0x1eb   :  { %v2591_v63 = vadd.f32 %v4348_v33, %v2590_v21  ;;  %v3252_v35 = vpop.f32.mrb[6].mxu0 }
 0x1ec   :  { %v2777_v3 = vadd.f32 %v2776_v13, %v2775_v8  ;;  %v3173_v19 = vpack.c.bf16 %v2599_v28, %v2599_v28  ;;  %v2593_v53 = vpop.f32.mrb[7].mxu0  ;;  %v2724_v34 = vadd.f32 %v2723_v39, %v2722_v59  ;;  %v2602_v4 = vadd.f32 %v3252_v35, %v4348_v33 }
 0x1ed   :  { %v3171_v44 = vpack.c.bf16 %v2591_v63, %v2591_v63  ;;  %v2725_v61 = vsel %vm134_vm9, %v2591_v63, 0.0  ;;  %v2761_v7 = vmul.f32 %v2591_v63, %v2591_v63  ;;  %v2594_v31 = vadd.f32 %v4348_v33, %v2593_v53 }
 0x1ee   :  { %2708 = vst.msk [vmem:[%s4475_s5 + $0x18] sm:$0xf] %vm2701_vm11, %v3173_v19  ;;  %v2779_v30 = vadd.f32 %v2778_v25, %v2777_v3  ;;  %v2726_v17 = vadd.f32 %v2725_v61, %v2724_v34  ;;  %v3174_v37 = vpack.c.bf16 %v2602_v4, %v2602_v4  ;;  %v2763_v48 = vmul.f32 %v2599_v28, %v2599_v28 }
 0x1ef   :  { %2706 = vst.msk [vmem:[%s4475_s5 + $0x10] sm:$0xf] %vm2701_vm11, %v3171_v44  ;;  %v2780_v56 = vsel %vm134_vm9, %v2761_v7, 0.0  ;;  %v3172_v40 = vpack.c.bf16 %v2594_v31, %v2594_v31  ;;  %v2727_v0 = vsel %vm134_vm9, %v2594_v31, 0.0  ;;  %v2762_v58 = vmul.f32 %v2594_v31, %v2594_v31 }
 0x1f0   :  { %v2781_v18 = vadd.f32 %v2780_v56, %v2779_v30  ;;  %2709 = vst.msk [vmem:[%s4475_s5 + $0x1c] sm:$0xf] %vm2701_vm11, %v3174_v37  ;;  %v2728_v42 = vadd.f32 %v2727_v0, %v2726_v17  ;;  %v2729_v41 = vsel %vm134_vm9, %v2599_v28, 0.0  ;;  %v2764_v29 = vmul.f32 %v2602_v4, %v2602_v4 }
 0x1f1   :  { %2707 = vst.msk [vmem:[%s4475_s5 + $0x14] sm:$0xf] %vm2701_vm11, %v3172_v40  ;;  %v2782_v46 = vsel %vm134_vm9, %v2762_v58, 0.0  ;;  %v2784_v14 = vsel %vm134_vm9, %v2763_v48, 0.0  ;;  %v2731_v2 = vsel %vm134_vm9, %v2602_v4, 0.0 }
 0x1f2   :  { %v2730_v54 = vadd.f32 %v2729_v41, %v2728_v42  ;;  %v2783_v20 = vadd.f32 %v2782_v46, %v2781_v18  ;;  %v2786_v36 = vsel %vm134_vm9, %v2764_v29, 0.0 }
 0x1f4   :  { %v2785_v60 = vadd.f32 %v2784_v14, %v2783_v20  ;;  %v2732_v27 = vadd.f32 %v2731_v2, %v2730_v54 }
 0x1f6   :  { %v2787_v12 = vadd.f32 %v2786_v36, %v2785_v60 }
 0x21f   :  { %v3255_v23 = vpop.f32.mrb[0].mxu1 }
 0x220   :  { %v2615_v49 = vadd.f32 %v3255_v23, %v4348_v33  ;;  %v2606_v22 = vpop.f32.mrb[1].mxu1 }
 0x221   :  { %v2607_v26 = vadd.f32 %v4348_v33, %v2606_v22  ;;  %v3256_v1 = vpop.f32.mrb[2].mxu1 }
 0x222   :  { %v3177_v62 = vpack.c.bf16 %v2615_v49, %v2615_v49  ;;  %v2618_v47 = vadd.f32 %v3256_v1, %v4348_v33  ;;  %v2609_v11 = vpop.f32.mrb[3].mxu1  ;;  %v2767_v51 = vmul.f32 %v2615_v49, %v2615_v49  ;;  %v2737_v24 = vsel %vm134_vm9, %v2615_v49, 0.0 }
 0x223   :  { %v3175_v38 = vpack.c.bf16 %v2607_v26, %v2607_v26  ;;  %v2733_v45 = vsel %vm134_vm9, %v2607_v26, 0.0  ;;  %v2765_v15 = vmul.f32 %v2607_v26, %v2607_v26  ;;  %v2610_v5 = vadd.f32 %v4348_v33, %v2609_v11 }
 0x224   :  { %2712 = vst.msk [vmem:[%s4475_s5 + $0x28] sm:$0xf] %vm2701_vm11, %v3177_v62  ;;  %v2734_v50 = vadd.f32 %v2733_v45, %v2732_v27  ;;  %v3178_v57 = vpack.c.bf16 %v2618_v47, %v2618_v47  ;;  %v2768_v6 = vmul.f32 %v2618_v47, %v2618_v47  ;;  %v2739_v8 = vsel %vm134_vm9, %v2618_v47, 0.0 }
 0x225   :  { %2710 = vst.msk [vmem:[%s4475_s5 + $0x20] sm:$0xf] %vm2701_vm11, %v3175_v38  ;;  %v2788_v55 = vsel %vm134_vm9, %v2765_v15, 0.0  ;;  %v3176_v32 = vpack.c.bf16 %v2610_v5, %v2610_v5  ;;  %v2735_v16 = vsel %vm134_vm9, %v2610_v5, 0.0  ;;  %v2766_v52 = vmul.f32 %v2610_v5, %v2610_v5 }
 0x226   :  { %v2789_v10 = vadd.f32 %v2788_v55, %v2787_v12  ;;  %2713 = vst.msk [vmem:[%s4475_s5 + $0x2c] sm:$0xf] %vm2701_vm11, %v3178_v57  ;;  %v2736_v43 = vadd.f32 %v2735_v16, %v2734_v50  ;;  %v2792_v21 = vsel %vm134_vm9, %v2767_v51, 0.0  ;;  %v2794_v35 = vsel %vm134_vm9, %v2768_v6, 0.0 }
 0x227   :  { %2711 = vst.msk [vmem:[%s4475_s5 + $0x24] sm:$0xf] %vm2701_vm11, %v3176_v32  ;;  %v2790_v59 = vsel %vm134_vm9, %v2766_v52, 0.0 }
 0x228   :  { %v2738_v9 = vadd.f32 %v2737_v24, %v2736_v43  ;;  %v2791_v28 = vadd.f32 %v2790_v59, %v2789_v10 }
 0x22a   :  { %v2740_v13 = vadd.f32 %v2739_v8, %v2738_v9  ;;  %v2793_v63 = vadd.f32 %v2792_v21, %v2791_v28 }
 0x22c   :  { %v2795_v39 = vadd.f32 %v2794_v35, %v2793_v63 }
 0x255   :  { %v3259_v25 = vpop.f32.mrb[4].mxu1 }
 0x256   :  { %v2631_v3 = vadd.f32 %v3259_v25, %v4348_v33  ;;  %v2622_v19 = vpop.f32.mrb[5].mxu1 }
 0x257   :  { %v2623_v53 = vadd.f32 %v4348_v33, %v2622_v19  ;;  %v3260_v44 = vpop.f32.mrb[6].mxu1 }
 0x258   :  { %v3181_v34 = vpack.c.bf16 %v2631_v3, %v2631_v3  ;;  %v2634_v61 = vadd.f32 %v3260_v44, %v4348_v33  ;;  %v2625_v7 = vpop.f32.mrb[7].mxu1  ;;  %v2771_v0 = vmul.f32 %v2631_v3, %v2631_v3  ;;  %v2745_v41 = vsel %vm134_vm9, %v2631_v3, 0.0 }
 0x259   :  { %v3179_v30 = vpack.c.bf16 %v2623_v53, %v2623_v53  ;;  %v2741_v4 = vsel %vm134_vm9, %v2623_v53, 0.0  ;;  %v2769_v31 = vmul.f32 %v2623_v53, %v2623_v53  ;;  %v2626_v17 = vadd.f32 %v4348_v33, %v2625_v7 }
 0x25a   :  { %2716 = vst.msk [vmem:[%s4475_s5 + $0x38] sm:$0xf] %vm2701_vm11, %v3181_v34  ;;  %v2742_v56 = vadd.f32 %v2741_v4, %v2740_v13  ;;  %v3182_v18 = vpack.c.bf16 %v2634_v61, %v2634_v61  ;;  %v2772_v29 = vmul.f32 %v2634_v61, %v2634_v61  ;;  %v2747_v20 = vsel %vm134_vm9, %v2634_v61, 0.0 }
 0x25b   :  { %2714 = vst.msk [vmem:[%s4475_s5 + $0x30] sm:$0xf] %vm2701_vm11, %v3179_v30  ;;  %v2796_v37 = vsel %vm134_vm9, %v2769_v31, 0.0  ;;  %v3180_v48 = vpack.c.bf16 %v2626_v17, %v2626_v17  ;;  %v2743_v40 = vsel %vm134_vm9, %v2626_v17, 0.0  ;;  %v2770_v42 = vmul.f32 %v2626_v17, %v2626_v17 }
 0x25c   :  { %v2797_v58 = vadd.f32 %v2796_v37, %v2795_v39  ;;  %2717 = vst.msk [vmem:[%s4475_s5 + $0x3c] sm:$0xf] %vm2701_vm11, %v3182_v18  ;;  %v2744_v33 = vadd.f32 %v2743_v40, %v2742_v56  ;;  %v2800_v2 = vsel %vm134_vm9, %v2771_v0, 0.0  ;;  %v2802_v36 = vsel %vm134_vm9, %v2772_v29, 0.0 }
 0x25d   :  { %2715 = vst.msk [vmem:[%s4475_s5 + $0x34] sm:$0xf] %vm2701_vm11, %v3180_v48  ;;  %v2798_v54 = vsel %vm134_vm9, %v2770_v42, 0.0 }
 0x25e   :  { %v2746_v46 = vadd.f32 %v2745_v41, %v2744_v33  ;;  %v2799_v14 = vadd.f32 %v2798_v54, %v2797_v58 }
 0x260   :  { %v2748_v60 = vadd.f32 %v2747_v20, %v2746_v46  ;;  %v2801_v27 = vadd.f32 %v2800_v2, %v2799_v14 }
 0x262   :  { %v2749_v12 = vrot.slane %v2748_v60, 4  ;;  %v2803_v23 = vadd.f32 %v2802_v36, %v2801_v27 }
 0x264   :  { %v2750_v49 = vadd.f32 %v2749_v12, %v2748_v60  ;;  %v2804_v22 = vrot.slane %v2803_v23, 4 }
 0x266   :  { %v2751_v26 = vrot.slane %v2750_v49, 2  ;;  %v2805_v1 = vadd.f32 %v2804_v22, %v2803_v23 }
 0x268   :  { %v2752_v62 = vadd.f32 %v2751_v26, %v2750_v49  ;;  %v2806_v47 = vrot.slane %v2805_v1, 2 }
 0x26a   :  { %v2753_v11 = vrot.slane %v2752_v62, 1  ;;  %v2807_v38 = vadd.f32 %v2806_v47, %v2805_v1 }
 0x26c   :  { %v2754_v45 = vadd.f32 %v2753_v11, %v2752_v62  ;;  %v2808_v15 = vrot.slane %v2807_v38, 1 }
 0x26e   :  { %2756 = vst.msk [vmem:[%s4476_s6] sm:$0x1] %vm140_vm0, %v2754_v45  ;;  %v2809_v5 = vadd.f32 %v2808_v15, %v2807_v38 }
 0x270   :  { %2810 = vst.msk [vmem:[%s4477_s7] sm:$0x1] %vm140_vm0, %v2809_v5 }

</bundles_post_ra>
